<compile_context>
chip_gen: v6e
topology: v6e:2x2x1
jax: 0.10.0
libtpu: 0.0.40
codegen_flags: <defaults>
</compile_context>

<pallas_src>
import functools

import numpy as np

import jax
import jax.numpy as jnp
from jax.experimental import pallas as pl
from jax.experimental.pallas import tpu as pltpu


# ----------------------------- Pallas kernel ------------------------------ #

def _conv_kernel(x_ref, w_ref, m_ref, b_ref, o_ref, xf_ref, *,
                 K, pad, H, W, Cin, Cout, NB, G, mask_trivial):
    """Lane-dense direct conv for one batch-block.

    x_ref : (NB*Cin, H*W)        flattened input planes, VMEM.
    w_ref : (K*K, Cout, NB*Cin, 1) per-tap weight columns, VMEM.
    m_ref : (K*K, 1, H*W)        per-tap 0/1 boundary masks, VMEM.
    b_ref : (Cout,)              bias, SMEM.
    o_ref : (NB, Cout, H*W)      flattened output planes, VMEM.
    xf_ref: (NB*Cin, 2*G + H*W)  scratch with zero guard bands, VMEM.
    """
    HW = H * W
    RB = NB * Cin
    f32 = jnp.float32

    # ---- in-kernel zero padding: zero the guard bands, copy the interior ----
    zg = jnp.zeros((RB, G), f32)
    xf_ref[:, pl.ds(0, G)] = zg                    # leading guard  (aligned)
    xf_ref[:, pl.ds(G + HW, G)] = zg               # trailing guard (aligned)
    xf_ref[:, pl.ds(G, HW)] = x_ref[...].astype(f32)   # interior     (aligned)

    # ---- hoisted bias scalars (read once) ----
    bias = [b_ref[co] for co in range(Cout)]

    # ---- K*K shifted-window MACs; each shifted load shared by all Cout ----
    acc = [jnp.zeros((RB, HW), f32) for _ in range(Cout)]
    t = 0
    for kh in range(K):
        for kw in range(K):
            d = (kh - pad) * W + (kw - pad)
            patch = xf_ref[:, pl.ds(G + d, HW)]        # (RB, HW), lane dense
            if not mask_trivial[t]:
                patch = patch * m_ref[t]               # (1, HW) boundary mask
            for co in range(Cout):
                # (RB, 1) weight column broadcast along lanes.
                acc[co] = acc[co] + w_ref[t, co] * patch
            t += 1

    # ---- reduce the Cin rows of each batch element, add bias, dense store ----
    for co in range(Cout):
        a = acc[co]
        for nb in range(NB):
            r0 = nb * Cin
            seg = a[r0:r0 + 1, :]
            for ci in range(1, Cin):
                seg = seg + a[r0 + ci:r0 + ci + 1, :]
            o_ref[nb, pl.ds(co, 1), :] = (seg + bias[co]).astype(o_ref.dtype)


# ------------------------------- wrapper ----------------------------------- #

def conv_layer1_forward(params, x, *, stride=1):
    """x: (N, Cin, H, W) NCHW. params: {'weight': (Cout,Cin,K,K), 'bias': (Cout,)}."""
    w = params["weight"]
    b = params["bias"]
    Cout, Cin, K, _ = w.shape
    N, Cin_x, H, W = x.shape
    assert Cin_x == Cin
    pad = (K - 1) // 2
    Ho = (H + 2 * pad - K) // stride + 1
    Wo = (W + 2 * pad - K) // stride + 1
    HW = H * W

    # Batch-block size: pack NB*Cin rows onto the 8 sublanes of a vreg.
    NB = max(1, min(N, 8 // Cin)) if Cin <= 8 else 1
    while NB > 1 and N % NB != 0:
        NB -= 1
    RB = NB * Cin
    if RB % 8 != 0 and RB != N * Cin:      # keep the sublane block tile-legal
        NB, RB = N, N * Cin

    # Guard band: >= largest |tap shift|, 128-aligned so the interior copy is aligned.
    max_shift = max(pad * (W + 1), (K - 1 - pad) * (W + 1), 1)
    G = ((max_shift + 127) // 128) * 128

    # ---- host-side prep (copy-free reshape + tiny constant tensors) ----
    x2d = x.reshape(N * Cin, HW)                               # free reshape
    w_cols = jnp.tile(
        w.astype(jnp.float32).reshape(Cout, Cin, K * K).transpose(2, 0, 1),
        (1, 1, NB))[..., None]                                 # (K*K, Cout, RB, 1)
    b_f32 = b.astype(jnp.float32)

    # Per-tap boundary masks over the flattened plane (trace-time numpy).
    mask_np = np.zeros((K * K, 1, HW), np.float32)
    trivial = []
    hh = np.arange(H)[:, None]
    ww = np.arange(W)[None, :]
    t = 0
    for kh in range(K):
        for kw in range(K):
            dy, dx = kh - pad, kw - pad
            valid = ((hh + dy >= 0) & (hh + dy < H) &
                     (ww + dx >= 0) & (ww + dx < W))
            mask_np[t, 0] = valid.reshape(HW)
            trivial.append(bool(valid.all()))
            t += 1
    masks = jnp.asarray(mask_np)

    kernel = functools.partial(
        _conv_kernel, K=K, pad=pad, H=H, W=W, Cin=Cin, Cout=Cout,
        NB=NB, G=G, mask_trivial=tuple(trivial))

    out_flat = pl.pallas_call(
        kernel,
        out_shape=jax.ShapeDtypeStruct((N, Cout, HW), x.dtype),
        grid=(N // NB,),
        in_specs=[
            pl.BlockSpec((RB, HW), lambda bb: (bb, 0)),                   # activations
            pl.BlockSpec((K * K, Cout, RB, 1), lambda bb: (0, 0, 0, 0)),  # weight cols
            pl.BlockSpec((K * K, 1, HW), lambda bb: (0, 0, 0)),           # tap masks
            pl.BlockSpec(memory_space=pltpu.MemorySpace.SMEM),            # bias
        ],
        out_specs=pl.BlockSpec((NB, Cout, HW), lambda bb: (bb, 0, 0)),
        scratch_shapes=[pltpu.VMEM((RB, 2 * G + HW), jnp.float32)],
        compiler_params=pltpu.CompilerParams(
            dimension_semantics=("parallel",),
            vmem_limit_bytes=32 * 1024 * 1024),
    )(x2d, w_cols, masks, b_f32)

    out = out_flat.reshape(N, Cout, H, W)
    if stride != 1 or Ho != H or Wo != W:
        # TODO(synk): stride>1 / even K recomputes the dense stride-1 map and
        # decimates here; a strided kernel variant would avoid ~stride^2 extra MACs.
        out = out[:, :, ::stride, ::stride][:, :, :Ho, :Wo]
    return out


# --------------------------- parameter creation ---------------------------- #

def init_params(key, in_channels, out_channels, kernel_size):
    kw_, kb_ = jax.random.split(key)
    fan_in = in_channels * kernel_size * kernel_size
    fan_out = out_channels * kernel_size * kernel_size
    std = (2.0 / (fan_in + fan_out)) ** 0.5          # xavier_normal_
    weight = std * jax.random.normal(
        kw_, (out_channels, in_channels, kernel_size, kernel_size), jnp.float32)
    bound = 1.0 / fan_in ** 0.5                       # Conv2d default bias init
    bias = jax.random.uniform(kb_, (out_channels,), jnp.float32, -bound, bound)
    return {"weight": weight, "bias": bias}


# -------------------------- pure-JAX reference ----------------------------- #

def _ref_forward(params, x, *, stride=1):
    K = params["weight"].shape[2]
    pad = (K - 1) // 2
    out = jax.lax.conv_general_dilated(
        x, params["weight"], window_strides=(stride, stride),
        padding=[(pad, pad), (pad, pad)],
        dimension_numbers=("NCHW", "OIHW", "NCHW"))
    return out + params["bias"].reshape(1, -1, 1, 1)


# --------------------------------- main ------------------------------------ #

if __name__ == "__main__":
    in_channels, out_channels, kernel_size, stride = 4, 8, 3, 1
    N, H, W = 2, 16, 16

    key = jax.random.PRNGKey(0)
    kp, kx = jax.random.split(key)
    params = init_params(kp, in_channels, out_channels, kernel_size)
    x = jax.random.normal(kx, (N, in_channels, H, W), jnp.float32)

    fwd = jax.jit(functools.partial(conv_layer1_forward, stride=stride))
    out = jax.block_until_ready(fwd(params, x))

    ref = jax.block_until_ready(_ref_forward(params, x, stride=stride))
    assert out.shape == ref.shape, (out.shape, ref.shape)
    assert jnp.allclose(out, ref, atol=1e-4, rtol=1e-4), "mismatch vs reference"

    print("KERNEL_OK")
</pallas_src>

<mosaic_0001>
module attributes {stable_mosaic.version = 11 : i64} {
  func.func @_conv_kernel(%arg0: i32, %arg1: memref<8x256xf32, #tpu.memory_space<vmem>>, %arg2: memref<9x8x8x1xf32, #tpu.memory_space<vmem>>, %arg3: memref<9x1x256xf32, #tpu.memory_space<vmem>>, %arg4: memref<8xf32, #tpu.memory_space<smem>>, %arg5: memref<2x8x256xf32, #tpu.memory_space<vmem>>, %arg6: memref<8x512xf32, #tpu.memory_space<vmem>>) attributes {dimension_semantics = [#tpu.dimension_semantics<parallel>], iteration_bounds = array<i64: 1>, scalar_prefetch = 0 : i64, scratch_operands = 1 : i64, tpu.core_type = #tpu.core_type<tc>, window_params = [{transform_indices = @transform_0, window_bounds = array<i64: 8, 256>}, {pipeline_mode = #tpu.pipeline_mode<synchronous>, transform_indices = @transform_1, window_bounds = array<i64: 9, 8, 8, 1>}, {pipeline_mode = #tpu.pipeline_mode<synchronous>, transform_indices = @transform_2, window_bounds = array<i64: 9, 1, 256>}, {transform_indices = @transform_3, window_bounds = array<i64: 8>}, {transform_indices = @transform_4, window_bounds = array<i64: 2, 8, 256>}]} {
    %cst = arith.constant 0.000000e+00 : f32
    %0 = vector.broadcast %cst : f32 to vector<8x128xf32>
    %c0 = arith.constant 0 : index
    %c0_0 = arith.constant 0 : index
    %1 = vector.load %arg6[%c0, %c0_0] : memref<8x512xf32, #tpu.memory_space<vmem>>, vector<8x128xf32>
    tpu.vector_store %arg6[%c0, %c0_0], %0 {strides = array<i32>} : memref<8x512xf32, #tpu.memory_space<vmem>>, vector<8x128xf32>,
    %c0_1 = arith.constant 0 : index
    %c384 = arith.constant 384 : index
    %2 = vector.load %arg6[%c0_1, %c384] : memref<8x512xf32, #tpu.memory_space<vmem>>, vector<8x128xf32>
    tpu.vector_store %arg6[%c0_1, %c384], %0 {strides = array<i32>} : memref<8x512xf32, #tpu.memory_space<vmem>>, vector<8x128xf32>,
    %c0_2 = arith.constant 0 : index
    %c0_3 = arith.constant 0 : index
    %3 = vector.load %arg1[%c0_2, %c0_3] : memref<8x256xf32, #tpu.memory_space<vmem>>, vector<8x256xf32>
    %c0_4 = arith.constant 0 : index
    %c128 = arith.constant 128 : index
    %4 = vector.load %arg6[%c0_4, %c128] : memref<8x512xf32, #tpu.memory_space<vmem>>, vector<8x256xf32>
    tpu.vector_store %arg6[%c0_4, %c128], %3 {strides = array<i32>} : memref<8x512xf32, #tpu.memory_space<vmem>>, vector<8x256xf32>,
    %c0_5 = arith.constant 0 : index
    %5 = memref.load %arg4[%c0_5] : memref<8xf32, #tpu.memory_space<smem>>
    %c1 = arith.constant 1 : index
    %6 = memref.load %arg4[%c1] : memref<8xf32, #tpu.memory_space<smem>>
    %c2 = arith.constant 2 : index
    %7 = memref.load %arg4[%c2] : memref<8xf32, #tpu.memory_space<smem>>
    %c3 = arith.constant 3 : index
    %8 = memref.load %arg4[%c3] : memref<8xf32, #tpu.memory_space<smem>>
    %c4 = arith.constant 4 : index
    %9 = memref.load %arg4[%c4] : memref<8xf32, #tpu.memory_space<smem>>
    %c5 = arith.constant 5 : index
    %10 = memref.load %arg4[%c5] : memref<8xf32, #tpu.memory_space<smem>>
    %c6 = arith.constant 6 : index
    %11 = memref.load %arg4[%c6] : memref<8xf32, #tpu.memory_space<smem>>
    %c7 = arith.constant 7 : index
    %12 = memref.load %arg4[%c7] : memref<8xf32, #tpu.memory_space<smem>>
    %cst_6 = arith.constant 0.000000e+00 : f32
    %13 = vector.broadcast %cst_6 : f32 to vector<8x256xf32>
    %cst_7 = arith.constant 0.000000e+00 : f32
    %14 = vector.broadcast %cst_7 : f32 to vector<8x256xf32>
    %cst_8 = arith.constant 0.000000e+00 : f32
    %15 = vector.broadcast %cst_8 : f32 to vector<8x256xf32>
    %cst_9 = arith.constant 0.000000e+00 : f32
    %16 = vector.broadcast %cst_9 : f32 to vector<8x256xf32>
    %cst_10 = arith.constant 0.000000e+00 : f32
    %17 = vector.broadcast %cst_10 : f32 to vector<8x256xf32>
    %cst_11 = arith.constant 0.000000e+00 : f32
    %18 = vector.broadcast %cst_11 : f32 to vector<8x256xf32>
    %cst_12 = arith.constant 0.000000e+00 : f32
    %19 = vector.broadcast %cst_12 : f32 to vector<8x256xf32>
    %cst_13 = arith.constant 0.000000e+00 : f32
    %20 = vector.broadcast %cst_13 : f32 to vector<8x256xf32>
    %c0_14 = arith.constant 0 : index
    %c111 = arith.constant 111 : index
    %21 = vector.load %arg6[%c0_14, %c111] : memref<8x512xf32, #tpu.memory_space<vmem>>, vector<8x256xf32>
    %c0_15 = arith.constant 0 : index
    %c0_16 = arith.constant 0 : index
    %c0_17 = arith.constant 0 : index
    %22 = vector.load %arg3[%c0_15, %c0_16, %c0_17] : memref<9x1x256xf32, #tpu.memory_space<vmem>>, vector<1x1x256xf32>
    %23 = vector.shape_cast %22 : vector<1x1x256xf32> to vector<1x256xf32>
    %24 = vector.broadcast %23 : vector<1x256xf32> to vector<8x256xf32>
    %25 = arith.mulf %21, %24 : vector<8x256xf32>
    %c0_18 = arith.constant 0 : index
    %c0_19 = arith.constant 0 : index
    %c0_20 = arith.constant 0 : index
    %c0_21 = arith.constant 0 : index
    %26 = vector.load %arg2[%c0_18, %c0_19, %c0_20, %c0_21] : memref<9x8x8x1xf32, #tpu.memory_space<vmem>>, vector<1x1x8x1xf32>
    %27 = vector.shape_cast %26 : vector<1x1x8x1xf32> to vector<8x1xf32>
    %28 = vector.broadcast %27 : vector<8x1xf32> to vector<8x256xf32>
    %29 = arith.mulf %28, %25 : vector<8x256xf32>
    %30 = arith.addf %13, %29 : vector<8x256xf32>
    %c0_22 = arith.constant 0 : index
    %c1_23 = arith.constant 1 : index
    %c0_24 = arith.constant 0 : index
    %c0_25 = arith.constant 0 : index
    %31 = vector.load %arg2[%c0_22, %c1_23, %c0_24, %c0_25] : memref<9x8x8x1xf32, #tpu.memory_space<vmem>>, vector<1x1x8x1xf32>
    %32 = vector.shape_cast %31 : vector<1x1x8x1xf32> to vector<8x1xf32>
    %33 = vector.broadcast %32 : vector<8x1xf32> to vector<8x256xf32>
    %34 = arith.mulf %33, %25 : vector<8x256xf32>
    %35 = arith.addf %14, %34 : vector<8x256xf32>
    %c0_26 = arith.constant 0 : index
    %c2_27 = arith.constant 2 : index
    %c0_28 = arith.constant 0 : index
    %c0_29 = arith.constant 0 : index
    %36 = vector.load %arg2[%c0_26, %c2_27, %c0_28, %c0_29] : memref<9x8x8x1xf32, #tpu.memory_space<vmem>>, vector<1x1x8x1xf32>
    %37 = vector.shape_cast %36 : vector<1x1x8x1xf32> to vector<8x1xf32>
    %38 = vector.broadcast %37 : vector<8x1xf32> to vector<8x256xf32>
    %39 = arith.mulf %38, %25 : vector<8x256xf32>
    %40 = arith.addf %15, %39 : vector<8x256xf32>
    %c0_30 = arith.constant 0 : index
    %c3_31 = arith.constant 3 : index
    %c0_32 = arith.constant 0 : index
    %c0_33 = arith.constant 0 : index
    %41 = vector.load %arg2[%c0_30, %c3_31, %c0_32, %c0_33] : memref<9x8x8x1xf32, #tpu.memory_space<vmem>>, vector<1x1x8x1xf32>
    %42 = vector.shape_cast %41 : vector<1x1x8x1xf32> to vector<8x1xf32>
    %43 = vector.broadcast %42 : vector<8x1xf32> to vector<8x256xf32>
    %44 = arith.mulf %43, %25 : vector<8x256xf32>
    %45 = arith.addf %16, %44 : vector<8x256xf32>
    %c0_34 = arith.constant 0 : index
    %c4_35 = arith.constant 4 : index
    %c0_36 = arith.constant 0 : index
    %c0_37 = arith.constant 0 : index
    %46 = vector.load %arg2[%c0_34, %c4_35, %c0_36, %c0_37] : memref<9x8x8x1xf32, #tpu.memory_space<vmem>>, vector<1x1x8x1xf32>
    %47 = vector.shape_cast %46 : vector<1x1x8x1xf32> to vector<8x1xf32>
    %48 = vector.broadcast %47 : vector<8x1xf32> to vector<8x256xf32>
    %49 = arith.mulf %48, %25 : vector<8x256xf32>
    %50 = arith.addf %17, %49 : vector<8x256xf32>
    %c0_38 = arith.constant 0 : index
    %c5_39 = arith.constant 5 : index
    %c0_40 = arith.constant 0 : index
    %c0_41 = arith.constant 0 : index
    %51 = vector.load %arg2[%c0_38, %c5_39, %c0_40, %c0_41] : memref<9x8x8x1xf32, #tpu.memory_space<vmem>>, vector<1x1x8x1xf32>
    %52 = vector.shape_cast %51 : vector<1x1x8x1xf32> to vector<8x1xf32>
    %53 = vector.broadcast %52 : vector<8x1xf32> to vector<8x256xf32>
    %54 = arith.mulf %53, %25 : vector<8x256xf32>
    %55 = arith.addf %18, %54 : vector<8x256xf32>
    %c0_42 = arith.constant 0 : index
    %c6_43 = arith.constant 6 : index
    %c0_44 = arith.constant 0 : index
    %c0_45 = arith.constant 0 : index
    %56 = vector.load %arg2[%c0_42, %c6_43, %c0_44, %c0_45] : memref<9x8x8x1xf32, #tpu.memory_space<vmem>>, vector<1x1x8x1xf32>
    %57 = vector.shape_cast %56 : vector<1x1x8x1xf32> to vector<8x1xf32>
    %58 = vector.broadcast %57 : vector<8x1xf32> to vector<8x256xf32>
    %59 = arith.mulf %58, %25 : vector<8x256xf32>
    %60 = arith.addf %19, %59 : vector<8x256xf32>
    %c0_46 = arith.constant 0 : index
    %c7_47 = arith.constant 7 : index
    %c0_48 = arith.constant 0 : index
    %c0_49 = arith.constant 0 : index
    %61 = vector.load %arg2[%c0_46, %c7_47, %c0_48, %c0_49] : memref<9x8x8x1xf32, #tpu.memory_space<vmem>>, vector<1x1x8x1xf32>
    %62 = vector.shape_cast %61 : vector<1x1x8x1xf32> to vector<8x1xf32>
    %63 = vector.broadcast %62 : vector<8x1xf32> to vector<8x256xf32>
    %64 = arith.mulf %63, %25 : vector<8x256xf32>
    %65 = arith.addf %20, %64 : vector<8x256xf32>
    %c0_50 = arith.constant 0 : index
    %c112 = arith.constant 112 : index
    %66 = vector.load %arg6[%c0_50, %c112] : memref<8x512xf32, #tpu.memory_space<vmem>>, vector<8x256xf32>
    %c1_51 = arith.constant 1 : index
    %c0_52 = arith.constant 0 : index
    %c0_53 = arith.constant 0 : index
    %67 = vector.load %arg3[%c1_51, %c0_52, %c0_53] : memref<9x1x256xf32, #tpu.memory_space<vmem>>, vector<1x1x256xf32>
    %68 = vector.shape_cast %67 : vector<1x1x256xf32> to vector<1x256xf32>
    %69 = vector.broadcast %68 : vector<1x256xf32> to vector<8x256xf32>
    %70 = arith.mulf %66, %69 : vector<8x256xf32>
    %c1_54 = arith.constant 1 : index
    %c0_55 = arith.constant 0 : index
    %c0_56 = arith.constant 0 : index
    %c0_57 = arith.constant 0 : index
    %71 = vector.load %arg2[%c1_54, %c0_55, %c0_56, %c0_57] : memref<9x8x8x1xf32, #tpu.memory_space<vmem>>, vector<1x1x8x1xf32>
    %72 = vector.shape_cast %71 : vector<1x1x8x1xf32> to vector<8x1xf32>
    %73 = vector.broadcast %72 : vector<8x1xf32> to vector<8x256xf32>
    %74 = arith.mulf %73, %70 : vector<8x256xf32>
    %75 = arith.addf %30, %74 : vector<8x256xf32>
    %c1_58 = arith.constant 1 : index
    %c1_59 = arith.constant 1 : index
    %c0_60 = arith.constant 0 : index
    %c0_61 = arith.constant 0 : index
    %76 = vector.load %arg2[%c1_58, %c1_59, %c0_60, %c0_61] : memref<9x8x8x1xf32, #tpu.memory_space<vmem>>, vector<1x1x8x1xf32>
    %77 = vector.shape_cast %76 : vector<1x1x8x1xf32> to vector<8x1xf32>
    %78 = vector.broadcast %77 : vector<8x1xf32> to vector<8x256xf32>
    %79 = arith.mulf %78, %70 : vector<8x256xf32>
    %80 = arith.addf %35, %79 : vector<8x256xf32>
    %c1_62 = arith.constant 1 : index
    %c2_63 = arith.constant 2 : index
    %c0_64 = arith.constant 0 : index
    %c0_65 = arith.constant 0 : index
    %81 = vector.load %arg2[%c1_62, %c2_63, %c0_64, %c0_65] : memref<9x8x8x1xf32, #tpu.memory_space<vmem>>, vector<1x1x8x1xf32>
    %82 = vector.shape_cast %81 : vector<1x1x8x1xf32> to vector<8x1xf32>
    %83 = vector.broadcast %82 : vector<8x1xf32> to vector<8x256xf32>
    %84 = arith.mulf %83, %70 : vector<8x256xf32>
    %85 = arith.addf %40, %84 : vector<8x256xf32>
    %c1_66 = arith.constant 1 : index
    %c3_67 = arith.constant 3 : index
    %c0_68 = arith.constant 0 : index
    %c0_69 = arith.constant 0 : index
    %86 = vector.load %arg2[%c1_66, %c3_67, %c0_68, %c0_69] : memref<9x8x8x1xf32, #tpu.memory_space<vmem>>, vector<1x1x8x1xf32>
    %87 = vector.shape_cast %86 : vector<1x1x8x1xf32> to vector<8x1xf32>
    %88 = vector.broadcast %87 : vector<8x1xf32> to vector<8x256xf32>
    %89 = arith.mulf %88, %70 : vector<8x256xf32>
    %90 = arith.addf %45, %89 : vector<8x256xf32>
    %c1_70 = arith.constant 1 : index
    %c4_71 = arith.constant 4 : index
    %c0_72 = arith.constant 0 : index
    %c0_73 = arith.constant 0 : index
    %91 = vector.load %arg2[%c1_70, %c4_71, %c0_72, %c0_73] : memref<9x8x8x1xf32, #tpu.memory_space<vmem>>, vector<1x1x8x1xf32>
    %92 = vector.shape_cast %91 : vector<1x1x8x1xf32> to vector<8x1xf32>
    %93 = vector.broadcast %92 : vector<8x1xf32> to vector<8x256xf32>
    %94 = arith.mulf %93, %70 : vector<8x256xf32>
    %95 = arith.addf %50, %94 : vector<8x256xf32>
    %c1_74 = arith.constant 1 : index
    %c5_75 = arith.constant 5 : index
    %c0_76 = arith.constant 0 : index
    %c0_77 = arith.constant 0 : index
    %96 = vector.load %arg2[%c1_74, %c5_75, %c0_76, %c0_77] : memref<9x8x8x1xf32, #tpu.memory_space<vmem>>, vector<1x1x8x1xf32>
    %97 = vector.shape_cast %96 : vector<1x1x8x1xf32> to vector<8x1xf32>
    %98 = vector.broadcast %97 : vector<8x1xf32> to vector<8x256xf32>
    %99 = arith.mulf %98, %70 : vector<8x256xf32>
    %100 = arith.addf %55, %99 : vector<8x256xf32>
    %c1_78 = arith.constant 1 : index
    %c6_79 = arith.constant 6 : index
    %c0_80 = arith.constant 0 : index
    %c0_81 = arith.constant 0 : index
    %101 = vector.load %arg2[%c1_78, %c6_79, %c0_80, %c0_81] : memref<9x8x8x1xf32, #tpu.memory_space<vmem>>, vector<1x1x8x1xf32>
    %102 = vector.shape_cast %101 : vector<1x1x8x1xf32> to vector<8x1xf32>
    %103 = vector.broadcast %102 : vector<8x1xf32> to vector<8x256xf32>
    %104 = arith.mulf %103, %70 : vector<8x256xf32>
    %105 = arith.addf %60, %104 : vector<8x256xf32>
    %c1_82 = arith.constant 1 : index
    %c7_83 = arith.constant 7 : index
    %c0_84 = arith.constant 0 : index
    %c0_85 = arith.constant 0 : index
    %106 = vector.load %arg2[%c1_82, %c7_83, %c0_84, %c0_85] : memref<9x8x8x1xf32, #tpu.memory_space<vmem>>, vector<1x1x8x1xf32>
    %107 = vector.shape_cast %106 : vector<1x1x8x1xf32> to vector<8x1xf32>
    %108 = vector.broadcast %107 : vector<8x1xf32> to vector<8x256xf32>
    %109 = arith.mulf %108, %70 : vector<8x256xf32>
    %110 = arith.addf %65, %109 : vector<8x256xf32>
    %c0_86 = arith.constant 0 : index
    %c113 = arith.constant 113 : index
    %111 = vector.load %arg6[%c0_86, %c113] : memref<8x512xf32, #tpu.memory_space<vmem>>, vector<8x256xf32>
    %c2_87 = arith.constant 2 : index
    %c0_88 = arith.constant 0 : index
    %c0_89 = arith.constant 0 : index
    %112 = vector.load %arg3[%c2_87, %c0_88, %c0_89] : memref<9x1x256xf32, #tpu.memory_space<vmem>>, vector<1x1x256xf32>
    %113 = vector.shape_cast %112 : vector<1x1x256xf32> to vector<1x256xf32>
    %114 = vector.broadcast %113 : vector<1x256xf32> to vector<8x256xf32>
    %115 = arith.mulf %111, %114 : vector<8x256xf32>
    %c2_90 = arith.constant 2 : index
    %c0_91 = arith.constant 0 : index
    %c0_92 = arith.constant 0 : index
    %c0_93 = arith.constant 0 : index
    %116 = vector.load %arg2[%c2_90, %c0_91, %c0_92, %c0_93] : memref<9x8x8x1xf32, #tpu.memory_space<vmem>>, vector<1x1x8x1xf32>
    %117 = vector.shape_cast %116 : vector<1x1x8x1xf32> to vector<8x1xf32>
    %118 = vector.broadcast %117 : vector<8x1xf32> to vector<8x256xf32>
    %119 = arith.mulf %118, %115 : vector<8x256xf32>
    %120 = arith.addf %75, %119 : vector<8x256xf32>
    %c2_94 = arith.constant 2 : index
    %c1_95 = arith.constant 1 : index
    %c0_96 = arith.constant 0 : index
    %c0_97 = arith.constant 0 : index
    %121 = vector.load %arg2[%c2_94, %c1_95, %c0_96, %c0_97] : memref<9x8x8x1xf32, #tpu.memory_space<vmem>>, vector<1x1x8x1xf32>
    %122 = vector.shape_cast %121 : vector<1x1x8x1xf32> to vector<8x1xf32>
    %123 = vector.broadcast %122 : vector<8x1xf32> to vector<8x256xf32>
    %124 = arith.mulf %123, %115 : vector<8x256xf32>
    %125 = arith.addf %80, %124 : vector<8x256xf32>
    %c2_98 = arith.constant 2 : index
    %c2_99 = arith.constant 2 : index
    %c0_100 = arith.constant 0 : index
    %c0_101 = arith.constant 0 : index
    %126 = vector.load %arg2[%c2_98, %c2_99, %c0_100, %c0_101] : memref<9x8x8x1xf32, #tpu.memory_space<vmem>>, vector<1x1x8x1xf32>
    %127 = vector.shape_cast %126 : vector<1x1x8x1xf32> to vector<8x1xf32>
    %128 = vector.broadcast %127 : vector<8x1xf32> to vector<8x256xf32>
    %129 = arith.mulf %128, %115 : vector<8x256xf32>
    %130 = arith.addf %85, %129 : vector<8x256xf32>
    %c2_102 = arith.constant 2 : index
    %c3_103 = arith.constant 3 : index
    %c0_104 = arith.constant 0 : index
    %c0_105 = arith.constant 0 : index
    %131 = vector.load %arg2[%c2_102, %c3_103, %c0_104, %c0_105] : memref<9x8x8x1xf32, #tpu.memory_space<vmem>>, vector<1x1x8x1xf32>
    %132 = vector.shape_cast %131 : vector<1x1x8x1xf32> to vector<8x1xf32>
    %133 = vector.broadcast %132 : vector<8x1xf32> to vector<8x256xf32>
    %134 = arith.mulf %133, %115 : vector<8x256xf32>
    %135 = arith.addf %90, %134 : vector<8x256xf32>
    %c2_106 = arith.constant 2 : index
    %c4_107 = arith.constant 4 : index
    %c0_108 = arith.constant 0 : index
    %c0_109 = arith.constant 0 : index
    %136 = vector.load %arg2[%c2_106, %c4_107, %c0_108, %c0_109] : memref<9x8x8x1xf32, #tpu.memory_space<vmem>>, vector<1x1x8x1xf32>
    %137 = vector.shape_cast %136 : vector<1x1x8x1xf32> to vector<8x1xf32>
    %138 = vector.broadcast %137 : vector<8x1xf32> to vector<8x256xf32>
    %139 = arith.mulf %138, %115 : vector<8x256xf32>
    %140 = arith.addf %95, %139 : vector<8x256xf32>
    %c2_110 = arith.constant 2 : index
    %c5_111 = arith.constant 5 : index
    %c0_112 = arith.constant 0 : index
    %c0_113 = arith.constant 0 : index
    %141 = vector.load %arg2[%c2_110, %c5_111, %c0_112, %c0_113] : memref<9x8x8x1xf32, #tpu.memory_space<vmem>>, vector<1x1x8x1xf32>
    %142 = vector.shape_cast %141 : vector<1x1x8x1xf32> to vector<8x1xf32>
    %143 = vector.broadcast %142 : vector<8x1xf32> to vector<8x256xf32>
    %144 = arith.mulf %143, %115 : vector<8x256xf32>
    %145 = arith.addf %100, %144 : vector<8x256xf32>
    %c2_114 = arith.constant 2 : index
    %c6_115 = arith.constant 6 : index
    %c0_116 = arith.constant 0 : index
    %c0_117 = arith.constant 0 : index
    %146 = vector.load %arg2[%c2_114, %c6_115, %c0_116, %c0_117] : memref<9x8x8x1xf32, #tpu.memory_space<vmem>>, vector<1x1x8x1xf32>
    %147 = vector.shape_cast %146 : vector<1x1x8x1xf32> to vector<8x1xf32>
    %148 = vector.broadcast %147 : vector<8x1xf32> to vector<8x256xf32>
    %149 = arith.mulf %148, %115 : vector<8x256xf32>
    %150 = arith.addf %105, %149 : vector<8x256xf32>
    %c2_118 = arith.constant 2 : index
    %c7_119 = arith.constant 7 : index
    %c0_120 = arith.constant 0 : index
    %c0_121 = arith.constant 0 : index
    %151 = vector.load %arg2[%c2_118, %c7_119, %c0_120, %c0_121] : memref<9x8x8x1xf32, #tpu.memory_space<vmem>>, vector<1x1x8x1xf32>
    %152 = vector.shape_cast %151 : vector<1x1x8x1xf32> to vector<8x1xf32>
    %153 = vector.broadcast %152 : vector<8x1xf32> to vector<8x256xf32>
    %154 = arith.mulf %153, %115 : vector<8x256xf32>
    %155 = arith.addf %110, %154 : vector<8x256xf32>
    %c0_122 = arith.constant 0 : index
    %c127 = arith.constant 127 : index
    %156 = vector.load %arg6[%c0_122, %c127] : memref<8x512xf32, #tpu.memory_space<vmem>>, vector<8x256xf32>
    %c3_123 = arith.constant 3 : index
    %c0_124 = arith.constant 0 : index
    %c0_125 = arith.constant 0 : index
    %157 = vector.load %arg3[%c3_123, %c0_124, %c0_125] : memref<9x1x256xf32, #tpu.memory_space<vmem>>, vector<1x1x256xf32>
    %158 = vector.shape_cast %157 : vector<1x1x256xf32> to vector<1x256xf32>
    %159 = vector.broadcast %158 : vector<1x256xf32> to vector<8x256xf32>
    %160 = arith.mulf %156, %159 : vector<8x256xf32>
    %c3_126 = arith.constant 3 : index
    %c0_127 = arith.constant 0 : index
    %c0_128 = arith.constant 0 : index
    %c0_129 = arith.constant 0 : index
    %161 = vector.load %arg2[%c3_126, %c0_127, %c0_128, %c0_129] : memref<9x8x8x1xf32, #tpu.memory_space<vmem>>, vector<1x1x8x1xf32>
    %162 = vector.shape_cast %161 : vector<1x1x8x1xf32> to vector<8x1xf32>
    %163 = vector.broadcast %162 : vector<8x1xf32> to vector<8x256xf32>
    %164 = arith.mulf %163, %160 : vector<8x256xf32>
    %165 = arith.addf %120, %164 : vector<8x256xf32>
    %c3_130 = arith.constant 3 : index
    %c1_131 = arith.constant 1 : index
    %c0_132 = arith.constant 0 : index
    %c0_133 = arith.constant 0 : index
    %166 = vector.load %arg2[%c3_130, %c1_131, %c0_132, %c0_133] : memref<9x8x8x1xf32, #tpu.memory_space<vmem>>, vector<1x1x8x1xf32>
    %167 = vector.shape_cast %166 : vector<1x1x8x1xf32> to vector<8x1xf32>
    %168 = vector.broadcast %167 : vector<8x1xf32> to vector<8x256xf32>
    %169 = arith.mulf %168, %160 : vector<8x256xf32>
    %170 = arith.addf %125, %169 : vector<8x256xf32>
    %c3_134 = arith.constant 3 : index
    %c2_135 = arith.constant 2 : index
    %c0_136 = arith.constant 0 : index
    %c0_137 = arith.constant 0 : index
    %171 = vector.load %arg2[%c3_134, %c2_135, %c0_136, %c0_137] : memref<9x8x8x1xf32, #tpu.memory_space<vmem>>, vector<1x1x8x1xf32>
    %172 = vector.shape_cast %171 : vector<1x1x8x1xf32> to vector<8x1xf32>
    %173 = vector.broadcast %172 : vector<8x1xf32> to vector<8x256xf32>
    %174 = arith.mulf %173, %160 : vector<8x256xf32>
    %175 = arith.addf %130, %174 : vector<8x256xf32>
    %c3_138 = arith.constant 3 : index
    %c3_139 = arith.constant 3 : index
    %c0_140 = arith.constant 0 : index
    %c0_141 = arith.constant 0 : index
    %176 = vector.load %arg2[%c3_138, %c3_139, %c0_140, %c0_141] : memref<9x8x8x1xf32, #tpu.memory_space<vmem>>, vector<1x1x8x1xf32>
    %177 = vector.shape_cast %176 : vector<1x1x8x1xf32> to vector<8x1xf32>
    %178 = vector.broadcast %177 : vector<8x1xf32> to vector<8x256xf32>
    %179 = arith.mulf %178, %160 : vector<8x256xf32>
    %180 = arith.addf %135, %179 : vector<8x256xf32>
    %c3_142 = arith.constant 3 : index
    %c4_143 = arith.constant 4 : index
    %c0_144 = arith.constant 0 : index
    %c0_145 = arith.constant 0 : index
    %181 = vector.load %arg2[%c3_142, %c4_143, %c0_144, %c0_145] : memref<9x8x8x1xf32, #tpu.memory_space<vmem>>, vector<1x1x8x1xf32>
    %182 = vector.shape_cast %181 : vector<1x1x8x1xf32> to vector<8x1xf32>
    %183 = vector.broadcast %182 : vector<8x1xf32> to vector<8x256xf32>
    %184 = arith.mulf %183, %160 : vector<8x256xf32>
    %185 = arith.addf %140, %184 : vector<8x256xf32>
    %c3_146 = arith.constant 3 : index
    %c5_147 = arith.constant 5 : index
    %c0_148 = arith.constant 0 : index
    %c0_149 = arith.constant 0 : index
    %186 = vector.load %arg2[%c3_146, %c5_147, %c0_148, %c0_149] : memref<9x8x8x1xf32, #tpu.memory_space<vmem>>, vector<1x1x8x1xf32>
    %187 = vector.shape_cast %186 : vector<1x1x8x1xf32> to vector<8x1xf32>
    %188 = vector.broadcast %187 : vector<8x1xf32> to vector<8x256xf32>
    %189 = arith.mulf %188, %160 : vector<8x256xf32>
    %190 = arith.addf %145, %189 : vector<8x256xf32>
    %c3_150 = arith.constant 3 : index
    %c6_151 = arith.constant 6 : index
    %c0_152 = arith.constant 0 : index
    %c0_153 = arith.constant 0 : index
    %191 = vector.load %arg2[%c3_150, %c6_151, %c0_152, %c0_153] : memref<9x8x8x1xf32, #tpu.memory_space<vmem>>, vector<1x1x8x1xf32>
    %192 = vector.shape_cast %191 : vector<1x1x8x1xf32> to vector<8x1xf32>
    %193 = vector.broadcast %192 : vector<8x1xf32> to vector<8x256xf32>
    %194 = arith.mulf %193, %160 : vector<8x256xf32>
    %195 = arith.addf %150, %194 : vector<8x256xf32>
    %c3_154 = arith.constant 3 : index
    %c7_155 = arith.constant 7 : index
    %c0_156 = arith.constant 0 : index
    %c0_157 = arith.constant 0 : index
    %196 = vector.load %arg2[%c3_154, %c7_155, %c0_156, %c0_157] : memref<9x8x8x1xf32, #tpu.memory_space<vmem>>, vector<1x1x8x1xf32>
    %197 = vector.shape_cast %196 : vector<1x1x8x1xf32> to vector<8x1xf32>
    %198 = vector.broadcast %197 : vector<8x1xf32> to vector<8x256xf32>
    %199 = arith.mulf %198, %160 : vector<8x256xf32>
    %200 = arith.addf %155, %199 : vector<8x256xf32>
    %c0_158 = arith.constant 0 : index
    %c128_159 = arith.constant 128 : index
    %201 = vector.load %arg6[%c0_158, %c128_159] : memref<8x512xf32, #tpu.memory_space<vmem>>, vector<8x256xf32>
    %c4_160 = arith.constant 4 : index
    %c0_161 = arith.constant 0 : index
    %c0_162 = arith.constant 0 : index
    %c0_163 = arith.constant 0 : index
    %202 = vector.load %arg2[%c4_160, %c0_161, %c0_162, %c0_163] : memref<9x8x8x1xf32, #tpu.memory_space<vmem>>, vector<1x1x8x1xf32>
    %203 = vector.shape_cast %202 : vector<1x1x8x1xf32> to vector<8x1xf32>
    %204 = vector.broadcast %203 : vector<8x1xf32> to vector<8x256xf32>
    %205 = arith.mulf %204, %201 : vector<8x256xf32>
    %206 = arith.addf %165, %205 : vector<8x256xf32>
    %c4_164 = arith.constant 4 : index
    %c1_165 = arith.constant 1 : index
    %c0_166 = arith.constant 0 : index
    %c0_167 = arith.constant 0 : index
    %207 = vector.load %arg2[%c4_164, %c1_165, %c0_166, %c0_167] : memref<9x8x8x1xf32, #tpu.memory_space<vmem>>, vector<1x1x8x1xf32>
    %208 = vector.shape_cast %207 : vector<1x1x8x1xf32> to vector<8x1xf32>
    %209 = vector.broadcast %208 : vector<8x1xf32> to vector<8x256xf32>
    %210 = arith.mulf %209, %201 : vector<8x256xf32>
    %211 = arith.addf %170, %210 : vector<8x256xf32>
    %c4_168 = arith.constant 4 : index
    %c2_169 = arith.constant 2 : index
    %c0_170 = arith.constant 0 : index
    %c0_171 = arith.constant 0 : index
    %212 = vector.load %arg2[%c4_168, %c2_169, %c0_170, %c0_171] : memref<9x8x8x1xf32, #tpu.memory_space<vmem>>, vector<1x1x8x1xf32>
    %213 = vector.shape_cast %212 : vector<1x1x8x1xf32> to vector<8x1xf32>
    %214 = vector.broadcast %213 : vector<8x1xf32> to vector<8x256xf32>
    %215 = arith.mulf %214, %201 : vector<8x256xf32>
    %216 = arith.addf %175, %215 : vector<8x256xf32>
    %c4_172 = arith.constant 4 : index
    %c3_173 = arith.constant 3 : index
    %c0_174 = arith.constant 0 : index
    %c0_175 = arith.constant 0 : index
    %217 = vector.load %arg2[%c4_172, %c3_173, %c0_174, %c0_175] : memref<9x8x8x1xf32, #tpu.memory_space<vmem>>, vector<1x1x8x1xf32>
    %218 = vector.shape_cast %217 : vector<1x1x8x1xf32> to vector<8x1xf32>
    %219 = vector.broadcast %218 : vector<8x1xf32> to vector<8x256xf32>
    %220 = arith.mulf %219, %201 : vector<8x256xf32>
    %221 = arith.addf %180, %220 : vector<8x256xf32>
    %c4_176 = arith.constant 4 : index
    %c4_177 = arith.constant 4 : index
    %c0_178 = arith.constant 0 : index
    %c0_179 = arith.constant 0 : index
    %222 = vector.load %arg2[%c4_176, %c4_177, %c0_178, %c0_179] : memref<9x8x8x1xf32, #tpu.memory_space<vmem>>, vector<1x1x8x1xf32>
    %223 = vector.shape_cast %222 : vector<1x1x8x1xf32> to vector<8x1xf32>
    %224 = vector.broadcast %223 : vector<8x1xf32> to vector<8x256xf32>
    %225 = arith.mulf %224, %201 : vector<8x256xf32>
    %226 = arith.addf %185, %225 : vector<8x256xf32>
    %c4_180 = arith.constant 4 : index
    %c5_181 = arith.constant 5 : index
    %c0_182 = arith.constant 0 : index
    %c0_183 = arith.constant 0 : index
    %227 = vector.load %arg2[%c4_180, %c5_181, %c0_182, %c0_183] : memref<9x8x8x1xf32, #tpu.memory_space<vmem>>, vector<1x1x8x1xf32>
    %228 = vector.shape_cast %227 : vector<1x1x8x1xf32> to vector<8x1xf32>
    %229 = vector.broadcast %228 : vector<8x1xf32> to vector<8x256xf32>
    %230 = arith.mulf %229, %201 : vector<8x256xf32>
    %231 = arith.addf %190, %230 : vector<8x256xf32>
    %c4_184 = arith.constant 4 : index
    %c6_185 = arith.constant 6 : index
    %c0_186 = arith.constant 0 : index
    %c0_187 = arith.constant 0 : index
    %232 = vector.load %arg2[%c4_184, %c6_185, %c0_186, %c0_187] : memref<9x8x8x1xf32, #tpu.memory_space<vmem>>, vector<1x1x8x1xf32>
    %233 = vector.shape_cast %232 : vector<1x1x8x1xf32> to vector<8x1xf32>
    %234 = vector.broadcast %233 : vector<8x1xf32> to vector<8x256xf32>
    %235 = arith.mulf %234, %201 : vector<8x256xf32>
    %236 = arith.addf %195, %235 : vector<8x256xf32>
    %c4_188 = arith.constant 4 : index
    %c7_189 = arith.constant 7 : index
    %c0_190 = arith.constant 0 : index
    %c0_191 = arith.constant 0 : index
    %237 = vector.load %arg2[%c4_188, %c7_189, %c0_190, %c0_191] : memref<9x8x8x1xf32, #tpu.memory_space<vmem>>, vector<1x1x8x1xf32>
    %238 = vector.shape_cast %237 : vector<1x1x8x1xf32> to vector<8x1xf32>
    %239 = vector.broadcast %238 : vector<8x1xf32> to vector<8x256xf32>
    %240 = arith.mulf %239, %201 : vector<8x256xf32>
    %241 = arith.addf %200, %240 : vector<8x256xf32>
    %c0_192 = arith.constant 0 : index
    %c129 = arith.constant 129 : index
    %242 = vector.load %arg6[%c0_192, %c129] : memref<8x512xf32, #tpu.memory_space<vmem>>, vector<8x256xf32>
    %c5_193 = arith.constant 5 : index
    %c0_194 = arith.constant 0 : index
    %c0_195 = arith.constant 0 : index
    %243 = vector.load %arg3[%c5_193, %c0_194, %c0_195] : memref<9x1x256xf32, #tpu.memory_space<vmem>>, vector<1x1x256xf32>
    %244 = vector.shape_cast %243 : vector<1x1x256xf32> to vector<1x256xf32>
    %245 = vector.broadcast %244 : vector<1x256xf32> to vector<8x256xf32>
    %246 = arith.mulf %242, %245 : vector<8x256xf32>
    %c5_196 = arith.constant 5 : index
    %c0_197 = arith.constant 0 : index
    %c0_198 = arith.constant 0 : index
    %c0_199 = arith.constant 0 : index
    %247 = vector.load %arg2[%c5_196, %c0_197, %c0_198, %c0_199] : memref<9x8x8x1xf32, #tpu.memory_space<vmem>>, vector<1x1x8x1xf32>
    %248 = vector.shape_cast %247 : vector<1x1x8x1xf32> to vector<8x1xf32>
    %249 = vector.broadcast %248 : vector<8x1xf32> to vector<8x256xf32>
    %250 = arith.mulf %249, %246 : vector<8x256xf32>
    %251 = arith.addf %206, %250 : vector<8x256xf32>
    %c5_200 = arith.constant 5 : index
    %c1_201 = arith.constant 1 : index
    %c0_202 = arith.constant 0 : index
    %c0_203 = arith.constant 0 : index
    %252 = vector.load %arg2[%c5_200, %c1_201, %c0_202, %c0_203] : memref<9x8x8x1xf32, #tpu.memory_space<vmem>>, vector<1x1x8x1xf32>
    %253 = vector.shape_cast %252 : vector<1x1x8x1xf32> to vector<8x1xf32>
    %254 = vector.broadcast %253 : vector<8x1xf32> to vector<8x256xf32>
    %255 = arith.mulf %254, %246 : vector<8x256xf32>
    %256 = arith.addf %211, %255 : vector<8x256xf32>
    %c5_204 = arith.constant 5 : index
    %c2_205 = arith.constant 2 : index
    %c0_206 = arith.constant 0 : index
    %c0_207 = arith.constant 0 : index
    %257 = vector.load %arg2[%c5_204, %c2_205, %c0_206, %c0_207] : memref<9x8x8x1xf32, #tpu.memory_space<vmem>>, vector<1x1x8x1xf32>
    %258 = vector.shape_cast %257 : vector<1x1x8x1xf32> to vector<8x1xf32>
    %259 = vector.broadcast %258 : vector<8x1xf32> to vector<8x256xf32>
    %260 = arith.mulf %259, %246 : vector<8x256xf32>
    %261 = arith.addf %216, %260 : vector<8x256xf32>
    %c5_208 = arith.constant 5 : index
    %c3_209 = arith.constant 3 : index
    %c0_210 = arith.constant 0 : index
    %c0_211 = arith.constant 0 : index
    %262 = vector.load %arg2[%c5_208, %c3_209, %c0_210, %c0_211] : memref<9x8x8x1xf32, #tpu.memory_space<vmem>>, vector<1x1x8x1xf32>
    %263 = vector.shape_cast %262 : vector<1x1x8x1xf32> to vector<8x1xf32>
    %264 = vector.broadcast %263 : vector<8x1xf32> to vector<8x256xf32>
    %265 = arith.mulf %264, %246 : vector<8x256xf32>
    %266 = arith.addf %221, %265 : vector<8x256xf32>
    %c5_212 = arith.constant 5 : index
    %c4_213 = arith.constant 4 : index
    %c0_214 = arith.constant 0 : index
    %c0_215 = arith.constant 0 : index
    %267 = vector.load %arg2[%c5_212, %c4_213, %c0_214, %c0_215] : memref<9x8x8x1xf32, #tpu.memory_space<vmem>>, vector<1x1x8x1xf32>
    %268 = vector.shape_cast %267 : vector<1x1x8x1xf32> to vector<8x1xf32>
    %269 = vector.broadcast %268 : vector<8x1xf32> to vector<8x256xf32>
    %270 = arith.mulf %269, %246 : vector<8x256xf32>
    %271 = arith.addf %226, %270 : vector<8x256xf32>
    %c5_216 = arith.constant 5 : index
    %c5_217 = arith.constant 5 : index
    %c0_218 = arith.constant 0 : index
    %c0_219 = arith.constant 0 : index
    %272 = vector.load %arg2[%c5_216, %c5_217, %c0_218, %c0_219] : memref<9x8x8x1xf32, #tpu.memory_space<vmem>>, vector<1x1x8x1xf32>
    %273 = vector.shape_cast %272 : vector<1x1x8x1xf32> to vector<8x1xf32>
    %274 = vector.broadcast %273 : vector<8x1xf32> to vector<8x256xf32>
    %275 = arith.mulf %274, %246 : vector<8x256xf32>
    %276 = arith.addf %231, %275 : vector<8x256xf32>
    %c5_220 = arith.constant 5 : index
    %c6_221 = arith.constant 6 : index
    %c0_222 = arith.constant 0 : index
    %c0_223 = arith.constant 0 : index
    %277 = vector.load %arg2[%c5_220, %c6_221, %c0_222, %c0_223] : memref<9x8x8x1xf32, #tpu.memory_space<vmem>>, vector<1x1x8x1xf32>
    %278 = vector.shape_cast %277 : vector<1x1x8x1xf32> to vector<8x1xf32>
    %279 = vector.broadcast %278 : vector<8x1xf32> to vector<8x256xf32>
    %280 = arith.mulf %279, %246 : vector<8x256xf32>
    %281 = arith.addf %236, %280 : vector<8x256xf32>
    %c5_224 = arith.constant 5 : index
    %c7_225 = arith.constant 7 : index
    %c0_226 = arith.constant 0 : index
    %c0_227 = arith.constant 0 : index
    %282 = vector.load %arg2[%c5_224, %c7_225, %c0_226, %c0_227] : memref<9x8x8x1xf32, #tpu.memory_space<vmem>>, vector<1x1x8x1xf32>
    %283 = vector.shape_cast %282 : vector<1x1x8x1xf32> to vector<8x1xf32>
    %284 = vector.broadcast %283 : vector<8x1xf32> to vector<8x256xf32>
    %285 = arith.mulf %284, %246 : vector<8x256xf32>
    %286 = arith.addf %241, %285 : vector<8x256xf32>
    %c0_228 = arith.constant 0 : index
    %c143 = arith.constant 143 : index
    %287 = vector.load %arg6[%c0_228, %c143] : memref<8x512xf32, #tpu.memory_space<vmem>>, vector<8x256xf32>
    %c6_229 = arith.constant 6 : index
    %c0_230 = arith.constant 0 : index
    %c0_231 = arith.constant 0 : index
    %288 = vector.load %arg3[%c6_229, %c0_230, %c0_231] : memref<9x1x256xf32, #tpu.memory_space<vmem>>, vector<1x1x256xf32>
    %289 = vector.shape_cast %288 : vector<1x1x256xf32> to vector<1x256xf32>
    %290 = vector.broadcast %289 : vector<1x256xf32> to vector<8x256xf32>
    %291 = arith.mulf %287, %290 : vector<8x256xf32>
    %c6_232 = arith.constant 6 : index
    %c0_233 = arith.constant 0 : index
    %c0_234 = arith.constant 0 : index
    %c0_235 = arith.constant 0 : index
    %292 = vector.load %arg2[%c6_232, %c0_233, %c0_234, %c0_235] : memref<9x8x8x1xf32, #tpu.memory_space<vmem>>, vector<1x1x8x1xf32>
    %293 = vector.shape_cast %292 : vector<1x1x8x1xf32> to vector<8x1xf32>
    %294 = vector.broadcast %293 : vector<8x1xf32> to vector<8x256xf32>
    %295 = arith.mulf %294, %291 : vector<8x256xf32>
    %296 = arith.addf %251, %295 : vector<8x256xf32>
    %c6_236 = arith.constant 6 : index
    %c1_237 = arith.constant 1 : index
    %c0_238 = arith.constant 0 : index
    %c0_239 = arith.constant 0 : index
    %297 = vector.load %arg2[%c6_236, %c1_237, %c0_238, %c0_239] : memref<9x8x8x1xf32, #tpu.memory_space<vmem>>, vector<1x1x8x1xf32>
    %298 = vector.shape_cast %297 : vector<1x1x8x1xf32> to vector<8x1xf32>
    %299 = vector.broadcast %298 : vector<8x1xf32> to vector<8x256xf32>
    %300 = arith.mulf %299, %291 : vector<8x256xf32>
    %301 = arith.addf %256, %300 : vector<8x256xf32>
    %c6_240 = arith.constant 6 : index
    %c2_241 = arith.constant 2 : index
    %c0_242 = arith.constant 0 : index
    %c0_243 = arith.constant 0 : index
    %302 = vector.load %arg2[%c6_240, %c2_241, %c0_242, %c0_243] : memref<9x8x8x1xf32, #tpu.memory_space<vmem>>, vector<1x1x8x1xf32>
    %303 = vector.shape_cast %302 : vector<1x1x8x1xf32> to vector<8x1xf32>
    %304 = vector.broadcast %303 : vector<8x1xf32> to vector<8x256xf32>
    %305 = arith.mulf %304, %291 : vector<8x256xf32>
    %306 = arith.addf %261, %305 : vector<8x256xf32>
    %c6_244 = arith.constant 6 : index
    %c3_245 = arith.constant 3 : index
    %c0_246 = arith.constant 0 : index
    %c0_247 = arith.constant 0 : index
    %307 = vector.load %arg2[%c6_244, %c3_245, %c0_246, %c0_247] : memref<9x8x8x1xf32, #tpu.memory_space<vmem>>, vector<1x1x8x1xf32>
    %308 = vector.shape_cast %307 : vector<1x1x8x1xf32> to vector<8x1xf32>
    %309 = vector.broadcast %308 : vector<8x1xf32> to vector<8x256xf32>
    %310 = arith.mulf %309, %291 : vector<8x256xf32>
    %311 = arith.addf %266, %310 : vector<8x256xf32>
    %c6_248 = arith.constant 6 : index
    %c4_249 = arith.constant 4 : index
    %c0_250 = arith.constant 0 : index
    %c0_251 = arith.constant 0 : index
    %312 = vector.load %arg2[%c6_248, %c4_249, %c0_250, %c0_251] : memref<9x8x8x1xf32, #tpu.memory_space<vmem>>, vector<1x1x8x1xf32>
    %313 = vector.shape_cast %312 : vector<1x1x8x1xf32> to vector<8x1xf32>
    %314 = vector.broadcast %313 : vector<8x1xf32> to vector<8x256xf32>
    %315 = arith.mulf %314, %291 : vector<8x256xf32>
    %316 = arith.addf %271, %315 : vector<8x256xf32>
    %c6_252 = arith.constant 6 : index
    %c5_253 = arith.constant 5 : index
    %c0_254 = arith.constant 0 : index
    %c0_255 = arith.constant 0 : index
    %317 = vector.load %arg2[%c6_252, %c5_253, %c0_254, %c0_255] : memref<9x8x8x1xf32, #tpu.memory_space<vmem>>, vector<1x1x8x1xf32>
    %318 = vector.shape_cast %317 : vector<1x1x8x1xf32> to vector<8x1xf32>
    %319 = vector.broadcast %318 : vector<8x1xf32> to vector<8x256xf32>
    %320 = arith.mulf %319, %291 : vector<8x256xf32>
    %321 = arith.addf %276, %320 : vector<8x256xf32>
    %c6_256 = arith.constant 6 : index
    %c6_257 = arith.constant 6 : index
    %c0_258 = arith.constant 0 : index
    %c0_259 = arith.constant 0 : index
    %322 = vector.load %arg2[%c6_256, %c6_257, %c0_258, %c0_259] : memref<9x8x8x1xf32, #tpu.memory_space<vmem>>, vector<1x1x8x1xf32>
    %323 = vector.shape_cast %322 : vector<1x1x8x1xf32> to vector<8x1xf32>
    %324 = vector.broadcast %323 : vector<8x1xf32> to vector<8x256xf32>
    %325 = arith.mulf %324, %291 : vector<8x256xf32>
    %326 = arith.addf %281, %325 : vector<8x256xf32>
    %c6_260 = arith.constant 6 : index
    %c7_261 = arith.constant 7 : index
    %c0_262 = arith.constant 0 : index
    %c0_263 = arith.constant 0 : index
    %327 = vector.load %arg2[%c6_260, %c7_261, %c0_262, %c0_263] : memref<9x8x8x1xf32, #tpu.memory_space<vmem>>, vector<1x1x8x1xf32>
    %328 = vector.shape_cast %327 : vector<1x1x8x1xf32> to vector<8x1xf32>
    %329 = vector.broadcast %328 : vector<8x1xf32> to vector<8x256xf32>
    %330 = arith.mulf %329, %291 : vector<8x256xf32>
    %331 = arith.addf %286, %330 : vector<8x256xf32>
    %c0_264 = arith.constant 0 : index
    %c144 = arith.constant 144 : index
    %332 = vector.load %arg6[%c0_264, %c144] : memref<8x512xf32, #tpu.memory_space<vmem>>, vector<8x256xf32>
    %c7_265 = arith.constant 7 : index
    %c0_266 = arith.constant 0 : index
    %c0_267 = arith.constant 0 : index
    %333 = vector.load %arg3[%c7_265, %c0_266, %c0_267] : memref<9x1x256xf32, #tpu.memory_space<vmem>>, vector<1x1x256xf32>
    %334 = vector.shape_cast %333 : vector<1x1x256xf32> to vector<1x256xf32>
    %335 = vector.broadcast %334 : vector<1x256xf32> to vector<8x256xf32>
    %336 = arith.mulf %332, %335 : vector<8x256xf32>
    %c7_268 = arith.constant 7 : index
    %c0_269 = arith.constant 0 : index
    %c0_270 = arith.constant 0 : index
    %c0_271 = arith.constant 0 : index
    %337 = vector.load %arg2[%c7_268, %c0_269, %c0_270, %c0_271] : memref<9x8x8x1xf32, #tpu.memory_space<vmem>>, vector<1x1x8x1xf32>
    %338 = vector.shape_cast %337 : vector<1x1x8x1xf32> to vector<8x1xf32>
    %339 = vector.broadcast %338 : vector<8x1xf32> to vector<8x256xf32>
    %340 = arith.mulf %339, %336 : vector<8x256xf32>
    %341 = arith.addf %296, %340 : vector<8x256xf32>
    %c7_272 = arith.constant 7 : index
    %c1_273 = arith.constant 1 : index
    %c0_274 = arith.constant 0 : index
    %c0_275 = arith.constant 0 : index
    %342 = vector.load %arg2[%c7_272, %c1_273, %c0_274, %c0_275] : memref<9x8x8x1xf32, #tpu.memory_space<vmem>>, vector<1x1x8x1xf32>
    %343 = vector.shape_cast %342 : vector<1x1x8x1xf32> to vector<8x1xf32>
    %344 = vector.broadcast %343 : vector<8x1xf32> to vector<8x256xf32>
    %345 = arith.mulf %344, %336 : vector<8x256xf32>
    %346 = arith.addf %301, %345 : vector<8x256xf32>
    %c7_276 = arith.constant 7 : index
    %c2_277 = arith.constant 2 : index
    %c0_278 = arith.constant 0 : index
    %c0_279 = arith.constant 0 : index
    %347 = vector.load %arg2[%c7_276, %c2_277, %c0_278, %c0_279] : memref<9x8x8x1xf32, #tpu.memory_space<vmem>>, vector<1x1x8x1xf32>
    %348 = vector.shape_cast %347 : vector<1x1x8x1xf32> to vector<8x1xf32>
    %349 = vector.broadcast %348 : vector<8x1xf32> to vector<8x256xf32>
    %350 = arith.mulf %349, %336 : vector<8x256xf32>
    %351 = arith.addf %306, %350 : vector<8x256xf32>
    %c7_280 = arith.constant 7 : index
    %c3_281 = arith.constant 3 : index
    %c0_282 = arith.constant 0 : index
    %c0_283 = arith.constant 0 : index
    %352 = vector.load %arg2[%c7_280, %c3_281, %c0_282, %c0_283] : memref<9x8x8x1xf32, #tpu.memory_space<vmem>>, vector<1x1x8x1xf32>
    %353 = vector.shape_cast %352 : vector<1x1x8x1xf32> to vector<8x1xf32>
    %354 = vector.broadcast %353 : vector<8x1xf32> to vector<8x256xf32>
    %355 = arith.mulf %354, %336 : vector<8x256xf32>
    %356 = arith.addf %311, %355 : vector<8x256xf32>
    %c7_284 = arith.constant 7 : index
    %c4_285 = arith.constant 4 : index
    %c0_286 = arith.constant 0 : index
    %c0_287 = arith.constant 0 : index
    %357 = vector.load %arg2[%c7_284, %c4_285, %c0_286, %c0_287] : memref<9x8x8x1xf32, #tpu.memory_space<vmem>>, vector<1x1x8x1xf32>
    %358 = vector.shape_cast %357 : vector<1x1x8x1xf32> to vector<8x1xf32>
    %359 = vector.broadcast %358 : vector<8x1xf32> to vector<8x256xf32>
    %360 = arith.mulf %359, %336 : vector<8x256xf32>
    %361 = arith.addf %316, %360 : vector<8x256xf32>
    %c7_288 = arith.constant 7 : index
    %c5_289 = arith.constant 5 : index
    %c0_290 = arith.constant 0 : index
    %c0_291 = arith.constant 0 : index
    %362 = vector.load %arg2[%c7_288, %c5_289, %c0_290, %c0_291] : memref<9x8x8x1xf32, #tpu.memory_space<vmem>>, vector<1x1x8x1xf32>
    %363 = vector.shape_cast %362 : vector<1x1x8x1xf32> to vector<8x1xf32>
    %364 = vector.broadcast %363 : vector<8x1xf32> to vector<8x256xf32>
    %365 = arith.mulf %364, %336 : vector<8x256xf32>
    %366 = arith.addf %321, %365 : vector<8x256xf32>
    %c7_292 = arith.constant 7 : index
    %c6_293 = arith.constant 6 : index
    %c0_294 = arith.constant 0 : index
    %c0_295 = arith.constant 0 : index
    %367 = vector.load %arg2[%c7_292, %c6_293, %c0_294, %c0_295] : memref<9x8x8x1xf32, #tpu.memory_space<vmem>>, vector<1x1x8x1xf32>
    %368 = vector.shape_cast %367 : vector<1x1x8x1xf32> to vector<8x1xf32>
    %369 = vector.broadcast %368 : vector<8x1xf32> to vector<8x256xf32>
    %370 = arith.mulf %369, %336 : vector<8x256xf32>
    %371 = arith.addf %326, %370 : vector<8x256xf32>
    %c7_296 = arith.constant 7 : index
    %c7_297 = arith.constant 7 : index
    %c0_298 = arith.constant 0 : index
    %c0_299 = arith.constant 0 : index
    %372 = vector.load %arg2[%c7_296, %c7_297, %c0_298, %c0_299] : memref<9x8x8x1xf32, #tpu.memory_space<vmem>>, vector<1x1x8x1xf32>
    %373 = vector.shape_cast %372 : vector<1x1x8x1xf32> to vector<8x1xf32>
    %374 = vector.broadcast %373 : vector<8x1xf32> to vector<8x256xf32>
    %375 = arith.mulf %374, %336 : vector<8x256xf32>
    %376 = arith.addf %331, %375 : vector<8x256xf32>
    %c0_300 = arith.constant 0 : index
    %c145 = arith.constant 145 : index
    %377 = vector.load %arg6[%c0_300, %c145] : memref<8x512xf32, #tpu.memory_space<vmem>>, vector<8x256xf32>
    %c8 = arith.constant 8 : index
    %c0_301 = arith.constant 0 : index
    %c0_302 = arith.constant 0 : index
    %378 = vector.load %arg3[%c8, %c0_301, %c0_302] : memref<9x1x256xf32, #tpu.memory_space<vmem>>, vector<1x1x256xf32>
    %379 = vector.shape_cast %378 : vector<1x1x256xf32> to vector<1x256xf32>
    %380 = vector.broadcast %379 : vector<1x256xf32> to vector<8x256xf32>
    %381 = arith.mulf %377, %380 : vector<8x256xf32>
    %c8_303 = arith.constant 8 : index
    %c0_304 = arith.constant 0 : index
    %c0_305 = arith.constant 0 : index
    %c0_306 = arith.constant 0 : index
    %382 = vector.load %arg2[%c8_303, %c0_304, %c0_305, %c0_306] : memref<9x8x8x1xf32, #tpu.memory_space<vmem>>, vector<1x1x8x1xf32>
    %383 = vector.shape_cast %382 : vector<1x1x8x1xf32> to vector<8x1xf32>
    %384 = vector.broadcast %383 : vector<8x1xf32> to vector<8x256xf32>
    %385 = arith.mulf %384, %381 : vector<8x256xf32>
    %386 = arith.addf %341, %385 : vector<8x256xf32>
    %c8_307 = arith.constant 8 : index
    %c1_308 = arith.constant 1 : index
    %c0_309 = arith.constant 0 : index
    %c0_310 = arith.constant 0 : index
    %387 = vector.load %arg2[%c8_307, %c1_308, %c0_309, %c0_310] : memref<9x8x8x1xf32, #tpu.memory_space<vmem>>, vector<1x1x8x1xf32>
    %388 = vector.shape_cast %387 : vector<1x1x8x1xf32> to vector<8x1xf32>
    %389 = vector.broadcast %388 : vector<8x1xf32> to vector<8x256xf32>
    %390 = arith.mulf %389, %381 : vector<8x256xf32>
    %391 = arith.addf %346, %390 : vector<8x256xf32>
    %c8_311 = arith.constant 8 : index
    %c2_312 = arith.constant 2 : index
    %c0_313 = arith.constant 0 : index
    %c0_314 = arith.constant 0 : index
    %392 = vector.load %arg2[%c8_311, %c2_312, %c0_313, %c0_314] : memref<9x8x8x1xf32, #tpu.memory_space<vmem>>, vector<1x1x8x1xf32>
    %393 = vector.shape_cast %392 : vector<1x1x8x1xf32> to vector<8x1xf32>
    %394 = vector.broadcast %393 : vector<8x1xf32> to vector<8x256xf32>
    %395 = arith.mulf %394, %381 : vector<8x256xf32>
    %396 = arith.addf %351, %395 : vector<8x256xf32>
    %c8_315 = arith.constant 8 : index
    %c3_316 = arith.constant 3 : index
    %c0_317 = arith.constant 0 : index
    %c0_318 = arith.constant 0 : index
    %397 = vector.load %arg2[%c8_315, %c3_316, %c0_317, %c0_318] : memref<9x8x8x1xf32, #tpu.memory_space<vmem>>, vector<1x1x8x1xf32>
    %398 = vector.shape_cast %397 : vector<1x1x8x1xf32> to vector<8x1xf32>
    %399 = vector.broadcast %398 : vector<8x1xf32> to vector<8x256xf32>
    %400 = arith.mulf %399, %381 : vector<8x256xf32>
    %401 = arith.addf %356, %400 : vector<8x256xf32>
    %c8_319 = arith.constant 8 : index
    %c4_320 = arith.constant 4 : index
    %c0_321 = arith.constant 0 : index
    %c0_322 = arith.constant 0 : index
    %402 = vector.load %arg2[%c8_319, %c4_320, %c0_321, %c0_322] : memref<9x8x8x1xf32, #tpu.memory_space<vmem>>, vector<1x1x8x1xf32>
    %403 = vector.shape_cast %402 : vector<1x1x8x1xf32> to vector<8x1xf32>
    %404 = vector.broadcast %403 : vector<8x1xf32> to vector<8x256xf32>
    %405 = arith.mulf %404, %381 : vector<8x256xf32>
    %406 = arith.addf %361, %405 : vector<8x256xf32>
    %c8_323 = arith.constant 8 : index
    %c5_324 = arith.constant 5 : index
    %c0_325 = arith.constant 0 : index
    %c0_326 = arith.constant 0 : index
    %407 = vector.load %arg2[%c8_323, %c5_324, %c0_325, %c0_326] : memref<9x8x8x1xf32, #tpu.memory_space<vmem>>, vector<1x1x8x1xf32>
    %408 = vector.shape_cast %407 : vector<1x1x8x1xf32> to vector<8x1xf32>
    %409 = vector.broadcast %408 : vector<8x1xf32> to vector<8x256xf32>
    %410 = arith.mulf %409, %381 : vector<8x256xf32>
    %411 = arith.addf %366, %410 : vector<8x256xf32>
    %c8_327 = arith.constant 8 : index
    %c6_328 = arith.constant 6 : index
    %c0_329 = arith.constant 0 : index
    %c0_330 = arith.constant 0 : index
    %412 = vector.load %arg2[%c8_327, %c6_328, %c0_329, %c0_330] : memref<9x8x8x1xf32, #tpu.memory_space<vmem>>, vector<1x1x8x1xf32>
    %413 = vector.shape_cast %412 : vector<1x1x8x1xf32> to vector<8x1xf32>
    %414 = vector.broadcast %413 : vector<8x1xf32> to vector<8x256xf32>
    %415 = arith.mulf %414, %381 : vector<8x256xf32>
    %416 = arith.addf %371, %415 : vector<8x256xf32>
    %c8_331 = arith.constant 8 : index
    %c7_332 = arith.constant 7 : index
    %c0_333 = arith.constant 0 : index
    %c0_334 = arith.constant 0 : index
    %417 = vector.load %arg2[%c8_331, %c7_332, %c0_333, %c0_334] : memref<9x8x8x1xf32, #tpu.memory_space<vmem>>, vector<1x1x8x1xf32>
    %418 = vector.shape_cast %417 : vector<1x1x8x1xf32> to vector<8x1xf32>
    %419 = vector.broadcast %418 : vector<8x1xf32> to vector<8x256xf32>
    %420 = arith.mulf %419, %381 : vector<8x256xf32>
    %421 = arith.addf %376, %420 : vector<8x256xf32>
    %422 = vector.extract_strided_slice %386 {offsets = [0, 0], sizes = [1, 256], strides = [1, 1]} : vector<8x256xf32> to vector<1x256xf32>
    %423 = vector.extract_strided_slice %386 {offsets = [1, 0], sizes = [1, 256], strides = [1, 1]} : vector<8x256xf32> to vector<1x256xf32>
    %424 = arith.addf %422, %423 : vector<1x256xf32>
    %425 = vector.extract_strided_slice %386 {offsets = [2, 0], sizes = [1, 256], strides = [1, 1]} : vector<8x256xf32> to vector<1x256xf32>
    %426 = arith.addf %424, %425 : vector<1x256xf32>
    %427 = vector.extract_strided_slice %386 {offsets = [3, 0], sizes = [1, 256], strides = [1, 1]} : vector<8x256xf32> to vector<1x256xf32>
    %428 = arith.addf %426, %427 : vector<1x256xf32>
    %429 = vector.broadcast %5 : f32 to vector<1x256xf32>
    %430 = arith.addf %428, %429 : vector<1x256xf32>
    %c0_335 = arith.constant 0 : index
    %c0_336 = arith.constant 0 : index
    %c0_337 = arith.constant 0 : index
    %431 = vector.load %arg5[%c0_335, %c0_336, %c0_337] : memref<2x8x256xf32, #tpu.memory_space<vmem>>, vector<1x1x256xf32>
    %432 = vector.shape_cast %431 : vector<1x1x256xf32> to vector<1x256xf32>
    %433 = vector.shape_cast %430 : vector<1x256xf32> to vector<1x1x256xf32>
    tpu.vector_store %arg5[%c0_335, %c0_336, %c0_337], %433 {strides = array<i32>} : memref<2x8x256xf32, #tpu.memory_space<vmem>>, vector<1x1x256xf32>,
    %434 = vector.extract_strided_slice %386 {offsets = [4, 0], sizes = [1, 256], strides = [1, 1]} : vector<8x256xf32> to vector<1x256xf32>
    %435 = vector.extract_strided_slice %386 {offsets = [5, 0], sizes = [1, 256], strides = [1, 1]} : vector<8x256xf32> to vector<1x256xf32>
    %436 = arith.addf %434, %435 : vector<1x256xf32>
    %437 = vector.extract_strided_slice %386 {offsets = [6, 0], sizes = [1, 256], strides = [1, 1]} : vector<8x256xf32> to vector<1x256xf32>
    %438 = arith.addf %436, %437 : vector<1x256xf32>
    %439 = vector.extract_strided_slice %386 {offsets = [7, 0], sizes = [1, 256], strides = [1, 1]} : vector<8x256xf32> to vector<1x256xf32>
    %440 = arith.addf %438, %439 : vector<1x256xf32>
    %441 = vector.broadcast %5 : f32 to vector<1x256xf32>
    %442 = arith.addf %440, %441 : vector<1x256xf32>
    %c1_338 = arith.constant 1 : index
    %c0_339 = arith.constant 0 : index
    %c0_340 = arith.constant 0 : index
    %443 = vector.load %arg5[%c1_338, %c0_339, %c0_340] : memref<2x8x256xf32, #tpu.memory_space<vmem>>, vector<1x1x256xf32>
    %444 = vector.shape_cast %443 : vector<1x1x256xf32> to vector<1x256xf32>
    %445 = vector.shape_cast %442 : vector<1x256xf32> to vector<1x1x256xf32>
    tpu.vector_store %arg5[%c1_338, %c0_339, %c0_340], %445 {strides = array<i32>} : memref<2x8x256xf32, #tpu.memory_space<vmem>>, vector<1x1x256xf32>,
    %446 = vector.extract_strided_slice %391 {offsets = [0, 0], sizes = [1, 256], strides = [1, 1]} : vector<8x256xf32> to vector<1x256xf32>
    %447 = vector.extract_strided_slice %391 {offsets = [1, 0], sizes = [1, 256], strides = [1, 1]} : vector<8x256xf32> to vector<1x256xf32>
    %448 = arith.addf %446, %447 : vector<1x256xf32>
    %449 = vector.extract_strided_slice %391 {offsets = [2, 0], sizes = [1, 256], strides = [1, 1]} : vector<8x256xf32> to vector<1x256xf32>
    %450 = arith.addf %448, %449 : vector<1x256xf32>
    %451 = vector.extract_strided_slice %391 {offsets = [3, 0], sizes = [1, 256], strides = [1, 1]} : vector<8x256xf32> to vector<1x256xf32>
    %452 = arith.addf %450, %451 : vector<1x256xf32>
    %453 = vector.broadcast %6 : f32 to vector<1x256xf32>
    %454 = arith.addf %452, %453 : vector<1x256xf32>
    %c0_341 = arith.constant 0 : index
    %c1_342 = arith.constant 1 : index
    %c0_343 = arith.constant 0 : index
    %455 = vector.load %arg5[%c0_341, %c1_342, %c0_343] : memref<2x8x256xf32, #tpu.memory_space<vmem>>, vector<1x1x256xf32>
    %456 = vector.shape_cast %455 : vector<1x1x256xf32> to vector<1x256xf32>
    %457 = vector.shape_cast %454 : vector<1x256xf32> to vector<1x1x256xf32>
    tpu.vector_store %arg5[%c0_341, %c1_342, %c0_343], %457 {strides = array<i32>} : memref<2x8x256xf32, #tpu.memory_space<vmem>>, vector<1x1x256xf32>,
    %458 = vector.extract_strided_slice %391 {offsets = [4, 0], sizes = [1, 256], strides = [1, 1]} : vector<8x256xf32> to vector<1x256xf32>
    %459 = vector.extract_strided_slice %391 {offsets = [5, 0], sizes = [1, 256], strides = [1, 1]} : vector<8x256xf32> to vector<1x256xf32>
    %460 = arith.addf %458, %459 : vector<1x256xf32>
    %461 = vector.extract_strided_slice %391 {offsets = [6, 0], sizes = [1, 256], strides = [1, 1]} : vector<8x256xf32> to vector<1x256xf32>
    %462 = arith.addf %460, %461 : vector<1x256xf32>
    %463 = vector.extract_strided_slice %391 {offsets = [7, 0], sizes = [1, 256], strides = [1, 1]} : vector<8x256xf32> to vector<1x256xf32>
    %464 = arith.addf %462, %463 : vector<1x256xf32>
    %465 = vector.broadcast %6 : f32 to vector<1x256xf32>
    %466 = arith.addf %464, %465 : vector<1x256xf32>
    %c1_344 = arith.constant 1 : index
    %c1_345 = arith.constant 1 : index
    %c0_346 = arith.constant 0 : index
    %467 = vector.load %arg5[%c1_344, %c1_345, %c0_346] : memref<2x8x256xf32, #tpu.memory_space<vmem>>, vector<1x1x256xf32>
    %468 = vector.shape_cast %467 : vector<1x1x256xf32> to vector<1x256xf32>
    %469 = vector.shape_cast %466 : vector<1x256xf32> to vector<1x1x256xf32>
    tpu.vector_store %arg5[%c1_344, %c1_345, %c0_346], %469 {strides = array<i32>} : memref<2x8x256xf32, #tpu.memory_space<vmem>>, vector<1x1x256xf32>,
    %470 = vector.extract_strided_slice %396 {offsets = [0, 0], sizes = [1, 256], strides = [1, 1]} : vector<8x256xf32> to vector<1x256xf32>
    %471 = vector.extract_strided_slice %396 {offsets = [1, 0], sizes = [1, 256], strides = [1, 1]} : vector<8x256xf32> to vector<1x256xf32>
    %472 = arith.addf %470, %471 : vector<1x256xf32>
    %473 = vector.extract_strided_slice %396 {offsets = [2, 0], sizes = [1, 256], strides = [1, 1]} : vector<8x256xf32> to vector<1x256xf32>
    %474 = arith.addf %472, %473 : vector<1x256xf32>
    %475 = vector.extract_strided_slice %396 {offsets = [3, 0], sizes = [1, 256], strides = [1, 1]} : vector<8x256xf32> to vector<1x256xf32>
    %476 = arith.addf %474, %475 : vector<1x256xf32>
    %477 = vector.broadcast %7 : f32 to vector<1x256xf32>
    %478 = arith.addf %476, %477 : vector<1x256xf32>
    %c0_347 = arith.constant 0 : index
    %c2_348 = arith.constant 2 : index
    %c0_349 = arith.constant 0 : index
    %479 = vector.load %arg5[%c0_347, %c2_348, %c0_349] : memref<2x8x256xf32, #tpu.memory_space<vmem>>, vector<1x1x256xf32>
    %480 = vector.shape_cast %479 : vector<1x1x256xf32> to vector<1x256xf32>
    %481 = vector.shape_cast %478 : vector<1x256xf32> to vector<1x1x256xf32>
    tpu.vector_store %arg5[%c0_347, %c2_348, %c0_349], %481 {strides = array<i32>} : memref<2x8x256xf32, #tpu.memory_space<vmem>>, vector<1x1x256xf32>,
    %482 = vector.extract_strided_slice %396 {offsets = [4, 0], sizes = [1, 256], strides = [1, 1]} : vector<8x256xf32> to vector<1x256xf32>
    %483 = vector.extract_strided_slice %396 {offsets = [5, 0], sizes = [1, 256], strides = [1, 1]} : vector<8x256xf32> to vector<1x256xf32>
    %484 = arith.addf %482, %483 : vector<1x256xf32>
    %485 = vector.extract_strided_slice %396 {offsets = [6, 0], sizes = [1, 256], strides = [1, 1]} : vector<8x256xf32> to vector<1x256xf32>
    %486 = arith.addf %484, %485 : vector<1x256xf32>
    %487 = vector.extract_strided_slice %396 {offsets = [7, 0], sizes = [1, 256], strides = [1, 1]} : vector<8x256xf32> to vector<1x256xf32>
    %488 = arith.addf %486, %487 : vector<1x256xf32>
    %489 = vector.broadcast %7 : f32 to vector<1x256xf32>
    %490 = arith.addf %488, %489 : vector<1x256xf32>
    %c1_350 = arith.constant 1 : index
    %c2_351 = arith.constant 2 : index
    %c0_352 = arith.constant 0 : index
    %491 = vector.load %arg5[%c1_350, %c2_351, %c0_352] : memref<2x8x256xf32, #tpu.memory_space<vmem>>, vector<1x1x256xf32>
    %492 = vector.shape_cast %491 : vector<1x1x256xf32> to vector<1x256xf32>
    %493 = vector.shape_cast %490 : vector<1x256xf32> to vector<1x1x256xf32>
    tpu.vector_store %arg5[%c1_350, %c2_351, %c0_352], %493 {strides = array<i32>} : memref<2x8x256xf32, #tpu.memory_space<vmem>>, vector<1x1x256xf32>,
    %494 = vector.extract_strided_slice %401 {offsets = [0, 0], sizes = [1, 256], strides = [1, 1]} : vector<8x256xf32> to vector<1x256xf32>
    %495 = vector.extract_strided_slice %401 {offsets = [1, 0], sizes = [1, 256], strides = [1, 1]} : vector<8x256xf32> to vector<1x256xf32>
    %496 = arith.addf %494, %495 : vector<1x256xf32>
    %497 = vector.extract_strided_slice %401 {offsets = [2, 0], sizes = [1, 256], strides = [1, 1]} : vector<8x256xf32> to vector<1x256xf32>
    %498 = arith.addf %496, %497 : vector<1x256xf32>
    %499 = vector.extract_strided_slice %401 {offsets = [3, 0], sizes = [1, 256], strides = [1, 1]} : vector<8x256xf32> to vector<1x256xf32>
    %500 = arith.addf %498, %499 : vector<1x256xf32>
    %501 = vector.broadcast %8 : f32 to vector<1x256xf32>
    %502 = arith.addf %500, %501 : vector<1x256xf32>
    %c0_353 = arith.constant 0 : index
    %c3_354 = arith.constant 3 : index
    %c0_355 = arith.constant 0 : index
    %503 = vector.load %arg5[%c0_353, %c3_354, %c0_355] : memref<2x8x256xf32, #tpu.memory_space<vmem>>, vector<1x1x256xf32>
    %504 = vector.shape_cast %503 : vector<1x1x256xf32> to vector<1x256xf32>
    %505 = vector.shape_cast %502 : vector<1x256xf32> to vector<1x1x256xf32>
    tpu.vector_store %arg5[%c0_353, %c3_354, %c0_355], %505 {strides = array<i32>} : memref<2x8x256xf32, #tpu.memory_space<vmem>>, vector<1x1x256xf32>,
    %506 = vector.extract_strided_slice %401 {offsets = [4, 0], sizes = [1, 256], strides = [1, 1]} : vector<8x256xf32> to vector<1x256xf32>
    %507 = vector.extract_strided_slice %401 {offsets = [5, 0], sizes = [1, 256], strides = [1, 1]} : vector<8x256xf32> to vector<1x256xf32>
    %508 = arith.addf %506, %507 : vector<1x256xf32>
    %509 = vector.extract_strided_slice %401 {offsets = [6, 0], sizes = [1, 256], strides = [1, 1]} : vector<8x256xf32> to vector<1x256xf32>
    %510 = arith.addf %508, %509 : vector<1x256xf32>
    %511 = vector.extract_strided_slice %401 {offsets = [7, 0], sizes = [1, 256], strides = [1, 1]} : vector<8x256xf32> to vector<1x256xf32>
    %512 = arith.addf %510, %511 : vector<1x256xf32>
    %513 = vector.broadcast %8 : f32 to vector<1x256xf32>
    %514 = arith.addf %512, %513 : vector<1x256xf32>
    %c1_356 = arith.constant 1 : index
    %c3_357 = arith.constant 3 : index
    %c0_358 = arith.constant 0 : index
    %515 = vector.load %arg5[%c1_356, %c3_357, %c0_358] : memref<2x8x256xf32, #tpu.memory_space<vmem>>, vector<1x1x256xf32>
    %516 = vector.shape_cast %515 : vector<1x1x256xf32> to vector<1x256xf32>
    %517 = vector.shape_cast %514 : vector<1x256xf32> to vector<1x1x256xf32>
    tpu.vector_store %arg5[%c1_356, %c3_357, %c0_358], %517 {strides = array<i32>} : memref<2x8x256xf32, #tpu.memory_space<vmem>>, vector<1x1x256xf32>,
    %518 = vector.extract_strided_slice %406 {offsets = [0, 0], sizes = [1, 256], strides = [1, 1]} : vector<8x256xf32> to vector<1x256xf32>
    %519 = vector.extract_strided_slice %406 {offsets = [1, 0], sizes = [1, 256], strides = [1, 1]} : vector<8x256xf32> to vector<1x256xf32>
    %520 = arith.addf %518, %519 : vector<1x256xf32>
    %521 = vector.extract_strided_slice %406 {offsets = [2, 0], sizes = [1, 256], strides = [1, 1]} : vector<8x256xf32> to vector<1x256xf32>
    %522 = arith.addf %520, %521 : vector<1x256xf32>
    %523 = vector.extract_strided_slice %406 {offsets = [3, 0], sizes = [1, 256], strides = [1, 1]} : vector<8x256xf32> to vector<1x256xf32>
    %524 = arith.addf %522, %523 : vector<1x256xf32>
    %525 = vector.broadcast %9 : f32 to vector<1x256xf32>
    %526 = arith.addf %524, %525 : vector<1x256xf32>
    %c0_359 = arith.constant 0 : index
    %c4_360 = arith.constant 4 : index
    %c0_361 = arith.constant 0 : index
    %527 = vector.load %arg5[%c0_359, %c4_360, %c0_361] : memref<2x8x256xf32, #tpu.memory_space<vmem>>, vector<1x1x256xf32>
    %528 = vector.shape_cast %527 : vector<1x1x256xf32> to vector<1x256xf32>
    %529 = vector.shape_cast %526 : vector<1x256xf32> to vector<1x1x256xf32>
    tpu.vector_store %arg5[%c0_359, %c4_360, %c0_361], %529 {strides = array<i32>} : memref<2x8x256xf32, #tpu.memory_space<vmem>>, vector<1x1x256xf32>,
    %530 = vector.extract_strided_slice %406 {offsets = [4, 0], sizes = [1, 256], strides = [1, 1]} : vector<8x256xf32> to vector<1x256xf32>
    %531 = vector.extract_strided_slice %406 {offsets = [5, 0], sizes = [1, 256], strides = [1, 1]} : vector<8x256xf32> to vector<1x256xf32>
    %532 = arith.addf %530, %531 : vector<1x256xf32>
    %533 = vector.extract_strided_slice %406 {offsets = [6, 0], sizes = [1, 256], strides = [1, 1]} : vector<8x256xf32> to vector<1x256xf32>
    %534 = arith.addf %532, %533 : vector<1x256xf32>
    %535 = vector.extract_strided_slice %406 {offsets = [7, 0], sizes = [1, 256], strides = [1, 1]} : vector<8x256xf32> to vector<1x256xf32>
    %536 = arith.addf %534, %535 : vector<1x256xf32>
    %537 = vector.broadcast %9 : f32 to vector<1x256xf32>
    %538 = arith.addf %536, %537 : vector<1x256xf32>
    %c1_362 = arith.constant 1 : index
    %c4_363 = arith.constant 4 : index
    %c0_364 = arith.constant 0 : index
    %539 = vector.load %arg5[%c1_362, %c4_363, %c0_364] : memref<2x8x256xf32, #tpu.memory_space<vmem>>, vector<1x1x256xf32>
    %540 = vector.shape_cast %539 : vector<1x1x256xf32> to vector<1x256xf32>
    %541 = vector.shape_cast %538 : vector<1x256xf32> to vector<1x1x256xf32>
    tpu.vector_store %arg5[%c1_362, %c4_363, %c0_364], %541 {strides = array<i32>} : memref<2x8x256xf32, #tpu.memory_space<vmem>>, vector<1x1x256xf32>,
    %542 = vector.extract_strided_slice %411 {offsets = [0, 0], sizes = [1, 256], strides = [1, 1]} : vector<8x256xf32> to vector<1x256xf32>
    %543 = vector.extract_strided_slice %411 {offsets = [1, 0], sizes = [1, 256], strides = [1, 1]} : vector<8x256xf32> to vector<1x256xf32>
    %544 = arith.addf %542, %543 : vector<1x256xf32>
    %545 = vector.extract_strided_slice %411 {offsets = [2, 0], sizes = [1, 256], strides = [1, 1]} : vector<8x256xf32> to vector<1x256xf32>
    %546 = arith.addf %544, %545 : vector<1x256xf32>
    %547 = vector.extract_strided_slice %411 {offsets = [3, 0], sizes = [1, 256], strides = [1, 1]} : vector<8x256xf32> to vector<1x256xf32>
    %548 = arith.addf %546, %547 : vector<1x256xf32>
    %549 = vector.broadcast %10 : f32 to vector<1x256xf32>
    %550 = arith.addf %548, %549 : vector<1x256xf32>
    %c0_365 = arith.constant 0 : index
    %c5_366 = arith.constant 5 : index
    %c0_367 = arith.constant 0 : index
    %551 = vector.load %arg5[%c0_365, %c5_366, %c0_367] : memref<2x8x256xf32, #tpu.memory_space<vmem>>, vector<1x1x256xf32>
    %552 = vector.shape_cast %551 : vector<1x1x256xf32> to vector<1x256xf32>
    %553 = vector.shape_cast %550 : vector<1x256xf32> to vector<1x1x256xf32>
    tpu.vector_store %arg5[%c0_365, %c5_366, %c0_367], %553 {strides = array<i32>} : memref<2x8x256xf32, #tpu.memory_space<vmem>>, vector<1x1x256xf32>,
    %554 = vector.extract_strided_slice %411 {offsets = [4, 0], sizes = [1, 256], strides = [1, 1]} : vector<8x256xf32> to vector<1x256xf32>
    %555 = vector.extract_strided_slice %411 {offsets = [5, 0], sizes = [1, 256], strides = [1, 1]} : vector<8x256xf32> to vector<1x256xf32>
    %556 = arith.addf %554, %555 : vector<1x256xf32>
    %557 = vector.extract_strided_slice %411 {offsets = [6, 0], sizes = [1, 256], strides = [1, 1]} : vector<8x256xf32> to vector<1x256xf32>
    %558 = arith.addf %556, %557 : vector<1x256xf32>
    %559 = vector.extract_strided_slice %411 {offsets = [7, 0], sizes = [1, 256], strides = [1, 1]} : vector<8x256xf32> to vector<1x256xf32>
    %560 = arith.addf %558, %559 : vector<1x256xf32>
    %561 = vector.broadcast %10 : f32 to vector<1x256xf32>
    %562 = arith.addf %560, %561 : vector<1x256xf32>
    %c1_368 = arith.constant 1 : index
    %c5_369 = arith.constant 5 : index
    %c0_370 = arith.constant 0 : index
    %563 = vector.load %arg5[%c1_368, %c5_369, %c0_370] : memref<2x8x256xf32, #tpu.memory_space<vmem>>, vector<1x1x256xf32>
    %564 = vector.shape_cast %563 : vector<1x1x256xf32> to vector<1x256xf32>
    %565 = vector.shape_cast %562 : vector<1x256xf32> to vector<1x1x256xf32>
    tpu.vector_store %arg5[%c1_368, %c5_369, %c0_370], %565 {strides = array<i32>} : memref<2x8x256xf32, #tpu.memory_space<vmem>>, vector<1x1x256xf32>,
    %566 = vector.extract_strided_slice %416 {offsets = [0, 0], sizes = [1, 256], strides = [1, 1]} : vector<8x256xf32> to vector<1x256xf32>
    %567 = vector.extract_strided_slice %416 {offsets = [1, 0], sizes = [1, 256], strides = [1, 1]} : vector<8x256xf32> to vector<1x256xf32>
    %568 = arith.addf %566, %567 : vector<1x256xf32>
    %569 = vector.extract_strided_slice %416 {offsets = [2, 0], sizes = [1, 256], strides = [1, 1]} : vector<8x256xf32> to vector<1x256xf32>
    %570 = arith.addf %568, %569 : vector<1x256xf32>
    %571 = vector.extract_strided_slice %416 {offsets = [3, 0], sizes = [1, 256], strides = [1, 1]} : vector<8x256xf32> to vector<1x256xf32>
    %572 = arith.addf %570, %571 : vector<1x256xf32>
    %573 = vector.broadcast %11 : f32 to vector<1x256xf32>
    %574 = arith.addf %572, %573 : vector<1x256xf32>
    %c0_371 = arith.constant 0 : index
    %c6_372 = arith.constant 6 : index
    %c0_373 = arith.constant 0 : index
    %575 = vector.load %arg5[%c0_371, %c6_372, %c0_373] : memref<2x8x256xf32, #tpu.memory_space<vmem>>, vector<1x1x256xf32>
    %576 = vector.shape_cast %575 : vector<1x1x256xf32> to vector<1x256xf32>
    %577 = vector.shape_cast %574 : vector<1x256xf32> to vector<1x1x256xf32>
    tpu.vector_store %arg5[%c0_371, %c6_372, %c0_373], %577 {strides = array<i32>} : memref<2x8x256xf32, #tpu.memory_space<vmem>>, vector<1x1x256xf32>,
    %578 = vector.extract_strided_slice %416 {offsets = [4, 0], sizes = [1, 256], strides = [1, 1]} : vector<8x256xf32> to vector<1x256xf32>
    %579 = vector.extract_strided_slice %416 {offsets = [5, 0], sizes = [1, 256], strides = [1, 1]} : vector<8x256xf32> to vector<1x256xf32>
    %580 = arith.addf %578, %579 : vector<1x256xf32>
    %581 = vector.extract_strided_slice %416 {offsets = [6, 0], sizes = [1, 256], strides = [1, 1]} : vector<8x256xf32> to vector<1x256xf32>
    %582 = arith.addf %580, %581 : vector<1x256xf32>
    %583 = vector.extract_strided_slice %416 {offsets = [7, 0], sizes = [1, 256], strides = [1, 1]} : vector<8x256xf32> to vector<1x256xf32>
    %584 = arith.addf %582, %583 : vector<1x256xf32>
    %585 = vector.broadcast %11 : f32 to vector<1x256xf32>
    %586 = arith.addf %584, %585 : vector<1x256xf32>
    %c1_374 = arith.constant 1 : index
    %c6_375 = arith.constant 6 : index
    %c0_376 = arith.constant 0 : index
    %587 = vector.load %arg5[%c1_374, %c6_375, %c0_376] : memref<2x8x256xf32, #tpu.memory_space<vmem>>, vector<1x1x256xf32>
    %588 = vector.shape_cast %587 : vector<1x1x256xf32> to vector<1x256xf32>
    %589 = vector.shape_cast %586 : vector<1x256xf32> to vector<1x1x256xf32>
    tpu.vector_store %arg5[%c1_374, %c6_375, %c0_376], %589 {strides = array<i32>} : memref<2x8x256xf32, #tpu.memory_space<vmem>>, vector<1x1x256xf32>,
    %590 = vector.extract_strided_slice %421 {offsets = [0, 0], sizes = [1, 256], strides = [1, 1]} : vector<8x256xf32> to vector<1x256xf32>
    %591 = vector.extract_strided_slice %421 {offsets = [1, 0], sizes = [1, 256], strides = [1, 1]} : vector<8x256xf32> to vector<1x256xf32>
    %592 = arith.addf %590, %591 : vector<1x256xf32>
    %593 = vector.extract_strided_slice %421 {offsets = [2, 0], sizes = [1, 256], strides = [1, 1]} : vector<8x256xf32> to vector<1x256xf32>
    %594 = arith.addf %592, %593 : vector<1x256xf32>
    %595 = vector.extract_strided_slice %421 {offsets = [3, 0], sizes = [1, 256], strides = [1, 1]} : vector<8x256xf32> to vector<1x256xf32>
    %596 = arith.addf %594, %595 : vector<1x256xf32>
    %597 = vector.broadcast %12 : f32 to vector<1x256xf32>
    %598 = arith.addf %596, %597 : vector<1x256xf32>
    %c0_377 = arith.constant 0 : index
    %c7_378 = arith.constant 7 : index
    %c0_379 = arith.constant 0 : index
    %599 = vector.load %arg5[%c0_377, %c7_378, %c0_379] : memref<2x8x256xf32, #tpu.memory_space<vmem>>, vector<1x1x256xf32>
    %600 = vector.shape_cast %599 : vector<1x1x256xf32> to vector<1x256xf32>
    %601 = vector.shape_cast %598 : vector<1x256xf32> to vector<1x1x256xf32>
    tpu.vector_store %arg5[%c0_377, %c7_378, %c0_379], %601 {strides = array<i32>} : memref<2x8x256xf32, #tpu.memory_space<vmem>>, vector<1x1x256xf32>,
    %602 = vector.extract_strided_slice %421 {offsets = [4, 0], sizes = [1, 256], strides = [1, 1]} : vector<8x256xf32> to vector<1x256xf32>
    %603 = vector.extract_strided_slice %421 {offsets = [5, 0], sizes = [1, 256], strides = [1, 1]} : vector<8x256xf32> to vector<1x256xf32>
    %604 = arith.addf %602, %603 : vector<1x256xf32>
    %605 = vector.extract_strided_slice %421 {offsets = [6, 0], sizes = [1, 256], strides = [1, 1]} : vector<8x256xf32> to vector<1x256xf32>
    %606 = arith.addf %604, %605 : vector<1x256xf32>
    %607 = vector.extract_strided_slice %421 {offsets = [7, 0], sizes = [1, 256], strides = [1, 1]} : vector<8x256xf32> to vector<1x256xf32>
    %608 = arith.addf %606, %607 : vector<1x256xf32>
    %609 = vector.broadcast %12 : f32 to vector<1x256xf32>
    %610 = arith.addf %608, %609 : vector<1x256xf32>
    %c1_380 = arith.constant 1 : index
    %c7_381 = arith.constant 7 : index
    %c0_382 = arith.constant 0 : index
    %611 = vector.load %arg5[%c1_380, %c7_381, %c0_382] : memref<2x8x256xf32, #tpu.memory_space<vmem>>, vector<1x1x256xf32>
    %612 = vector.shape_cast %611 : vector<1x1x256xf32> to vector<1x256xf32>
    %613 = vector.shape_cast %610 : vector<1x256xf32> to vector<1x1x256xf32>
    tpu.vector_store %arg5[%c1_380, %c7_381, %c0_382], %613 {strides = array<i32>} : memref<2x8x256xf32, #tpu.memory_space<vmem>>, vector<1x1x256xf32>,
    return
  }
  func.func @transform_0(%arg0: i32) -> (i32, i32) {
    %c0_i32 = arith.constant 0 : i32
    %c0_i32_0 = arith.constant 0 : i32
    return %arg0, %c0_i32 : i32, i32
  }
  func.func @transform_1(%arg0: i32) -> (i32, i32, i32, i32) {
    %c0_i32 = arith.constant 0 : i32
    %c0_i32_0 = arith.constant 0 : i32
    %c0_i32_1 = arith.constant 0 : i32
    %c0_i32_2 = arith.constant 0 : i32
    %c0_i32_3 = arith.constant 0 : i32
    return %c0_i32, %c0_i32_0, %c0_i32_1, %c0_i32_2 : i32, i32, i32, i32
  }
  func.func @transform_2(%arg0: i32) -> (i32, i32, i32) {
    %c0_i32 = arith.constant 0 : i32
    %c0_i32_0 = arith.constant 0 : i32
    %c0_i32_1 = arith.constant 0 : i32
    %c0_i32_2 = arith.constant 0 : i32
    return %c0_i32, %c0_i32_0, %c0_i32_1 : i32, i32, i32
  }
  func.func @transform_3(%arg0: i32) -> i32 {
    %c0_i32 = arith.constant 0 : i32
    %c0_i32_0 = arith.constant 0 : i32
    return %c0_i32 : i32
  }
  func.func @transform_4(%arg0: i32) -> (i32, i32, i32) {
    %c0_i32 = arith.constant 0 : i32
    %c0_i32_0 = arith.constant 0 : i32
    %c0_i32_1 = arith.constant 0 : i32
    return %arg0, %c0_i32, %c0_i32_0 : i32, i32, i32
  }
}

</mosaic_0001>

<bundles_post_ra>
// kernel: conv_layer1_forward.1
= control target key start
LH: loop header
LB: loop body
LE: loop exit
PB: predicated region body
PF: predicated region fallthrough
CT: control target
= control target key end

     0   :  { %9 = vsyncpa [#allocation4], 0  ;;  %s4799_s0 = inlined_call_operand.vmem [shape: f32[8,256], index: 0, kind: input, shape index: {}]   ;;  %s4800_s1 = inlined_call_operand.vmem [shape: f32[9,8,8,1], index: 1, kind: input, shape index: {}]   ;;  %s4801_s2 = inlined_call_operand.vmem [shape: f32[9,1,256], index: 2, kind: input, shape index: {}]   ;;  %s4802_s3 = inlined_call_operand.vmem [shape: f32[8], index: 3, kind: input, shape index: {}]   ;;  %s4803_s4 = inlined_call_operand.vmem [shape: f32[2,8,256], index: 4, kind: output, shape index: {}]  }
   0x1   :  { %s22_s17 = sshll.u32 %s4802_s3, 4  ;;  %s23_s17 = int_to_ptr.vmem [resolvable:$true] %s22_s17 }
   0x2   :  { %s2964_s18 = scalar_lea.vmem %s23_s17, 16  ;;  %p2969_p1 = scmp.lt.s32.totalorder %s23_s17, %s23_s17 }
   0x3   :  { %p2965_p0 = scmp.ne.s32.totalorder %s23_s17, %s2964_s18  ;;  %p2970_p2 = scmp.lt.s32.totalorder %s2964_s18, %s2964_s18 }
   0x5   :  { %p2971_p3 = por %p2970_p2, %p2969_p1 }
   0x7   :  { %p2972_p4 = pnand %p2971_p3, %p2965_p0 }
   0x9   :  { %2975 = shalt.err (!%p2972_p4)
}
   0xa   :  { %s2978_s19 = smov [#allocation3]  }
   0xb   :  { %25 = dma.vmem_to_smem %s23_s17, 16, %s2978_s19, [#allocation4]  }
   0xc   :  { %2976 = dma.done.wait [#allocation4], 16  }
   0xd   :  { %2977 = vsyncadd [#allocation4], 4294967280 }
   0xe   :  { %29 = sfence }
   0xf   :  { %v69_v0 = vld [vmem:[%s4800_s1] sm:$0xff]  ;;  %v4804_v1 = vlaneseq  ;;  %v2979_v2 = vmov 0   ;;  %v2851_v4 = vld [vmem:[%s4800_s1 + $0x8] sm:$0xff]  ;;  %v2853_v9 = vld [vmem:[%s4800_s1 + $0x18] sm:$0xff]  ;;  %s2980_s27 = smov 111   ;;  %s2981_s14 = smov 112  }
  0x10   :  { %2960 = vset.pattern.permute.xlu1 %v2979_v2  ;;  %2961 = vset.pattern.permute.xlu0 %v2979_v2  ;;  %v47_v5 = vld [vmem:[%s4801_s2] sm:$0x3]  ;;  %v2852_v12 = vld [vmem:[%s4800_s1 + $0x10] sm:$0xff]  ;;  %v2858_v14 = vld [vmem:[%s4801_s2 + $0x2] sm:$0x3]  ;;  %s2982_s22 = smov 113  }
  0x11   :  { %72 = vperm.xlu1 %2960, %v69_v0   ;;  %v3026_v3 = vshrl.u32 %v4804_v1, 7  ;;  %v2854_v11 = vld [vmem:[%s4800_s1 + $0x20] sm:$0xff]  ;;  %v2856_v13 = vld [vmem:[%s4800_s1 + $0x30] sm:$0xff]  ;;  %v2855_v15 = vld [vmem:[%s4800_s1 + $0x28] sm:$0xff]  ;;  %vm187_vm0 = vcmask 916480   ;;  %vm427_vm1 = vcmask 924672  }
  0x12   :  { %v2857_v17 = vld [vmem:[%s4800_s1 + $0x38] sm:$0xff]  ;;  %v2859_v18 = vld [vmem:[%s4800_s1 + $0x40] sm:$0xff]  ;;  %v2860_v20 = vld [vmem:[%s4800_s1 + $0x48] sm:$0xff]  ;;  %s2984_s23 = smov 126   ;;  %vm214_vm2 = vcmask 1039360   ;;  %s2985_s16 = smov 1  }
  0x13   :  { %v3035_v6 = vsub.s32 0, %v3026_v3  ;;  %v3038_v7 = vsub.s32 1, %v3026_v3  ;;  %v2867_v21 = vld [vmem:[%s4801_s2 + $0x4] sm:$0x3]  ;;  %v2861_v23 = vld [vmem:[%s4800_s1 + $0x50] sm:$0xff]  ;;  %v2862_v24 = vld [vmem:[%s4800_s1 + $0x58] sm:$0xff] }
  0x14   :  { %v2863_v25 = vld [vmem:[%s4800_s1 + $0x60] sm:$0xff]  ;;  %v2864_v26 = vld [vmem:[%s4800_s1 + $0x68] sm:$0xff]  ;;  %v2865_v27 = vld [vmem:[%s4800_s1 + $0x70] sm:$0xff]  ;;  %vm1084_vm3 = vcmask 7168   ;;  %s2987_s8 = smov 15   ;;  %vm1324_vm4 = vcmask 121856  }
  0x15   :  { %85 = vperm.xlu1 %2960, %v2851_v4   ;;  %v52_v8 = vrot.slane %v47_v5, %v3035_v6  ;;  %v56_v10 = vrot.slane %v47_v5, %v3038_v7  ;;  %v178_v16 = vrot.slane %v2858_v14, %v3035_v6  ;;  %v182_v19 = vrot.slane %v2858_v14, %v3038_v7  ;;  %v2866_v28 = vld [vmem:[%s4800_s1 + $0x78] sm:$0xff]  ;;  %v2868_v30 = vld [vmem:[%s4800_s1 + $0x80] sm:$0xff]  ;;  %v2869_v31 = vld [vmem:[%s4800_s1 + $0x88] sm:$0xff]  ;;  %s2988_s11 = smov 96   ;;  %s2990_s10 = smov 17  }
  0x16   :  { %v422_v22 = vrot.slane %v2867_v21, %v3038_v7  ;;  %v418_v29 = vrot.slane %v2867_v21, %v3035_v6  ;;  %v2870_v32 = vld [vmem:[%s4800_s1 + $0x90] sm:$0xff]  ;;  %v2871_v33 = vld [vmem:[%s4800_s1 + $0x98] sm:$0xff]  ;;  %v2872_v34 = vld [vmem:[%s4800_s1 + $0xa0] sm:$0xff]  ;;  %vm1351_vm5 = vcmask 785408   ;;  %vm1564_vm6 = vcmask 130048   ;;  %s2991_s13 = smov 95  }
  0x17   :  { %57 = vrot.lane.b32.xlu0 %v52_v8, %s2980_s27  ;;  %v3139_v49 = vld [vmem:[%s4799_s0 + $0x8] sm:$0xff]  ;;  %v3144_v51 = vld [vmem:[%s4799_s0] sm:$0xff]  ;;  %vm1804_vm7 = vcmask 138240   ;;  %vm61_vm8 = vcmask 908288   ;;  %vm454_vm9 = vcmask 1031168   ;;  %vm1111_vm10 = vcmask 900096  }
  0x18   :  { %s4317_s15 = sld [smem:[#allocation3]]  ;;  %vm1591_vm11 = vcmask 777216   ;;  %vm1831_vm12 = vcmask 769024  }
  0x19   :  { %111 = vperm.xlu1 %2960, %v2853_v9   ;;  %s4334_s17 = sld [smem:[#allocation3 + $0x2]] }
  0x1a   :  { %s4337_s18 = sld [smem:[#allocation3 + $0x3]] }
  0x1b   :  { %59 = vrot.lane.b32.xlu0 %v56_v10, %s2980_s27  ;;  %s4358_s19 = sld [smem:[#allocation3 + $0x5]] }
  0x1c   :  { %s4370_s20 = sld [smem:[#allocation3 + $0x6]] }
  0x1d   :  { %124 = vperm.xlu1 %2960, %v2854_v11   ;;  %s4382_s21 = sld [smem:[#allocation3 + $0x7]] }
  0x1f   :  { %98 = vperm.xlu0 %2961, %v2852_v12  }
  0x21   :  { %150 = vperm.xlu1 %2960, %v2856_v13  }
  0x23   :  { %137 = vperm.xlu0 %2961, %v2855_v15  }
  0x25   :  { %183 = vrot.lane.b32.xlu1 %v178_v16, %s2981_s14 }
  0x27   :  { %163 = vperm.xlu0 %2961, %v2857_v17  }
  0x29   :  { %199 = vperm.xlu1 %2960, %v2859_v18  }
  0x2b   :  { %185 = vrot.lane.b32.xlu0 %v182_v19, %s2981_s14 }
  0x2d   :  { %227 = vperm.xlu1 %2960, %v2860_v20  }
  0x2f   :  { %425 = vrot.lane.b32.xlu0 %v422_v22, %s2982_s22 }
  0x31   :  { %254 = vperm.xlu1 %2960, %v2861_v23  }
  0x35   :  { %281 = vperm.xlu1 %2960, %v2862_v24  }
  0x39   :  { %308 = vperm.xlu1 %2960, %v2863_v25  }
  0x3d   :  { %335 = vperm.xlu1 %2960, %v2864_v26  }
  0x41   :  { %362 = vperm.xlu1 %2960, %v2865_v27  }
  0x45   :  { %389 = vperm.xlu1 %2960, %v2866_v28  }
  0x49   :  { %423 = vrot.lane.b32.xlu1 %v418_v29, %s2982_s22  ;;  %s2983_s22 = smov 127  }
  0x4d   :  { %439 = vperm.xlu1 %2960, %v2868_v30  }
  0x51   :  { %467 = vperm.xlu1 %2960, %v2869_v31  }
  0x55   :  { %494 = vperm.xlu1 %2960, %v2870_v32  }
  0x59   :  { %521 = vperm.xlu1 %2960, %v2871_v33  }
  0x5d   :  { %548 = vperm.xlu1 %2960, %v2872_v34  }
  0x89   :  { %v3115_v36 = vpop.permute.xlu0 %57 }
  0x8c   :  { %v3113_v35 = vpop.permute.xlu1 %72 }
  0x8d   :  { %v3121_v39 = vpop.permute.xlu0 %59 }
  0x90   :  { %v3117_v37 = vpop.permute.xlu1 %85 }
  0x94   :  { %v3119_v38 = vpop.permute.xlu1 %111 }
  0x98   :  { %v3123_v40 = vpop.permute.xlu1 %124 }
  0x9a   :  { %v3125_v41 = vpop.permute.xlu0 %98 }
  0x9c   :  { %v3127_v42 = vpop.permute.xlu1 %150 }
  0x9e   :  { %v3129_v43 = vpop.permute.xlu0 %137 }
  0xa0   :  { %v184_v44 = vpop.permute.xlu1 %183 }
  0xa1   :  { %v3133_v46 = vmul.f32 0.0, %v184_v44 }
  0xa2   :  { %v3131_v45 = vpop.permute.xlu0 %163 }
  0xa4   :  { %v200_v47 = vpop.permute.xlu1 %199 }
  0xa5   :  { %v202_v48 = vmul.f32 %v200_v47, %v3133_v46 }
  0xa6   :  { %v186_v50 = vpop.permute.xlu0 %185 }
  0xa7   :  { %v188_v52 = vsel %vm187_vm0, %v184_v44, %v186_v50  ;;  %v3148_v53 = vmul.f32 %v186_v50, %v3139_v49  ;;  %208 = vrot.lane.b32.xlu0 %v202_v48, %s2983_s22  ;;  %v2873_v50 = vld [vmem:[%s4800_s1 + $0xa8] sm:$0xff] }
  0xa8   :  { %v193_v54 = vmul.f32 %v188_v52, %v3144_v51  ;;  %v228_v55 = vpop.permute.xlu1 %227 }
  0xa9   :  { %v204_v56 = vmul.f32 %v200_v47, %v3148_v53  ;;  %v230_v59 = vmul.f32 %v228_v55, %v3133_v46  ;;  %v232_v62 = vmul.f32 %v228_v55, %v3148_v53 }
  0xaa   :  { %v203_v57 = vmul.f32 %v200_v47, %v193_v54  ;;  %v231_v60 = vmul.f32 %v228_v55, %v193_v54  ;;  %v426_v15 = vpop.permute.xlu0 %425 }
  0xab   :  { %212 = vrot.lane.b32.xlu0 %v204_v56, %s2983_s22  ;;  %v3209_v55 = vmul.f32 %v426_v15, %v3139_v49 }
  0xac   :  { %v255_v58 = vpop.permute.xlu1 %254  ;;  %210 = vrot.lane.b32.xlu1 %v203_v57, %s2983_s22 }
  0xad   :  { %v258_v63 = vmul.f32 %v255_v58, %v193_v54  ;;  %v257_v2 = vmul.f32 %v255_v58, %v3133_v46  ;;  %v259_v8 = vmul.f32 %v255_v58, %v3148_v53 }
  0xaf   :  { %236 = vrot.lane.b32.xlu0 %v230_v59, %s2983_s22 }
  0xb0   :  { %v282_v61 = vpop.permute.xlu1 %281  ;;  %238 = vrot.lane.b32.xlu1 %v231_v60, %s2983_s22 }
  0xb1   :  { %v285_v4 = vmul.f32 %v282_v61, %v193_v54  ;;  %v284_v11 = vmul.f32 %v282_v61, %v3133_v46  ;;  %v286_v14 = vmul.f32 %v282_v61, %v3148_v53 }
  0xb3   :  { %240 = vrot.lane.b32.xlu0 %v232_v62, %s2983_s22 }
  0xb4   :  { %v309_v0 = vpop.permute.xlu1 %308  ;;  %265 = vrot.lane.b32.xlu1 %v258_v63, %s2983_s22 }
  0xb5   :  { %v312_v9 = vmul.f32 %v309_v0, %v193_v54  ;;  %v311_v19 = vmul.f32 %v309_v0, %v3133_v46  ;;  %v313_v23 = vmul.f32 %v309_v0, %v3148_v53 }
  0xb7   :  { %263 = vrot.lane.b32.xlu0 %v257_v2, %s2983_s22 }
  0xb8   :  { %v336_v5 = vpop.permute.xlu1 %335  ;;  %292 = vrot.lane.b32.xlu1 %v285_v4, %s2983_s22 }
  0xb9   :  { %v339_v12 = vmul.f32 %v336_v5, %v193_v54  ;;  %v338_v26 = vmul.f32 %v336_v5, %v3133_v46  ;;  %v340_v29 = vmul.f32 %v336_v5, %v3148_v53 }
  0xbb   :  { %267 = vrot.lane.b32.xlu0 %v259_v8, %s2983_s22 }
  0xbc   :  { %v363_v10 = vpop.permute.xlu1 %362  ;;  %319 = vrot.lane.b32.xlu1 %v312_v9, %s2983_s22 }
  0xbd   :  { %v366_v16 = vmul.f32 %v363_v10, %v193_v54  ;;  %v365_v32 = vmul.f32 %v363_v10, %v3133_v46  ;;  %v367_v44 = vmul.f32 %v363_v10, %v3148_v53 }
  0xbf   :  { %290 = vrot.lane.b32.xlu0 %v284_v11, %s2983_s22 }
  0xc0   :  { %v390_v13 = vpop.permute.xlu1 %389  ;;  %346 = vrot.lane.b32.xlu1 %v339_v12, %s2983_s22 }
  0xc1   :  { %v393_v21 = vmul.f32 %v390_v13, %v193_v54  ;;  %v392_v48 = vmul.f32 %v390_v13, %v3133_v46  ;;  %v394_v52 = vmul.f32 %v390_v13, %v3148_v53 }
  0xc3   :  { %294 = vrot.lane.b32.xlu0 %v286_v14, %s2983_s22 }
  0xc4   :  { %v424_v17 = vpop.permute.xlu1 %423  ;;  %373 = vrot.lane.b32.xlu1 %v366_v16, %s2983_s22 }
  0xc5   :  { %v428_v18 = vsel %vm427_vm1, %v424_v17, %v426_v15  ;;  %v3205_v54 = vmul.f32 0.0, %v424_v17 }
  0xc6   :  { %v3175_v20 = vmul.f32 %v428_v18, %v3144_v51 }
  0xc7   :  { %317 = vrot.lane.b32.xlu0 %v311_v19, %s2983_s22 }
  0xc8   :  { %v440_v22 = vpop.permute.xlu1 %439  ;;  %400 = vrot.lane.b32.xlu1 %v393_v21, %s2983_s22  ;;  %v2874_v21 = vld [vmem:[%s4800_s1 + $0xb0] sm:$0xff] }
  0xc9   :  { %v443_v24 = vmul.f32 %v440_v22, %v3175_v20  ;;  %v442_v56 = vmul.f32 %v440_v22, %v3205_v54  ;;  %v444_v46 = vmul.f32 %v440_v22, %v3209_v55 }
  0xcb   :  { %321 = vrot.lane.b32.xlu0 %v313_v23, %s2983_s22 }
  0xcc   :  { %v468_v25 = vpop.permute.xlu1 %467  ;;  %450 = vrot.lane.b32.xlu1 %v443_v24, %s2984_s23 }
  0xcd   :  { %v471_v27 = vmul.f32 %v468_v25, %v3175_v20  ;;  %v470_v57 = vmul.f32 %v468_v25, %v3205_v54  ;;  %v472_v53 = vmul.f32 %v468_v25, %v3209_v55 }
  0xcf   :  { %344 = vrot.lane.b32.xlu0 %v338_v26, %s2983_s22 }
  0xd0   :  { %v495_v28 = vpop.permute.xlu1 %494  ;;  %478 = vrot.lane.b32.xlu1 %v471_v27, %s2984_s23  ;;  %v2875_v27 = vld [vmem:[%s4800_s1 + $0xb8] sm:$0xff] }
  0xd1   :  { %v498_v30 = vmul.f32 %v495_v28, %v3175_v20  ;;  %v497_v58 = vmul.f32 %v495_v28, %v3205_v54  ;;  %v499_v59 = vmul.f32 %v495_v28, %v3209_v55 }
  0xd3   :  { %348 = vrot.lane.b32.xlu0 %v340_v29, %s2983_s22 }
  0xd4   :  { %v522_v31 = vpop.permute.xlu1 %521  ;;  %505 = vrot.lane.b32.xlu1 %v498_v30, %s2984_s23 }
  0xd5   :  { %v525_v33 = vmul.f32 %v522_v31, %v3175_v20  ;;  %v524_v60 = vmul.f32 %v522_v31, %v3205_v54  ;;  %v526_v61 = vmul.f32 %v522_v31, %v3209_v55 }
  0xd7   :  { %371 = vrot.lane.b32.xlu0 %v365_v32, %s2983_s22 }
  0xd8   :  { %v549_v34 = vpop.permute.xlu1 %548  ;;  %532 = vrot.lane.b32.xlu1 %v525_v33, %s2984_s23 }
  0xd9   :  { %v552_v47 = vmul.f32 %v549_v34, %v3175_v20  ;;  %v551_v62 = vmul.f32 %v549_v34, %v3205_v54  ;;  %v553_v63 = vmul.f32 %v549_v34, %v3209_v55 }
  0xdb   :  { %375 = vrot.lane.b32.xlu0 %v367_v44, %s2983_s22 }
  0xdc   :  { %559 = vrot.lane.b32.xlu1 %v552_v47, %s2984_s23 }
  0xdf   :  { %398 = vrot.lane.b32.xlu0 %v392_v48, %s2983_s22 }
  0xe0   :  { %575 = vperm.xlu1 %2960, %v2873_v50  }
  0xe3   :  { %402 = vrot.lane.b32.xlu0 %v394_v52, %s2983_s22 }
  0xe7   :  { %448 = vrot.lane.b32.xlu0 %v442_v56, %s2984_s23 }
  0xeb   :  { %452 = vrot.lane.b32.xlu0 %v444_v46, %s2984_s23  ;;  %v2876_v46 = vld [vmem:[%s4801_s2 + $0x6] sm:$0x3] }
  0xef   :  { %476 = vrot.lane.b32.xlu0 %v470_v57, %s2984_s23 }
  0xf3   :  { %480 = vrot.lane.b32.xlu0 %v472_v53, %s2984_s23 }
  0xf7   :  { %503 = vrot.lane.b32.xlu0 %v497_v58, %s2984_s23 }
  0xfb   :  { %507 = vrot.lane.b32.xlu0 %v499_v59, %s2984_s23  ;;  %v658_v59 = vrot.slane %v2876_v46, %v3035_v6 }
  0xff   :  { %530 = vrot.lane.b32.xlu0 %v524_v60, %s2984_s23 }
 0x103   :  { %534 = vrot.lane.b32.xlu0 %v526_v61, %s2984_s23  ;;  %v662_v61 = vrot.slane %v2876_v46, %v3038_v7 }
 0x107   :  { %557 = vrot.lane.b32.xlu0 %v551_v62, %s2984_s23 }
 0x10b   :  { %561 = vrot.lane.b32.xlu0 %v553_v63, %s2984_s23 }
 0x119   :  { %v3277_v29 = vpop.permute.xlu0 %208 }
 0x11d   :  { %v3279_v30 = vpop.permute.xlu0 %212 }
 0x11e   :  { %v3231_v0 = vpop.permute.xlu1 %210 }
 0x121   :  { %v3281_v31 = vpop.permute.xlu0 %236 }
 0x122   :  { %v3233_v2 = vpop.permute.xlu1 %238 }
 0x125   :  { %v3283_v32 = vpop.permute.xlu0 %240 }
 0x126   :  { %v3235_v4 = vpop.permute.xlu1 %265 }
 0x129   :  { %v3285_v33 = vpop.permute.xlu0 %263 }
 0x12a   :  { %v3237_v5 = vpop.permute.xlu1 %292 }
 0x12d   :  { %v3287_v34 = vpop.permute.xlu0 %267 }
 0x12e   :  { %v3239_v8 = vpop.permute.xlu1 %319 }
 0x131   :  { %v3289_v44 = vpop.permute.xlu0 %290 }
 0x132   :  { %v3241_v9 = vpop.permute.xlu1 %346 }
 0x135   :  { %v3291_v47 = vpop.permute.xlu0 %294 }
 0x136   :  { %v3243_v10 = vpop.permute.xlu1 %373 }
 0x139   :  { %v3293_v48 = vpop.permute.xlu0 %317 }
 0x13a   :  { %v3245_v11 = vpop.permute.xlu1 %400 }
 0x13d   :  { %v3297_v52 = vpop.permute.xlu0 %321 }
 0x13e   :  { %v3247_v12 = vpop.permute.xlu1 %450 }
 0x141   :  { %v3304_v58 = vpop.permute.xlu0 %344 }
 0x142   :  { %v3249_v13 = vpop.permute.xlu1 %478 }
 0x146   :  { %v3251_v14 = vpop.permute.xlu1 %505 }
 0x147   :  { %4882 = vst [vmem:[#allocation6_spill] sm:$0xff] %v3251_v14 }
 0x14a   :  { %v3253_v15 = vpop.permute.xlu1 %532 }
 0x14b   :  { %4883 = vst [vmem:[#allocation7_spill] sm:$0xff] %v3253_v15 }
 0x14e   :  { %v3255_v16 = vpop.permute.xlu1 %559 }
 0x14f   :  { %4884 = vst [vmem:[#allocation8_spill] sm:$0xff] %v3255_v16 }
 0x15b   :  { %v576_v17 = vpop.permute.xlu1 %575 }
 0x15c   :  { %v579_v18 = vmul.f32 %v576_v17, %v3175_v20  ;;  %v578_v19 = vmul.f32 %v576_v17, %v3205_v54  ;;  %v580_v22 = vmul.f32 %v576_v17, %v3209_v55 }
 0x15e   :  { %586 = vrot.lane.b32.xlu1 %v579_v18, %s2984_s23  ;;  %584 = vrot.lane.b32.xlu0 %v578_v19, %s2984_s23 }
 0x162   :  { %602 = vperm.xlu1 %2960, %v2874_v21   ;;  %588 = vrot.lane.b32.xlu0 %v580_v22, %s2984_s23 }
 0x1d0   :  { %v3266_v23 = vpop.permute.xlu1 %586 }
 0x1d1   :  { %4885 = vst [vmem:[#allocation9_spill] sm:$0xff] %v3266_v23 }
 0x1dd   :  { %v603_v24 = vpop.permute.xlu1 %602 }
 0x1de   :  { %v606_v25 = vmul.f32 %v603_v24, %v3175_v20  ;;  %v605_v26 = vmul.f32 %v603_v24, %v3205_v54  ;;  %v607_v28 = vmul.f32 %v603_v24, %v3209_v55 }
 0x1e0   :  { %613 = vrot.lane.b32.xlu1 %v606_v25, %s2984_s23  ;;  %611 = vrot.lane.b32.xlu0 %v605_v26, %s2984_s23 }
 0x1e4   :  { %629 = vperm.xlu1 %2960, %v2875_v27   ;;  %615 = vrot.lane.b32.xlu0 %v607_v28, %s2984_s23 }
 0x252   :  { %v3295_v50 = vpop.permute.xlu1 %613 }
 0x253   :  { %4886 = vst [vmem:[#allocation10_spill] sm:$0xff] %v3295_v50 }
 0x25f   :  { %v630_v56 = vpop.permute.xlu1 %629 }
 0x260   :  { %v633_v57 = vmul.f32 %v630_v56, %v3175_v20  ;;  %v632_v53 = vmul.f32 %v630_v56, %v3205_v54  ;;  %v634_v60 = vmul.f32 %v630_v56, %v3209_v55  ;;  %v2877_v20 = vld [vmem:[%s4800_s1 + $0xc0] sm:$0xff]  ;;  %v3316_v54 = vpop.permute.xlu0 %348 }
 0x262   :  { %640 = vrot.lane.b32.xlu1 %v633_v57, %s2984_s23  ;;  %638 = vrot.lane.b32.xlu0 %v632_v53, %s2984_s23 }
 0x264   :  { %v3319_v62 = vpop.permute.xlu0 %371 }
 0x266   :  { %663 = vrot.lane.b32.xlu1 %v658_v59, %s2983_s22  ;;  %642 = vrot.lane.b32.xlu0 %v634_v60, %s2984_s23 }
 0x268   :  { %v3321_v63 = vpop.permute.xlu0 %375 }
 0x26a   :  { %678 = vperm.xlu1 %2960, %v2877_v20   ;;  %665 = vrot.lane.b32.xlu0 %v662_v61, %s2983_s22 }
 0x26c   :  { %v3323_v55 = vpop.permute.xlu0 %398 }
 0x270   :  { %v3325_v17 = vpop.permute.xlu0 %402 }
 0x274   :  { %v3327_v18 = vpop.permute.xlu0 %448 }
 0x278   :  { %v3329_v19 = vpop.permute.xlu0 %452 }
 0x27c   :  { %v3331_v21 = vpop.permute.xlu0 %476 }
 0x27d   :  { %4887 = vst [vmem:[#allocation11_spill] sm:$0xff] %v3331_v21 }
 0x280   :  { %v3333_v22 = vpop.permute.xlu0 %480 }
 0x281   :  { %4888 = vst [vmem:[#allocation12_spill] sm:$0xff] %v3333_v22 }
 0x284   :  { %v3335_v24 = vpop.permute.xlu0 %503 }
 0x285   :  { %4889 = vst [vmem:[#allocation13_spill] sm:$0xff] %v3335_v24 }
 0x288   :  { %v3337_v25 = vpop.permute.xlu0 %507 }
 0x289   :  { %4890 = vst [vmem:[#allocation14_spill] sm:$0xff] %v3337_v25 }
 0x28c   :  { %v3339_v26 = vpop.permute.xlu0 %530 }
 0x28d   :  { %4891 = vst [vmem:[#allocation15_spill] sm:$0xff] %v3339_v26 }
 0x290   :  { %v3341_v27 = vpop.permute.xlu0 %534 }
 0x291   :  { %4892 = vst [vmem:[#allocation16_spill] sm:$0xff] %v3341_v27 }
 0x294   :  { %v3343_v28 = vpop.permute.xlu0 %557 }
 0x295   :  { %4893 = vst [vmem:[#allocation17_spill] sm:$0xff] %v3343_v28 }
 0x298   :  { %v3345_v56 = vpop.permute.xlu0 %561 }
 0x299   :  { %4894 = vst [vmem:[#allocation18_spill] sm:$0xff] %v3345_v56 }
 0x29c   :  { %v3347_v46 = vpop.permute.xlu0 %584 }
 0x29d   :  { %4895 = vst [vmem:[#allocation19_spill] sm:$0xff] %v3347_v46 }
 0x2a0   :  { %v3349_v57 = vpop.permute.xlu0 %588 }
 0x2a1   :  { %4896 = vst [vmem:[#allocation20_spill] sm:$0xff] %v3349_v57 }
 0x2a4   :  { %v3351_v53 = vpop.permute.xlu0 %611 }
 0x2a5   :  { %4897 = vst [vmem:[#allocation21_spill] sm:$0xff] %v3351_v53 }
 0x2a8   :  { %v3353_v59 = vpop.permute.xlu0 %615 }
 0x2a9   :  { %4898 = vst [vmem:[#allocation22_spill] sm:$0xff] %v3353_v59 }
 0x2d4   :  { %v3355_v60 = vpop.permute.xlu0 %638  ;;  %v3359_v20 = vpop.permute.xlu1 %640 }
 0x2d5   :  { %4899 = vst [vmem:[#allocation23_spill] sm:$0xff] %v3355_v60  ;;  %4901 = vst [vmem:[#allocation25_spill] sm:$0xff] %v3359_v20 }
 0x2d8   :  { %v3357_v61 = vpop.permute.xlu0 %642  ;;  %v664_v50 = vpop.permute.xlu1 %663 }
 0x2d9   :  { %4900 = vst [vmem:[#allocation24_spill] sm:$0xff] %v3357_v61  ;;  %v3362_v56 = vmul.f32 0.0, %v664_v50 }
 0x2dc   :  { %v666_v1 = vpop.permute.xlu0 %665 }
 0x2dd   :  { %v667_v23 = vsel %vm214_vm2, %v664_v50, %v666_v1  ;;  %v3368_v53 = vmul.f32 %v666_v1, %v3139_v49  ;;  %v2878_v50 = vld [vmem:[%s4800_s1 + $0xc8] sm:$0xff] }
 0x2de   :  { %v3365_v46 = vmul.f32 %v667_v23, %v3144_v51 }
 0x2e5   :  { %v679_v57 = vpop.permute.xlu1 %678 }
 0x2e6   :  { %v681_v60 = vmul.f32 %v679_v57, %v3362_v56  ;;  %v682_v61 = vmul.f32 %v679_v57, %v3365_v46  ;;  %v683_v20 = vmul.f32 %v679_v57, %v3368_v53 }
 0x2e8   :  { %687 = vrot.lane.b32.xlu0 %v681_v60, %s2981_s14  ;;  %689 = vrot.lane.b32.xlu1 %v682_v61, %s2981_s14  ;;  %v2879_v60 = vld [vmem:[%s4800_s1 + $0xd0] sm:$0xff] }
 0x2ec   :  { %691 = vrot.lane.b32.xlu0 %v683_v20, %s2981_s14  ;;  %705 = vperm.xlu1 %2960, %v2878_v50  }
 0x35a   :  { %v3379_v23 = vpop.permute.xlu1 %689 }
 0x35b   :  { %4902 = vst [vmem:[#allocation26_spill] sm:$0xff] %v3379_v23 }
 0x367   :  { %v706_v1 = vpop.permute.xlu1 %705 }
 0x368   :  { %v709_v59 = vmul.f32 %v706_v1, %v3365_v46  ;;  %v708_v28 = vmul.f32 %v706_v1, %v3362_v56  ;;  %v710_v57 = vmul.f32 %v706_v1, %v3368_v53 }
 0x36a   :  { %716 = vrot.lane.b32.xlu1 %v709_v59, %s2981_s14  ;;  %714 = vrot.lane.b32.xlu0 %v708_v28, %s2981_s14  ;;  %v2880_v28 = vld [vmem:[%s4800_s1 + $0xd8] sm:$0xff] }
 0x36e   :  { %732 = vperm.xlu1 %2960, %v2879_v60   ;;  %718 = vrot.lane.b32.xlu0 %v710_v57, %s2981_s14 }
 0x3dc   :  { %v3390_v61 = vpop.permute.xlu1 %716 }
 0x3dd   :  { %4903 = vst [vmem:[#allocation27_spill] sm:$0xff] %v3390_v61 }
 0x3e9   :  { %v733_v20 = vpop.permute.xlu1 %732 }
 0x3ea   :  { %v736_v50 = vmul.f32 %v733_v20, %v3365_v46  ;;  %v735_v23 = vmul.f32 %v733_v20, %v3362_v56  ;;  %v737_v59 = vmul.f32 %v733_v20, %v3368_v53 }
 0x3ec   :  { %743 = vrot.lane.b32.xlu1 %v736_v50, %s2981_s14  ;;  %741 = vrot.lane.b32.xlu0 %v735_v23, %s2981_s14  ;;  %v2881_v23 = vld [vmem:[%s4800_s1 + $0xe0] sm:$0xff] }
 0x3f0   :  { %759 = vperm.xlu1 %2960, %v2880_v28   ;;  %745 = vrot.lane.b32.xlu0 %v737_v59, %s2981_s14 }
 0x45e   :  { %v3401_v1 = vpop.permute.xlu1 %743 }
 0x45f   :  { %4904 = vst [vmem:[#allocation28_spill] sm:$0xff] %v3401_v1 }
 0x46b   :  { %v760_v60 = vpop.permute.xlu1 %759 }
 0x46c   :  { %v763_v57 = vmul.f32 %v760_v60, %v3365_v46  ;;  %v762_v61 = vmul.f32 %v760_v60, %v3362_v56  ;;  %v764_v20 = vmul.f32 %v760_v60, %v3368_v53 }
 0x46e   :  { %770 = vrot.lane.b32.xlu1 %v763_v57, %s2981_s14  ;;  %768 = vrot.lane.b32.xlu0 %v762_v61, %s2981_s14  ;;  %v2882_v61 = vld [vmem:[%s4800_s1 + $0xe8] sm:$0xff] }
 0x472   :  { %786 = vperm.xlu1 %2960, %v2881_v23   ;;  %772 = vrot.lane.b32.xlu0 %v764_v20, %s2981_s14 }
 0x4e0   :  { %v3412_v50 = vpop.permute.xlu1 %770 }
 0x4e1   :  { %4905 = vst [vmem:[#allocation29_spill] sm:$0xff] %v3412_v50 }
 0x4ed   :  { %v787_v28 = vpop.permute.xlu1 %786 }
 0x4ee   :  { %v790_v59 = vmul.f32 %v787_v28, %v3365_v46  ;;  %v789_v1 = vmul.f32 %v787_v28, %v3362_v56  ;;  %v791_v60 = vmul.f32 %v787_v28, %v3368_v53 }
 0x4f0   :  { %797 = vrot.lane.b32.xlu1 %v790_v59, %s2981_s14  ;;  %795 = vrot.lane.b32.xlu0 %v789_v1, %s2981_s14  ;;  %v2883_v1 = vld [vmem:[%s4800_s1 + $0xf0] sm:$0xff] }
 0x4f4   :  { %813 = vperm.xlu1 %2960, %v2882_v61   ;;  %799 = vrot.lane.b32.xlu0 %v791_v60, %s2981_s14 }
 0x562   :  { %v3423_v57 = vpop.permute.xlu1 %797 }
 0x563   :  { %4906 = vst [vmem:[#allocation30_spill] sm:$0xff] %v3423_v57 }
 0x56f   :  { %v814_v23 = vpop.permute.xlu1 %813 }
 0x570   :  { %v816_v20 = vmul.f32 %v814_v23, %v3362_v56  ;;  %v817_v50 = vmul.f32 %v814_v23, %v3365_v46  ;;  %v818_v28 = vmul.f32 %v814_v23, %v3368_v53 }
 0x572   :  { %824 = vrot.lane.b32.xlu1 %v817_v50, %s2981_s14  ;;  %822 = vrot.lane.b32.xlu0 %v816_v20, %s2981_s14  ;;  %v2884_v50 = vld [vmem:[%s4800_s1 + $0xf8] sm:$0xff] }
 0x576   :  { %840 = vperm.xlu1 %2960, %v2883_v1   ;;  %826 = vrot.lane.b32.xlu0 %v818_v28, %s2981_s14 }
 0x5e4   :  { %v3434_v59 = vpop.permute.xlu1 %824 }
 0x5e5   :  { %4907 = vst [vmem:[#allocation31_spill] sm:$0xff] %v3434_v59 }
 0x5f1   :  { %v841_v61 = vpop.permute.xlu1 %840 }
 0x5f2   :  { %v843_v60 = vmul.f32 %v841_v61, %v3362_v56  ;;  %v844_v57 = vmul.f32 %v841_v61, %v3365_v46  ;;  %v845_v23 = vmul.f32 %v841_v61, %v3368_v53 }
 0x5f4   :  { %851 = vrot.lane.b32.xlu1 %v844_v57, %s2981_s14  ;;  %849 = vrot.lane.b32.xlu0 %v843_v60, %s2981_s14  ;;  %v2885_v57 = vld [vmem:[%s4800_s1 + $0x100] sm:$0xff] }
 0x5f8   :  { %867 = vperm.xlu1 %2960, %v2884_v50   ;;  %853 = vrot.lane.b32.xlu0 %v845_v23, %s2981_s14 }
 0x666   :  { %v3445_v20 = vpop.permute.xlu1 %851 }
 0x667   :  { %4908 = vst [vmem:[#allocation32_spill] sm:$0xff] %v3445_v20 }
 0x673   :  { %v868_v1 = vpop.permute.xlu1 %867 }
 0x674   :  { %v870_v28 = vmul.f32 %v868_v1, %v3362_v56  ;;  %v871_v59 = vmul.f32 %v868_v1, %v3365_v46  ;;  %v872_v61 = vmul.f32 %v868_v1, %v3368_v53  ;;  %v3465_v53 = vpop.permute.xlu0 %687 }
 0x675   :  { %4910 = vst [vmem:[#allocation34_spill] sm:$0xff] %v3465_v53 }
 0x676   :  { %878 = vrot.lane.b32.xlu1 %v871_v59, %s2981_s14  ;;  %876 = vrot.lane.b32.xlu0 %v870_v28, %s2981_s14  ;;  %v2886_v59 = vld [vmem:[%s4800_s1 + $0x108] sm:$0xff] }
 0x678   :  { %v3467_v23 = vpop.permute.xlu0 %691 }
 0x679   :  { %4911 = vst [vmem:[#allocation35_spill] sm:$0xff] %v3467_v23 }
 0x67a   :  { %894 = vperm.xlu1 %2960, %v2885_v57   ;;  %880 = vrot.lane.b32.xlu0 %v872_v61, %s2981_s14 }
 0x67c   :  { %v3469_v1 = vpop.permute.xlu0 %714 }
 0x67d   :  { %4912 = vst [vmem:[#allocation36_spill] sm:$0xff] %v3469_v1 }
 0x680   :  { %v3471_v28 = vpop.permute.xlu0 %718 }
 0x681   :  { %4913 = vst [vmem:[#allocation37_spill] sm:$0xff] %v3471_v28 }
 0x684   :  { %v3473_v57 = vpop.permute.xlu0 %741 }
 0x685   :  { %4914 = vst [vmem:[#allocation38_spill] sm:$0xff] %v3473_v57 }
 0x688   :  { %v3475_v61 = vpop.permute.xlu0 %745 }
 0x689   :  { %4915 = vst [vmem:[#allocation39_spill] sm:$0xff] %v3475_v61 }
 0x6e8   :  { %v3456_v60 = vpop.permute.xlu1 %878 }
 0x6e9   :  { %4909 = vst [vmem:[#allocation33_spill] sm:$0xff] %v3456_v60 }
 0x6f5   :  { %v895_v50 = vpop.permute.xlu1 %894 }
 0x6f6   :  { %v897_v56 = vmul.f32 %v895_v50, %v3144_v51  ;;  %v898_v46 = vmul.f32 %v895_v50, %v3139_v49  ;;  %v3477_v50 = vpop.permute.xlu0 %768 }
 0x6f7   :  { %4916 = vst [vmem:[#allocation40_spill] sm:$0xff] %v3477_v50 }
 0x6f8   :  { %903 = vrot.lane.b32.xlu1 %v898_v46, %s2980_s27  ;;  %901 = vrot.lane.b32.xlu0 %v897_v56, %s2980_s27 }
 0x6fa   :  { %v3479_v56 = vpop.permute.xlu0 %772 }
 0x6fb   :  { %4917 = vst [vmem:[#allocation41_spill] sm:$0xff] %v3479_v56 }
 0x6fc   :  { %916 = vperm.xlu0 %2961, %v2886_v59  }
 0x6fe   :  { %v3481_v46 = vpop.permute.xlu0 %795 }
 0x6ff   :  { %4918 = vst [vmem:[#allocation42_spill] sm:$0xff] %v3481_v46 }
 0x702   :  { %v3483_v60 = vpop.permute.xlu0 %799 }
 0x703   :  { %4919 = vst [vmem:[#allocation43_spill] sm:$0xff] %v3483_v60 }
 0x706   :  { %v3485_v59 = vpop.permute.xlu0 %822 }
 0x707   :  { %4920 = vst [vmem:[#allocation44_spill] sm:$0xff] %v3485_v59 }
 0x70a   :  { %v3487_v20 = vpop.permute.xlu0 %826 }
 0x70b   :  { %4921 = vst [vmem:[#allocation45_spill] sm:$0xff] %v3487_v20 }
 0x70e   :  { %v3489_v23 = vpop.permute.xlu0 %849 }
 0x70f   :  { %4922 = vst [vmem:[#allocation46_spill] sm:$0xff] %v3489_v23  ;;  %v2887_v23 = vld [vmem:[%s4800_s1 + $0x110] sm:$0xff] }
 0x712   :  { %v3491_v1 = vpop.permute.xlu0 %853 }
 0x713   :  { %4923 = vst [vmem:[#allocation47_spill] sm:$0xff] %v3491_v1 }
 0x716   :  { %v3493_v28 = vpop.permute.xlu0 %876 }
 0x717   :  { %4924 = vst [vmem:[#allocation48_spill] sm:$0xff] %v3493_v28 }
 0x71a   :  { %v3495_v57 = vpop.permute.xlu0 %880 }
 0x71b   :  { %4925 = vst [vmem:[#allocation49_spill] sm:$0xff] %v3495_v57 }
 0x76a   :  { %v3497_v61 = vpop.permute.xlu0 %901  ;;  %v3506_v1 = vpop.permute.xlu1 %903 }
 0x76b   :  { %4926 = vst [vmem:[#allocation50_spill] sm:$0xff] %v3497_v61  ;;  %4927 = vst [vmem:[#allocation51_spill] sm:$0xff] %v3506_v1 }
 0x777   :  { %v917_v50 = vpop.permute.xlu0 %916 }
 0x778   :  { %v919_v56 = vmul.f32 %v917_v50, %v3144_v51  ;;  %v920_v46 = vmul.f32 %v917_v50, %v3139_v49  ;;  %v2888_v50 = vld [vmem:[%s4800_s1 + $0x118] sm:$0xff] }
 0x77a   :  { %925 = vrot.lane.b32.xlu0 %v920_v46, %s2980_s27  ;;  %923 = vrot.lane.b32.xlu1 %v919_v56, %s2980_s27 }
 0x77e   :  { %938 = vperm.xlu1 %2960, %v2887_v23  }
 0x7ec   :  { %v3508_v28 = vpop.permute.xlu1 %923  ;;  %v3517_v56 = vpop.permute.xlu0 %925 }
 0x7ed   :  { %4928 = vst [vmem:[#allocation52_spill] sm:$0xff] %v3508_v28  ;;  %4929 = vst [vmem:[#allocation53_spill] sm:$0xff] %v3517_v56 }
 0x7f9   :  { %v939_v57 = vpop.permute.xlu1 %938 }
 0x7fa   :  { %v941_v61 = vmul.f32 %v939_v57, %v3144_v51  ;;  %v942_v20 = vmul.f32 %v939_v57, %v3139_v49 }
 0x7fc   :  { %947 = vrot.lane.b32.xlu1 %v942_v20, %s2980_s27  ;;  %945 = vrot.lane.b32.xlu0 %v941_v61, %s2980_s27  ;;  %v2889_v20 = vld [vmem:[%s4800_s1 + $0x120] sm:$0xff] }
 0x800   :  { %960 = vperm.xlu0 %2961, %v2888_v50  }
 0x86e   :  { %v3519_v23 = vpop.permute.xlu0 %945  ;;  %v3528_v57 = vpop.permute.xlu1 %947 }
 0x86f   :  { %4930 = vst [vmem:[#allocation54_spill] sm:$0xff] %v3519_v23  ;;  %4931 = vst [vmem:[#allocation55_spill] sm:$0xff] %v3528_v57 }
 0x87b   :  { %v961_v46 = vpop.permute.xlu0 %960 }
 0x87c   :  { %v963_v28 = vmul.f32 %v961_v46, %v3144_v51  ;;  %v964_v1 = vmul.f32 %v961_v46, %v3139_v49 }
 0x87e   :  { %969 = vrot.lane.b32.xlu0 %v964_v1, %s2980_s27  ;;  %967 = vrot.lane.b32.xlu1 %v963_v28, %s2980_s27  ;;  %v2890_v1 = vld [vmem:[%s4800_s1 + $0x128] sm:$0xff] }
 0x882   :  { %982 = vperm.xlu1 %2960, %v2889_v20  }
 0x8f0   :  { %v3530_v61 = vpop.permute.xlu1 %967  ;;  %v3539_v28 = vpop.permute.xlu0 %969 }
 0x8f1   :  { %4932 = vst [vmem:[#allocation56_spill] sm:$0xff] %v3530_v61  ;;  %4933 = vst [vmem:[#allocation57_spill] sm:$0xff] %v3539_v28 }
 0x8fd   :  { %v983_v50 = vpop.permute.xlu1 %982 }
 0x8fe   :  { %v985_v23 = vmul.f32 %v983_v50, %v3144_v51  ;;  %v986_v56 = vmul.f32 %v983_v50, %v3139_v49 }
 0x900   :  { %991 = vrot.lane.b32.xlu1 %v986_v56, %s2980_s27  ;;  %989 = vrot.lane.b32.xlu0 %v985_v23, %s2980_s27  ;;  %v2891_v56 = vld [vmem:[%s4800_s1 + $0x130] sm:$0xff] }
 0x904   :  { %1004 = vperm.xlu0 %2961, %v2890_v1  }
 0x972   :  { %v3541_v46 = vpop.permute.xlu0 %989  ;;  %v3550_v23 = vpop.permute.xlu1 %991 }
 0x973   :  { %4934 = vst [vmem:[#allocation58_spill] sm:$0xff] %v3541_v46  ;;  %4935 = vst [vmem:[#allocation59_spill] sm:$0xff] %v3550_v23 }
 0x97f   :  { %v1005_v20 = vpop.permute.xlu0 %1004 }
 0x980   :  { %v1007_v61 = vmul.f32 %v1005_v20, %v3144_v51  ;;  %v1008_v57 = vmul.f32 %v1005_v20, %v3139_v49 }
 0x982   :  { %1013 = vrot.lane.b32.xlu0 %v1008_v57, %s2980_s27  ;;  %1011 = vrot.lane.b32.xlu1 %v1007_v61, %s2980_s27  ;;  %v2892_v57 = vld [vmem:[%s4800_s1 + $0x138] sm:$0xff] }
 0x986   :  { %1026 = vperm.xlu1 %2960, %v2891_v56  }
 0x9f4   :  { %v3552_v50 = vpop.permute.xlu1 %1011  ;;  %v3561_v61 = vpop.permute.xlu0 %1013 }
 0x9f5   :  { %4936 = vst [vmem:[#allocation60_spill] sm:$0xff] %v3552_v50  ;;  %4937 = vst [vmem:[#allocation61_spill] sm:$0xff] %v3561_v61  ;;  %v2893_v50 = vld [vmem:[%s4801_s2 + $0xa] sm:$0x3] }
 0xa01   :  { %v1027_v1 = vpop.permute.xlu1 %1026 }
 0xa02   :  { %v1029_v46 = vmul.f32 %v1027_v1, %v3144_v51  ;;  %v1030_v28 = vmul.f32 %v1027_v1, %v3139_v49 }
 0xa04   :  { %1035 = vrot.lane.b32.xlu1 %v1030_v28, %s2980_s27  ;;  %1033 = vrot.lane.b32.xlu0 %v1029_v46, %s2980_s27  ;;  %v1079_v46 = vrot.slane %v2893_v50, %v3038_v7 }
 0xa08   :  { %1048 = vperm.xlu0 %2961, %v2892_v57   ;;  %v1075_v57 = vrot.slane %v2893_v50, %v3035_v6 }
 0xa76   :  { %v3563_v20 = vpop.permute.xlu0 %1033  ;;  %v3577_v61 = vpop.permute.xlu1 %1035 }
 0xa77   :  { %4938 = vst [vmem:[#allocation62_spill] sm:$0xff] %v3563_v20  ;;  %v2894_v20 = vld [vmem:[%s4800_s1 + $0x140] sm:$0xff]  ;;  %4939 = vst [vmem:[#allocation63_spill] sm:$0xff] %v3577_v61 }
 0xa83   :  { %v1049_v56 = vpop.permute.xlu0 %1048 }
 0xa84   :  { %v1051_v1 = vmul.f32 %v1049_v56, %v3144_v51  ;;  %v1052_v28 = vmul.f32 %v1049_v56, %v3139_v49 }
 0xa86   :  { %1057 = vrot.lane.b32.xlu0 %v1052_v28, %s2980_s27  ;;  %1055 = vrot.lane.b32.xlu1 %v1051_v1, %s2980_s27  ;;  %s2986_s27 = smov 110  }
 0xa8a   :  { %1082 = vrot.lane.b32.xlu0 %v1079_v46, %s2985_s16  ;;  %1080 = vrot.lane.b32.xlu1 %v1075_v57, %s2985_s16  ;;  %s4325_s16 = sld [smem:[#allocation3 + $0x1]] }
 0xa8e   :  { %1096 = vperm.xlu1 %2960, %v2894_v20  }
 0xaf8   :  { %v3579_v23 = vpop.permute.xlu0 %1057  ;;  %v3581_v56 = vpop.permute.xlu1 %1055 }
 0xaf9   :  { %4940 = vst [vmem:[#allocation64_spill] sm:$0xff] %v3579_v23  ;;  %4941 = vst [vmem:[#allocation65_spill] sm:$0xff] %v3581_v56 }
 0xafc   :  { %v1083_v28 = vpop.permute.xlu0 %1082  ;;  %v1081_v1 = vpop.permute.xlu1 %1080 }
 0xafd   :  { %v1085_v59 = vsel %vm1084_vm3, %v1081_v1, %v1083_v28  ;;  %v3584_v50 = vmul.f32 %v1081_v1, %v3144_v51  ;;  %v3589_v60 = vmul.f32 0.0, %v1083_v28  ;;  %v2895_v1 = vld [vmem:[%s4800_s1 + $0x148] sm:$0xff] }
 0xafe   :  { %v3587_v46 = vmul.f32 %v1085_v59, %v3139_v49 }
 0xb09   :  { %v1097_v57 = vpop.permute.xlu1 %1096 }
 0xb0a   :  { %v1099_v20 = vmul.f32 %v1097_v57, %v3584_v50  ;;  %v1100_v61 = vmul.f32 %v1097_v57, %v3587_v46  ;;  %v1101_v56 = vmul.f32 %v1097_v57, %v3589_v60 }
 0xb0c   :  { %1107 = vrot.lane.b32.xlu1 %v1100_v61, %s2986_s27  ;;  %1105 = vrot.lane.b32.xlu0 %v1099_v20, %s2986_s27  ;;  %v2896_v61 = vld [vmem:[%s4800_s1 + $0x150] sm:$0xff] }
 0xb10   :  { %1124 = vperm.xlu1 %2960, %v2895_v1   ;;  %1109 = vrot.lane.b32.xlu0 %v1101_v56, %s2986_s27 }
 0xb7e   :  { %v3600_v59 = vpop.permute.xlu1 %1107 }
 0xb7f   :  { %4942 = vst [vmem:[#allocation66_spill] sm:$0xff] %v3600_v59 }
 0xb8b   :  { %v1125_v28 = vpop.permute.xlu1 %1124 }
 0xb8c   :  { %v1127_v23 = vmul.f32 %v1125_v28, %v3584_v50  ;;  %v1128_v53 = vmul.f32 %v1125_v28, %v3587_v46  ;;  %v1129_v57 = vmul.f32 %v1125_v28, %v3589_v60 }
 0xb8e   :  { %1135 = vrot.lane.b32.xlu1 %v1128_v53, %s2986_s27  ;;  %1133 = vrot.lane.b32.xlu0 %v1127_v23, %s2986_s27  ;;  %v2897_v53 = vld [vmem:[%s4800_s1 + $0x158] sm:$0xff] }
 0xb92   :  { %1151 = vperm.xlu1 %2960, %v2896_v61   ;;  %1137 = vrot.lane.b32.xlu0 %v1129_v57, %s2986_s27 }
 0xc00   :  { %v3611_v56 = vpop.permute.xlu1 %1135 }
 0xc01   :  { %4943 = vst [vmem:[#allocation67_spill] sm:$0xff] %v3611_v56 }
 0xc0d   :  { %v1152_v20 = vpop.permute.xlu1 %1151 }
 0xc0e   :  { %v1154_v1 = vmul.f32 %v1152_v20, %v3584_v50  ;;  %v1155_v59 = vmul.f32 %v1152_v20, %v3587_v46  ;;  %v1156_v23 = vmul.f32 %v1152_v20, %v3589_v60 }
 0xc10   :  { %1162 = vrot.lane.b32.xlu1 %v1155_v59, %s2986_s27  ;;  %1160 = vrot.lane.b32.xlu0 %v1154_v1, %s2986_s27  ;;  %v2898_v59 = vld [vmem:[%s4800_s1 + $0x160] sm:$0xff] }
 0xc14   :  { %1178 = vperm.xlu1 %2960, %v2897_v53   ;;  %1164 = vrot.lane.b32.xlu0 %v1156_v23, %s2986_s27 }
 0xc82   :  { %v3622_v28 = vpop.permute.xlu1 %1162 }
 0xc83   :  { %4944 = vst [vmem:[#allocation68_spill] sm:$0xff] %v3622_v28 }
 0xc8f   :  { %v1179_v61 = vpop.permute.xlu1 %1178 }
 0xc90   :  { %v1181_v57 = vmul.f32 %v1179_v61, %v3584_v50  ;;  %v1182_v56 = vmul.f32 %v1179_v61, %v3587_v46  ;;  %v1183_v20 = vmul.f32 %v1179_v61, %v3589_v60 }
 0xc92   :  { %1189 = vrot.lane.b32.xlu1 %v1182_v56, %s2986_s27  ;;  %1187 = vrot.lane.b32.xlu0 %v1181_v57, %s2986_s27  ;;  %v2899_v56 = vld [vmem:[%s4800_s1 + $0x168] sm:$0xff] }
 0xc96   :  { %1205 = vperm.xlu1 %2960, %v2898_v59   ;;  %1191 = vrot.lane.b32.xlu0 %v1183_v20, %s2986_s27 }
 0xd04   :  { %v3633_v1 = vpop.permute.xlu1 %1189 }
 0xd05   :  { %4945 = vst [vmem:[#allocation69_spill] sm:$0xff] %v3633_v1 }
 0xd11   :  { %v1206_v53 = vpop.permute.xlu1 %1205 }
 0xd12   :  { %v1208_v23 = vmul.f32 %v1206_v53, %v3584_v50  ;;  %v1209_v28 = vmul.f32 %v1206_v53, %v3587_v46  ;;  %v1210_v61 = vmul.f32 %v1206_v53, %v3589_v60 }
 0xd14   :  { %1216 = vrot.lane.b32.xlu1 %v1209_v28, %s2986_s27  ;;  %1214 = vrot.lane.b32.xlu0 %v1208_v23, %s2986_s27  ;;  %v2900_v28 = vld [vmem:[%s4800_s1 + $0x170] sm:$0xff] }
 0xd18   :  { %1232 = vperm.xlu1 %2960, %v2899_v56   ;;  %1218 = vrot.lane.b32.xlu0 %v1210_v61, %s2986_s27 }
 0xd86   :  { %v3644_v57 = vpop.permute.xlu1 %1216 }
 0xd87   :  { %4946 = vst [vmem:[#allocation70_spill] sm:$0xff] %v3644_v57 }
 0xd93   :  { %v1233_v59 = vpop.permute.xlu1 %1232 }
 0xd94   :  { %v1235_v20 = vmul.f32 %v1233_v59, %v3584_v50  ;;  %v1236_v1 = vmul.f32 %v1233_v59, %v3587_v46  ;;  %v1237_v53 = vmul.f32 %v1233_v59, %v3589_v60 }
 0xd96   :  { %1243 = vrot.lane.b32.xlu1 %v1236_v1, %s2986_s27  ;;  %1241 = vrot.lane.b32.xlu0 %v1235_v20, %s2986_s27  ;;  %v2901_v1 = vld [vmem:[%s4800_s1 + $0x178] sm:$0xff] }
 0xd9a   :  { %1259 = vperm.xlu1 %2960, %v2900_v28   ;;  %1245 = vrot.lane.b32.xlu0 %v1237_v53, %s2986_s27  ;;  %v2902_v53 = vld [vmem:[%s4801_s2 + $0xc] sm:$0x3] }
 0xe08   :  { %v3655_v23 = vpop.permute.xlu1 %1243 }
 0xe09   :  { %4947 = vst [vmem:[#allocation71_spill] sm:$0xff] %v3655_v23 }
 0xe15   :  { %v1260_v56 = vpop.permute.xlu1 %1259 }
 0xe16   :  { %v1262_v61 = vmul.f32 %v1260_v56, %v3584_v50  ;;  %v1263_v57 = vmul.f32 %v1260_v56, %v3587_v46  ;;  %v1264_v59 = vmul.f32 %v1260_v56, %v3589_v60  ;;  %v1315_v56 = vrot.slane %v2902_v53, %v3035_v6 }
 0xe18   :  { %1270 = vrot.lane.b32.xlu1 %v1263_v57, %s2986_s27  ;;  %1268 = vrot.lane.b32.xlu0 %v1262_v61, %s2986_s27 }
 0xe1c   :  { %1286 = vperm.xlu1 %2960, %v2901_v1   ;;  %1272 = vrot.lane.b32.xlu0 %v1264_v59, %s2986_s27  ;;  %v1319_v59 = vrot.slane %v2902_v53, %v3038_v7 }
 0xe8a   :  { %v3666_v20 = vpop.permute.xlu1 %1270 }
 0xe8b   :  { %4948 = vst [vmem:[#allocation72_spill] sm:$0xff] %v3666_v20 }
 0xe97   :  { %v1287_v28 = vpop.permute.xlu1 %1286 }
 0xe98   :  { %v1289_v57 = vmul.f32 %v1287_v28, %v3584_v50  ;;  %v1290_v61 = vmul.f32 %v1287_v28, %v3587_v46  ;;  %v1291_v1 = vmul.f32 %v1287_v28, %v3589_v60  ;;  %v2903_v50 = vld [vmem:[%s4800_s1 + $0x180] sm:$0xff]  ;;  %v3682_v46 = vpop.permute.xlu0 %1105 }
 0xe99   :  { %4949 = vst [vmem:[#allocation73_spill] sm:$0xff] %v3682_v46 }
 0xe9a   :  { %1297 = vrot.lane.b32.xlu1 %v1290_v61, %s2986_s27  ;;  %1295 = vrot.lane.b32.xlu0 %v1289_v57, %s2986_s27 }
 0xe9c   :  { %v3684_v61 = vpop.permute.xlu0 %1109 }
 0xe9d   :  { %4950 = vst [vmem:[#allocation74_spill] sm:$0xff] %v3684_v61 }
 0xe9e   :  { %1320 = vrot.lane.b32.xlu1 %v1315_v56, %s2987_s8  ;;  %1299 = vrot.lane.b32.xlu0 %v1291_v1, %s2986_s27  ;;  %s2989_s27 = smov 16  }
 0xea0   :  { %v3686_v57 = vpop.permute.xlu0 %1133 }
 0xea1   :  { %4951 = vst [vmem:[#allocation75_spill] sm:$0xff] %v3686_v57 }
 0xea2   :  { %1336 = vperm.xlu1 %2960, %v2903_v50   ;;  %1322 = vrot.lane.b32.xlu0 %v1319_v59, %s2987_s8 }
 0xea4   :  { %v3688_v20 = vpop.permute.xlu0 %1137 }
 0xea5   :  { %4952 = vst [vmem:[#allocation76_spill] sm:$0xff] %v3688_v20 }
 0xea8   :  { %v3690_v60 = vpop.permute.xlu0 %1160 }
 0xea9   :  { %4953 = vst [vmem:[#allocation77_spill] sm:$0xff] %v3690_v60 }
 0xeac   :  { %v3692_v28 = vpop.permute.xlu0 %1164 }
 0xead   :  { %4954 = vst [vmem:[#allocation78_spill] sm:$0xff] %v3692_v28 }
 0xeb0   :  { %v3694_v56 = vpop.permute.xlu0 %1187 }
 0xeb1   :  { %4955 = vst [vmem:[#allocation79_spill] sm:$0xff] %v3694_v56 }
 0xeb4   :  { %v3696_v53 = vpop.permute.xlu0 %1191 }
 0xeb5   :  { %4956 = vst [vmem:[#allocation80_spill] sm:$0xff] %v3696_v53 }
 0xeb8   :  { %v3698_v1 = vpop.permute.xlu0 %1214 }
 0xeb9   :  { %4957 = vst [vmem:[#allocation81_spill] sm:$0xff] %v3698_v1 }
 0xebc   :  { %v3700_v50 = vpop.permute.xlu0 %1218 }
 0xebd   :  { %4958 = vst [vmem:[#allocation82_spill] sm:$0xff] %v3700_v50 }
 0xec0   :  { %v3702_v59 = vpop.permute.xlu0 %1241 }
 0xec1   :  { %4959 = vst [vmem:[#allocation83_spill] sm:$0xff] %v3702_v59 }
 0xec4   :  { %v3704_v23 = vpop.permute.xlu0 %1245 }
 0xec5   :  { %4960 = vst [vmem:[#allocation84_spill] sm:$0xff] %v3704_v23 }
 0xec8   :  { %v3706_v61 = vpop.permute.xlu0 %1268 }
 0xec9   :  { %4961 = vst [vmem:[#allocation85_spill] sm:$0xff] %v3706_v61 }
 0xecc   :  { %v3708_v57 = vpop.permute.xlu0 %1272 }
 0xecd   :  { %4962 = vst [vmem:[#allocation86_spill] sm:$0xff] %v3708_v57 }
 0xf0c   :  { %v3710_v20 = vpop.permute.xlu0 %1295  ;;  %v3714_v28 = vpop.permute.xlu1 %1297 }
 0xf0d   :  { %4963 = vst [vmem:[#allocation87_spill] sm:$0xff] %v3710_v20  ;;  %4965 = vst [vmem:[#allocation89_spill] sm:$0xff] %v3714_v28 }
 0xf10   :  { %v3712_v60 = vpop.permute.xlu0 %1299  ;;  %v1321_v56 = vpop.permute.xlu1 %1320 }
 0xf11   :  { %4964 = vst [vmem:[#allocation88_spill] sm:$0xff] %v3712_v60  ;;  %v3717_v50 = vmul.f32 %v1321_v56, %v3144_v51  ;;  %v2904_v51 = vld [vmem:[%s4800_s1 + $0x188] sm:$0xff] }
 0xf14   :  { %v1323_v53 = vpop.permute.xlu0 %1322 }
 0xf15   :  { %v1325_v1 = vsel %vm1324_vm4, %v1321_v56, %v1323_v53  ;;  %v3722_v61 = vmul.f32 0.0, %v1323_v53 }
 0xf16   :  { %v3720_v59 = vmul.f32 %v1325_v1, %v3139_v49 }
 0xf1d   :  { %v1337_v23 = vpop.permute.xlu1 %1336 }
 0xf1e   :  { %v1339_v57 = vmul.f32 %v1337_v23, %v3717_v50  ;;  %v1340_v20 = vmul.f32 %v1337_v23, %v3720_v59  ;;  %v1341_v56 = vmul.f32 %v1337_v23, %v3722_v61 }
 0xf20   :  { %1345 = vrot.lane.b32.xlu0 %v1339_v57, %s2988_s11  ;;  %1347 = vrot.lane.b32.xlu1 %v1340_v20, %s2988_s11  ;;  %v2905_v20 = vld [vmem:[%s4800_s1 + $0x190] sm:$0xff] }
 0xf24   :  { %1349 = vrot.lane.b32.xlu0 %v1341_v56, %s2988_s11  ;;  %1364 = vperm.xlu1 %2960, %v2904_v51  }
 0xf92   :  { %v3733_v49 = vpop.permute.xlu1 %1347 }
 0xf93   :  { %4966 = vst [vmem:[#allocation90_spill] sm:$0xff] %v3733_v49 }
 0xf9f   :  { %v1365_v53 = vpop.permute.xlu1 %1364 }
 0xfa0   :  { %v1367_v1 = vmul.f32 %v1365_v53, %v3717_v50  ;;  %v1368_v60 = vmul.f32 %v1365_v53, %v3720_v59  ;;  %v1369_v23 = vmul.f32 %v1365_v53, %v3722_v61 }
 0xfa2   :  { %1375 = vrot.lane.b32.xlu1 %v1368_v60, %s2988_s11  ;;  %1373 = vrot.lane.b32.xlu0 %v1367_v1, %s2988_s11  ;;  %v2906_v60 = vld [vmem:[%s4800_s1 + $0x198] sm:$0xff] }
 0xfa6   :  { %1391 = vperm.xlu1 %2960, %v2905_v20   ;;  %1377 = vrot.lane.b32.xlu0 %v1369_v23, %s2988_s11 }
0x1014   :  { %v3744_v57 = vpop.permute.xlu1 %1375 }
0x1015   :  { %4967 = vst [vmem:[#allocation91_spill] sm:$0xff] %v3744_v57 }
0x1021   :  { %v1392_v51 = vpop.permute.xlu1 %1391 }
0x1022   :  { %v1394_v56 = vmul.f32 %v1392_v51, %v3717_v50  ;;  %v1395_v49 = vmul.f32 %v1392_v51, %v3720_v59  ;;  %v1396_v53 = vmul.f32 %v1392_v51, %v3722_v61 }
0x1024   :  { %1402 = vrot.lane.b32.xlu1 %v1395_v49, %s2988_s11  ;;  %1400 = vrot.lane.b32.xlu0 %v1394_v56, %s2988_s11  ;;  %v2907_v49 = vld [vmem:[%s4800_s1 + $0x1a0] sm:$0xff] }
0x1028   :  { %1418 = vperm.xlu1 %2960, %v2906_v60   ;;  %1404 = vrot.lane.b32.xlu0 %v1396_v53, %s2988_s11 }
0x1096   :  { %v3755_v1 = vpop.permute.xlu1 %1402 }
0x1097   :  { %4968 = vst [vmem:[#allocation92_spill] sm:$0xff] %v3755_v1 }
0x10a3   :  { %v1419_v20 = vpop.permute.xlu1 %1418 }
0x10a4   :  { %v1421_v23 = vmul.f32 %v1419_v20, %v3717_v50  ;;  %v1422_v57 = vmul.f32 %v1419_v20, %v3720_v59  ;;  %v1423_v51 = vmul.f32 %v1419_v20, %v3722_v61 }
0x10a6   :  { %1429 = vrot.lane.b32.xlu1 %v1422_v57, %s2988_s11  ;;  %1427 = vrot.lane.b32.xlu0 %v1421_v23, %s2988_s11  ;;  %v2908_v57 = vld [vmem:[%s4800_s1 + $0x1a8] sm:$0xff] }
0x10aa   :  { %1445 = vperm.xlu1 %2960, %v2907_v49   ;;  %1431 = vrot.lane.b32.xlu0 %v1423_v51, %s2988_s11 }
0x1118   :  { %v3766_v56 = vpop.permute.xlu1 %1429 }
0x1119   :  { %4969 = vst [vmem:[#allocation93_spill] sm:$0xff] %v3766_v56 }
0x1125   :  { %v1446_v60 = vpop.permute.xlu1 %1445 }
0x1126   :  { %v1448_v53 = vmul.f32 %v1446_v60, %v3717_v50  ;;  %v1449_v1 = vmul.f32 %v1446_v60, %v3720_v59  ;;  %v1450_v20 = vmul.f32 %v1446_v60, %v3722_v61 }
0x1128   :  { %1456 = vrot.lane.b32.xlu1 %v1449_v1, %s2988_s11  ;;  %1454 = vrot.lane.b32.xlu0 %v1448_v53, %s2988_s11  ;;  %v2909_v1 = vld [vmem:[%s4800_s1 + $0x1b0] sm:$0xff]  ;;  %v3788_v53 = vpop.permute.xlu0 %1345 }
0x1129   :  { %4971 = vst [vmem:[#allocation95_spill] sm:$0xff] %v3788_v53 }
0x112c   :  { %1472 = vperm.xlu1 %2960, %v2908_v57   ;;  %1458 = vrot.lane.b32.xlu0 %v1450_v20, %s2988_s11  ;;  %v3790_v57 = vpop.permute.xlu0 %1349 }
0x112d   :  { %4972 = vst [vmem:[#allocation96_spill] sm:$0xff] %v3790_v57 }
0x1130   :  { %v3792_v20 = vpop.permute.xlu0 %1373 }
0x1131   :  { %4973 = vst [vmem:[#allocation97_spill] sm:$0xff] %v3792_v20 }
0x119a   :  { %v3777_v23 = vpop.permute.xlu1 %1456 }
0x119b   :  { %4970 = vst [vmem:[#allocation94_spill] sm:$0xff] %v3777_v23  ;;  %v3794_v23 = vpop.permute.xlu0 %1377 }
0x119c   :  { %4974 = vst [vmem:[#allocation98_spill] sm:$0xff] %v3794_v23 }
0x11a7   :  { %v1473_v49 = vpop.permute.xlu1 %1472 }
0x11a8   :  { %v1475_v51 = vmul.f32 %v1473_v49, %v3717_v50  ;;  %v1476_v56 = vmul.f32 %v1473_v49, %v3720_v59  ;;  %v1477_v60 = vmul.f32 %v1473_v49, %v3722_v61 }
0x11aa   :  { %1483 = vrot.lane.b32.xlu1 %v1476_v56, %s2988_s11  ;;  %1481 = vrot.lane.b32.xlu0 %v1475_v51, %s2988_s11  ;;  %v3796_v56 = vpop.permute.xlu0 %1400 }
0x11ab   :  { %4975 = vst [vmem:[#allocation99_spill] sm:$0xff] %v3796_v56 }
0x11ae   :  { %1499 = vperm.xlu1 %2960, %v2909_v1   ;;  %1485 = vrot.lane.b32.xlu0 %v1477_v60, %s2988_s11  ;;  %v3798_v51 = vpop.permute.xlu0 %1404 }
0x11af   :  { %4976 = vst [vmem:[#allocation100_spill] sm:$0xff] %v3798_v51 }
0x11b2   :  { %v3800_v28 = vpop.permute.xlu0 %1427 }
0x11b3   :  { %4977 = vst [vmem:[#allocation101_spill] sm:$0xff] %v3800_v28 }
0x11b6   :  { %v3802_v46 = vpop.permute.xlu0 %1431 }
0x11b7   :  { %4978 = vst [vmem:[#allocation102_spill] sm:$0xff] %v3802_v46 }
0x11ba   :  { %v3804_v49 = vpop.permute.xlu0 %1454 }
0x11bb   :  { %4979 = vst [vmem:[#allocation103_spill] sm:$0xff] %v3804_v49 }
0x11be   :  { %v3806_v1 = vpop.permute.xlu0 %1458 }
0x11bf   :  { %4980 = vst [vmem:[#allocation104_spill] sm:$0xff] %v3806_v1  ;;  %v2910_v1 = vld [vmem:[%s4800_s1 + $0x1b8] sm:$0xff] }
0x121c   :  { %v3808_v60 = vpop.permute.xlu1 %1483  ;;  %v3810_v57 = vpop.permute.xlu0 %1481 }
0x121d   :  { %4981 = vst [vmem:[#allocation105_spill] sm:$0xff] %v3808_v60  ;;  %4982 = vst [vmem:[#allocation106_spill] sm:$0xff] %v3810_v57  ;;  %v3815_v23 = vsel %vm1351_vm5, %v3810_v57, %v3808_v60  ;;  %v2912_v57 = vld [vmem:[%s4800_s1 + $0x1c0] sm:$0xff] }
0x121e   :  { %4983 = vst [vmem:[#allocation107_spill] sm:$0xff] %v3815_v23  ;;  %v2913_v23 = vld [vmem:[%s4800_s1 + $0x1c8] sm:$0xff] }
0x1229   :  { %v1500_v56 = vpop.permute.xlu1 %1499 }
0x122a   :  { %v1502_v51 = vmul.f32 %v1500_v56, %v3717_v50  ;;  %v1503_v28 = vmul.f32 %v1500_v56, %v3720_v59  ;;  %v1504_v49 = vmul.f32 %v1500_v56, %v3722_v61  ;;  %v2914_v56 = vld [vmem:[%s4800_s1 + $0x1d0] sm:$0xff] }
0x122c   :  { %1510 = vrot.lane.b32.xlu1 %v1503_v28, %s2988_s11  ;;  %1508 = vrot.lane.b32.xlu0 %v1502_v51, %s2988_s11  ;;  %v2915_v28 = vld [vmem:[%s4800_s1 + $0x1d8] sm:$0xff]  ;;  %v2917_v51 = vld [vmem:[%s4800_s1 + $0x1e8] sm:$0xff] }
0x1230   :  { %1526 = vperm.xlu1 %2960, %v2910_v1   ;;  %1512 = vrot.lane.b32.xlu0 %v1504_v49, %s2988_s11  ;;  %v2916_v49 = vld [vmem:[%s4800_s1 + $0x1e0] sm:$0xff]  ;;  %v2911_v1 = vld [vmem:[%s4801_s2 + $0xe] sm:$0x3] }
0x1234   :  { %1604 = vperm.xlu1 %2960, %v2913_v23   ;;  %1576 = vperm.xlu0 %2961, %v2912_v57   ;;  %v2919_v23 = vld [vmem:[%s4800_s1 + $0x1f8] sm:$0xff]  ;;  %v2918_v57 = vld [vmem:[%s4800_s1 + $0x1f0] sm:$0xff] }
0x1238   :  { %1658 = vperm.xlu1 %2960, %v2915_v28   ;;  %1631 = vperm.xlu0 %2961, %v2914_v56   ;;  %v1559_v28 = vrot.slane %v2911_v1, %v3038_v7  ;;  %v1555_v56 = vrot.slane %v2911_v1, %v3035_v6  ;;  %v2926_v1 = vld [vmem:[%s4800_s1 + $0x228] sm:$0xff] }
0x123c   :  { %1712 = vperm.xlu1 %2960, %v2917_v51   ;;  %1685 = vperm.xlu0 %2961, %v2916_v49   ;;  %v2922_v51 = vld [vmem:[%s4800_s1 + $0x208] sm:$0xff]  ;;  %v2921_v49 = vld [vmem:[%s4800_s1 + $0x200] sm:$0xff] }
0x1240   :  { %1766 = vperm.xlu1 %2960, %v2919_v23   ;;  %1739 = vperm.xlu0 %2961, %v2918_v57   ;;  %v2924_v23 = vld [vmem:[%s4800_s1 + $0x218] sm:$0xff]  ;;  %v2923_v57 = vld [vmem:[%s4800_s1 + $0x210] sm:$0xff] }
0x1244   :  { %1562 = vrot.lane.b32.xlu1 %v1559_v28, %s2989_s27  ;;  %1560 = vrot.lane.b32.xlu0 %v1555_v56, %s2989_s27  ;;  %v2925_v28 = vld [vmem:[%s4800_s1 + $0x220] sm:$0xff]  ;;  %v2928_v56 = vld [vmem:[%s4800_s1 + $0x238] sm:$0xff]  ;;  %s4348_s27 = sld [smem:[#allocation3 + $0x4]] }
0x1248   :  { %1844 = vperm.xlu1 %2960, %v2922_v51   ;;  %1816 = vperm.xlu0 %2961, %v2921_v49   ;;  %v2927_v51 = vld [vmem:[%s4800_s1 + $0x230] sm:$0xff] }
0x1249   :  { %v2920_v49 = vld [vmem:[%s4801_s2 + $0x10] sm:$0x3] }
0x124c   :  { %1898 = vperm.xlu1 %2960, %v2924_v23   ;;  %1871 = vperm.xlu0 %2961, %v2923_v57   ;;  %v1799_v23 = vrot.slane %v2920_v49, %v3038_v7  ;;  %v1795_v57 = vrot.slane %v2920_v49, %v3035_v6 }
0x1250   :  { %1952 = vperm.xlu1 %2960, %v2926_v1   ;;  %1925 = vperm.xlu0 %2961, %v2925_v28   ;;  %v3886_v1 = vpop.permute.xlu0 %1485 }
0x1251   :  { %4984 = vst [vmem:[#allocation108_spill] sm:$0xff] %v3886_v1 }
0x1254   :  { %2006 = vperm.xlu1 %2960, %v2928_v56   ;;  %1979 = vperm.xlu0 %2961, %v2927_v51  }
0x1258   :  { %1802 = vrot.lane.b32.xlu1 %v1799_v23, %s2990_s10  ;;  %1800 = vrot.lane.b32.xlu0 %v1795_v57, %s2990_s10 }
0x129e   :  { %v1511_v28 = vpop.permute.xlu1 %1510  ;;  %v3888_v60 = vpop.permute.xlu0 %1508 }
0x129f   :  { %4985 = vst [vmem:[#allocation109_spill] sm:$0xff] %v3888_v60  ;;  %v3892_v46 = vsel %vm1351_vm5, %v3888_v60, %v1511_v28 }
0x12a0   :  { %4986 = vst [vmem:[#allocation110_spill] sm:$0xff] %v3892_v46 }
0x12a2   :  { %v1513_v56 = vpop.permute.xlu0 %1512 }
0x12a3   :  { %v3895_v51 = vsel %vm1351_vm5, %v1511_v28, %v1513_v56 }
0x12a4   :  { %4987 = vst [vmem:[#allocation111_spill] sm:$0xff] %v3895_v51 }
0x12ab   :  { %v1527_v7 = vpop.permute.xlu1 %1526 }
0x12ac   :  { %v1529_v6 = vmul.f32 %v1527_v7, %v3717_v50  ;;  %v1530_v49 = vmul.f32 %v1527_v7, %v3720_v59  ;;  %v1531_v1 = vmul.f32 %v1527_v7, %v3722_v61 }
0x12ae   :  { %1537 = vrot.lane.b32.xlu1 %v1530_v49, %s2988_s11  ;;  %1535 = vrot.lane.b32.xlu0 %v1529_v6, %s2988_s11  ;;  %v3908_v6 = vld [vmem:[%s4799_s0] sm:$0xff] }
0x12af   :  { %v1605_v23 = vpop.permute.xlu1 %1604  ;;  %v1577_v57 = vpop.permute.xlu0 %1576 }
0x12b2   :  { %1539 = vrot.lane.b32.xlu0 %v1531_v1, %s2988_s11  ;;  %v3914_v1 = vld [vmem:[%s4799_s0 + $0x8] sm:$0xff]  ;;  %s2992_s0 = smov 94  }
0x12b3   :  { %v1659_v46 = vpop.permute.xlu1 %1658  ;;  %v1632_v60 = vpop.permute.xlu0 %1631 }
0x12b7   :  { %v1713_v20 = vpop.permute.xlu1 %1712  ;;  %v1686_v28 = vpop.permute.xlu0 %1685 }
0x12bb   :  { %v3903_v56 = vpop.permute.xlu1 %1766  ;;  %v1740_v51 = vpop.permute.xlu0 %1739 }
0x12bf   :  { %v1563_v50 = vpop.permute.xlu1 %1562  ;;  %v1561_v59 = vpop.permute.xlu0 %1560 }
0x12c0   :  { %v1565_v53 = vsel %vm1564_vm6, %v1561_v59, %v1563_v50  ;;  %v1569_v61 = vmul.f32 %v3908_v6, %v1561_v59  ;;  %v1571_v49 = vmul.f32 0.0, %v1563_v50 }
0x12c1   :  { %v1570_v7 = vmul.f32 %v3914_v1, %v1565_v53 }
0x12c2   :  { %v1579_v16 = vmul.f32 %v1577_v57, %v1569_v61  ;;  %v1581_v26 = vmul.f32 %v1577_v57, %v1571_v49  ;;  %v1607_v15 = vmul.f32 %v1605_v23, %v1569_v61  ;;  %v1609_v25 = vmul.f32 %v1605_v23, %v1571_v49 }
0x12c3   :  { %v1580_v27 = vmul.f32 %v1577_v57, %v1570_v7  ;;  %v1608_v59 = vmul.f32 %v1605_v23, %v1570_v7  ;;  %v1634_v53 = vmul.f32 %v1632_v60, %v1569_v61  ;;  %v1635_v50 = vmul.f32 %v1632_v60, %v1570_v7  ;;  %v1845_v24 = vpop.permute.xlu1 %1844 }
0x12c4   :  { %1585 = vrot.lane.b32.xlu1 %v1579_v16, %s2991_s13  ;;  %v1817_v16 = vpop.permute.xlu0 %1816  ;;  %v1661_v57 = vmul.f32 %v1659_v46, %v1569_v61  ;;  %v1743_v22 = vmul.f32 %v1740_v51, %v1570_v7 }
0x12c5   :  { %1587 = vrot.lane.b32.xlu0 %v1580_v27, %s2991_s13  ;;  %v1636_v27 = vmul.f32 %v1632_v60, %v1571_v49 }
0x12c8   :  { %1589 = vrot.lane.b32.xlu1 %v1581_v26, %s2991_s13  ;;  %v1899_v26 = vpop.permute.xlu1 %1898  ;;  %v1872_v23 = vpop.permute.xlu0 %1871 }
0x12c9   :  { %1613 = vrot.lane.b32.xlu0 %v1607_v15, %s2991_s13  ;;  %v1662_v15 = vmul.f32 %v1659_v46, %v1570_v7 }
0x12cc   :  { %1615 = vrot.lane.b32.xlu1 %v1608_v59, %s2991_s13  ;;  %v1663_v59 = vmul.f32 %v1659_v46, %v1571_v49  ;;  %v3930_v14 = vpop.permute.xlu1 %1952  ;;  %v1926_v60 = vpop.permute.xlu0 %1925  ;;  %v1716_v46 = vmul.f32 %v1713_v20, %v1570_v7 }
0x12cd   :  { %1617 = vrot.lane.b32.xlu0 %v1609_v25, %s2991_s13  ;;  %v1688_v25 = vmul.f32 %v1686_v28, %v1569_v61 }
0x12d0   :  { %1640 = vrot.lane.b32.xlu1 %v1634_v53, %s2991_s13  ;;  %v1689_v53 = vmul.f32 %v1686_v28, %v1570_v7 }
0x12d1   :  { %1642 = vrot.lane.b32.xlu0 %v1635_v50, %s2991_s13  ;;  %v1690_v50 = vmul.f32 %v1686_v28, %v1571_v49 }
0x12d4   :  { %1644 = vrot.lane.b32.xlu1 %v1636_v27, %s2991_s13  ;;  %v1715_v27 = vmul.f32 %v1713_v20, %v1569_v61 }
0x12d5   :  { %1667 = vrot.lane.b32.xlu0 %v1661_v57, %s2991_s13  ;;  %v3935_v57 = vpop.permute.xlu1 %2006 }
0x12d8   :  { %1669 = vrot.lane.b32.xlu1 %v1662_v15, %s2991_s13  ;;  %v3937_v15 = vpop.permute.xlu0 %1979 }
0x12d9   :  { %1671 = vrot.lane.b32.xlu0 %v1663_v59, %s2991_s13  ;;  %v1717_v59 = vmul.f32 %v1713_v20, %v1571_v49  ;;  %v1803_v28 = vpop.permute.xlu1 %1802 }
0x12dc   :  { %1694 = vrot.lane.b32.xlu1 %v1688_v25, %s2991_s13  ;;  %v1742_v25 = vmul.f32 %v1740_v51, %v1569_v61 }
0x12dd   :  { %1696 = vrot.lane.b32.xlu0 %v1689_v53, %s2991_s13  ;;  %v1801_v53 = vpop.permute.xlu0 %1800 }
0x12de   :  { %v1805_v21 = vsel %vm1804_vm7, %v1801_v53, %v1803_v28  ;;  %v1809_v20 = vmul.f32 %v3908_v6, %v1801_v53 }
0x12e0   :  { %1698 = vrot.lane.b32.xlu1 %v1690_v50, %s2991_s13  ;;  %v1744_v50 = vmul.f32 %v1740_v51, %v1571_v49  ;;  %v1819_v51 = vmul.f32 %v1817_v16, %v1809_v20  ;;  %v1847_v53 = vmul.f32 %v1845_v24, %v1809_v20 }
0x12e1   :  { %1721 = vrot.lane.b32.xlu0 %v1715_v27, %s2991_s13  ;;  %v1769_v27 = vmul.f32 %v3903_v56, %v1569_v61 }
0x12e4   :  { %1723 = vrot.lane.b32.xlu1 %v1716_v46, %s2991_s13  ;;  %v1770_v46 = vmul.f32 %v3903_v56, %v1570_v7  ;;  %v1874_v7 = vmul.f32 %v1872_v23, %v1809_v20 }
0x12e5   :  { %1725 = vrot.lane.b32.xlu0 %v1717_v59, %s2991_s13  ;;  %v1810_v59 = vmul.f32 %v3914_v1, %v1805_v21 }
0x12e7   :  { %v1820_v61 = vmul.f32 %v1817_v16, %v1810_v59  ;;  %v1848_v21 = vmul.f32 %v1845_v24, %v1810_v59 }
0x12e8   :  { %1748 = vrot.lane.b32.xlu1 %v1742_v25, %s2991_s13  ;;  %v1771_v25 = vmul.f32 %v3903_v56, %v1571_v49  ;;  %v1875_v49 = vmul.f32 %v1872_v23, %v1810_v59 }
0x12e9   :  { %1750 = vrot.lane.b32.xlu0 %v1743_v22, %s2991_s13  ;;  %v1811_v22 = vmul.f32 0.0, %v1803_v28 }
0x12eb   :  { %v1849_v56 = vmul.f32 %v1845_v24, %v1811_v22  ;;  %v1876_v28 = vmul.f32 %v1872_v23, %v1811_v22  ;;  %v1928_v24 = vmul.f32 %v1926_v60, %v1809_v20  ;;  %v1955_v23 = vmul.f32 %v3930_v14, %v1809_v20 }
0x12ec   :  { %1752 = vrot.lane.b32.xlu1 %v1744_v50, %s2991_s13  ;;  %v1821_v50 = vmul.f32 %v1817_v16, %v1811_v22  ;;  %v1902_v16 = vmul.f32 %v1899_v26, %v1810_v59 }
0x12ed   :  { %1775 = vrot.lane.b32.xlu0 %v1769_v27, %s2991_s13  ;;  %v1901_v27 = vmul.f32 %v1899_v26, %v1809_v20 }
0x12f0   :  { %1777 = vrot.lane.b32.xlu1 %v1770_v46, %s2991_s13  ;;  %v1903_v46 = vmul.f32 %v1899_v26, %v1811_v22  ;;  %v1957_v26 = vmul.f32 %v3930_v14, %v1811_v22 }
0x12f1   :  { %1779 = vrot.lane.b32.xlu0 %v1771_v25, %s2991_s13  ;;  %v1929_v25 = vmul.f32 %v1926_v60, %v1810_v59 }
0x12f4   :  { %1825 = vrot.lane.b32.xlu1 %v1819_v51, %s2992_s0  ;;  %v1930_v51 = vmul.f32 %v1926_v60, %v1811_v22  ;;  %v1983_v60 = vmul.f32 %v3937_v15, %v1810_v59 }
0x12f5   :  { %1827 = vrot.lane.b32.xlu0 %v1820_v61, %s2992_s0  ;;  %v1956_v61 = vmul.f32 %v3930_v14, %v1810_v59 }
0x12f8   :  { %1829 = vrot.lane.b32.xlu1 %v1821_v50, %s2992_s0  ;;  %v2993_v50 = vmov 1966171168  }
0x12f9   :  { %1853 = vrot.lane.b32.xlu0 %v1847_v53, %s2992_s0  ;;  %v2068_v53 = vunpack.c.l.s4 %v2993_v50 }
0x12fb   :  { %v2069_v14 = vunpack.c.0.s8 %v2068_v53 }
0x12fc   :  { %1855 = vrot.lane.b32.xlu1 %v1848_v21, %s2992_s0  ;;  %v1982_v21 = vmul.f32 %v3937_v15, %v1809_v20 }
0x12fd   :  { %1857 = vrot.lane.b32.xlu0 %v1849_v56, %s2992_s0  ;;  %v62_v56 = vsel %vm61_vm8, %v3115_v36, %v3121_v39 }
0x1300   :  { %1880 = vrot.lane.b32.xlu1 %v1874_v7, %s2992_s0  ;;  %v66_v7 = vmul.f32 0.0, %v3115_v36 }
0x1301   :  { %1882 = vrot.lane.b32.xlu0 %v1875_v49, %s2992_s0  ;;  %v68_v49 = vmul.f32 %v3914_v1, %v3121_v39 }
0x1302   :  { %v88_v39 = vmul.f32 %v3117_v37, %v66_v7  ;;  %v127_v50 = vmul.f32 %v3123_v40, %v66_v7 }
0x1303   :  { %v77_v36 = vmul.f32 %v3113_v35, %v68_v49  ;;  %v103_v53 = vmul.f32 %v3125_v41, %v68_v49 }
0x1304   :  { %1884 = vrot.lane.b32.xlu1 %v1876_v28, %s2992_s0  ;;  %v1984_v28 = vmul.f32 %v3937_v15, %v1811_v22  ;;  %v2011_v15 = vmul.f32 %v3935_v57, %v1811_v22  ;;  %v101_v22 = vmul.f32 %v3125_v41, %v66_v7 }
0x1305   :  { %1907 = vrot.lane.b32.xlu0 %v1901_v27, %s2992_s0  ;;  %v67_v27 = vmul.f32 %v3908_v6, %v62_v56  ;;  %v155_v56 = vmul.f32 %v3127_v42, %v68_v49 }
0x1307   :  { %v89_v1 = vmul.f32 %v3117_v37, %v67_v27  ;;  %v76_v6 = vmul.f32 %v3113_v35, %v67_v27 }
0x1308   :  { %1909 = vrot.lane.b32.xlu1 %v1902_v16, %s2992_s0  ;;  %v2009_v16 = vmul.f32 %v3935_v57, %v1809_v20  ;;  %v115_v20 = vmul.f32 %v3119_v38, %v67_v27 }
0x1309   :  { %1911 = vrot.lane.b32.xlu0 %v1903_v46, %s2992_s0  ;;  %v3990_v46 = vsub.s32 %v2069_v14, %v3026_v3  ;;  %v114_v3 = vmul.f32 %v3119_v38, %v66_v7  ;;  %v167_v14 = vmul.f32 %v3131_v45, %v67_v27 }
0x130b   :  { %4988 = vst [vmem:[#allocation112_spill] sm:$0xff] %v3990_v46  ;;  %v166_v46 = vmul.f32 %v3131_v45, %v66_v7 }
0x130c   :  { %1934 = vrot.lane.b32.xlu1 %v1928_v24, %s2992_s0  ;;  %v75_v24 = vmul.f32 %v3113_v35, %v66_v7  ;;  %v129_v35 = vmul.f32 %v3123_v40, %v68_v49 }
0x130d   :  { %1936 = vrot.lane.b32.xlu0 %v1929_v25, %s2992_s0  ;;  %v2010_v25 = vmul.f32 %v3935_v57, %v1810_v59 }
0x1310   :  { %1938 = vrot.lane.b32.xlu1 %v1930_v51, %s2992_s0  ;;  %v90_v51 = vmul.f32 %v3117_v37, %v68_v49  ;;  %v102_v37 = vmul.f32 %v3125_v41, %v67_v27  ;;  %v142_v41 = vmul.f32 %v3129_v43, %v68_v49 }
0x1311   :  { %1961 = vrot.lane.b32.xlu0 %v1955_v23, %s2992_s0  ;;  %v116_v23 = vmul.f32 %v3119_v38, %v68_v49  ;;  %v154_v38 = vmul.f32 %v3127_v42, %v67_v27 }
0x1314   :  { %1963 = vrot.lane.b32.xlu1 %v1956_v61, %s2992_s0 }
0x1315   :  { %1965 = vrot.lane.b32.xlu0 %v1957_v26, %s2992_s0  ;;  %v128_v26 = vmul.f32 %v3123_v40, %v67_v27  ;;  %v153_v40 = vmul.f32 %v3127_v42, %v66_v7  ;;  %v168_v42 = vmul.f32 %v3131_v45, %v68_v49  ;;  %v270_v45 = vsel %vm214_vm2, %v3235_v4, %v3287_v34 }
0x1316   :  { %v249_v49 = vadd.f32 %v3283_v32, %v90_v51 }
0x1318   :  { %1988 = vrot.lane.b32.xlu1 %v1982_v21, %s2992_s0  ;;  %v141_v21 = vmul.f32 %v3129_v43, %v67_v27 }
0x1319   :  { %1990 = vrot.lane.b32.xlu0 %v1983_v60, %s2992_s0  ;;  %v140_v60 = vmul.f32 %v3129_v43, %v66_v7  ;;  %v269_v43 = vsel %vm214_vm2, %v3285_v33, %v3235_v4  ;;  %v296_v7 = vsel %vm214_vm2, %v3289_v44, %v3237_v5  ;;  %v323_v33 = vsel %vm214_vm2, %v3293_v48, %v3239_v8 }
0x131a   :  { %v324_v4 = vsel %vm214_vm2, %v3239_v8, %v3297_v52  ;;  %v275_v44 = vadd.f32 %v270_v45, %v102_v37  ;;  %v351_v48 = vsel %vm214_vm2, %v3241_v9, %v3316_v54  ;;  %v330_v8 = vadd.f32 %v3297_v52, %v129_v35  ;;  %v4990_v35 = vld [vmem:[#allocation11_spill] sm:$0xff] }
0x131b   :  { %v356_v52 = vadd.f32 %v351_v48, %v141_v21  ;;  %v4992_v21 = vld [vmem:[#allocation6_spill] sm:$0xff] }
0x131c   :  { %1992 = vrot.lane.b32.xlu1 %v1984_v28, %s2992_s0  ;;  %v215_v28 = vsel %vm214_vm2, %v3277_v29, %v3231_v0  ;;  %v222_v29 = vadd.f32 %v3279_v30, %v77_v36  ;;  %v274_v36 = vadd.f32 %v269_v43, %v101_v22 }
0x131d   :  { %2015 = vrot.lane.b32.xlu0 %v2009_v16, %s2992_s0  ;;  %v216_v16 = vsel %vm214_vm2, %v3231_v0, %v3279_v30  ;;  %v243_v0 = vsel %vm214_vm2, %v3233_v2, %v3283_v32  ;;  %v303_v32 = vadd.f32 %v3291_v47, %v116_v23 }
0x1320   :  { %v1538_v61 = vpop.permute.xlu1 %1537  ;;  %2017 = vrot.lane.b32.xlu1 %v2010_v25, %s2992_s0  ;;  %v4004_v59 = vpop.permute.xlu0 %1535 }
0x1321   :  { %v4011_v57 = vsel %vm1351_vm5, %v4004_v59, %v1538_v61  ;;  %2019 = vrot.lane.b32.xlu0 %v2011_v15, %s2992_s0  ;;  %v242_v15 = vsel %vm214_vm2, %v3281_v31, %v3233_v2  ;;  %v221_v31 = vadd.f32 %v216_v16, %v76_v6  ;;  %v297_v2 = vsel %vm214_vm2, %v3237_v5, %v3291_v47  ;;  %v4997_v16 = vld [vmem:[#allocation16_spill] sm:$0xff] }
0x1322   :  { %4989 = vst [vmem:[#allocation113_spill] sm:$0xff] %v4011_v57  ;;  %v220_v57 = vadd.f32 %v215_v28, %v75_v24  ;;  %v247_v30 = vadd.f32 %v242_v15, %v88_v39  ;;  %v248_v24 = vadd.f32 %v243_v0, %v89_v1  ;;  %v276_v6 = vadd.f32 %v3287_v34, %v103_v53  ;;  %v4991_v53 = vld [vmem:[#allocation12_spill] sm:$0xff]  ;;  %v5000_v0 = vld [vmem:[#allocation18_spill] sm:$0xff] }
0x1323   :  { %v301_v39 = vadd.f32 %v296_v7, %v114_v3  ;;  %v350_v5 = vsel %vm214_vm2, %v3304_v58, %v3241_v9  ;;  %v302_v51 = vadd.f32 %v297_v2, %v115_v20  ;;  %v377_v34 = vsel %vm214_vm2, %v3319_v62, %v3243_v10 }
0x1324   :  { %v1540_v25 = vpop.permute.xlu0 %1539  ;;  %v329_v1 = vadd.f32 %v324_v4, %v128_v26  ;;  %v378_v47 = vsel %vm214_vm2, %v3243_v10, %v3321_v63  ;;  %v404_v58 = vsel %vm214_vm2, %v3323_v55, %v3245_v11  ;;  %v355_v20 = vadd.f32 %v350_v5, %v140_v60  ;;  %v5003_v5 = vld [vmem:[#allocation20_spill] sm:$0xff] }
0x1325   :  { %v4036_v27 = vsel %vm1351_vm5, %v1538_v61, %v1540_v25  ;;  %v328_v61 = vadd.f32 %v323_v33, %v127_v50  ;;  %v357_v3 = vadd.f32 %v3316_v54, %v142_v41  ;;  %v405_v9 = vsel %vm214_vm2, %v3245_v11, %v3325_v17  ;;  %v4998_v41 = vld [vmem:[#allocation8_spill] sm:$0xff]  ;;  %v4999_v25 = vld [vmem:[#allocation17_spill] sm:$0xff] }
0x1326   :  { %v455_v62 = vsel %vm454_vm9, %v3327_v18, %v3247_v12  ;;  %v382_v23 = vadd.f32 %v377_v34, %v153_v40  ;;  %v384_v26 = vadd.f32 %v3321_v63, %v155_v56  ;;  %v456_v10 = vsel %vm454_vm9, %v3247_v12, %v3329_v19  ;;  %v4993_v63 = vld [vmem:[#allocation13_spill] sm:$0xff]  ;;  %v4996_v56 = vld [vmem:[#allocation15_spill] sm:$0xff] }
0x1327   :  { %v383_v55 = vadd.f32 %v378_v47, %v154_v38  ;;  %v409_v50 = vadd.f32 %v404_v58, %v166_v46  ;;  %v411_v54 = vadd.f32 %v3325_v17, %v168_v42  ;;  %v482_v11 = vsel %vm454_vm9, %v4990_v35, %v3249_v13  ;;  %v4994_v46 = vld [vmem:[#allocation14_spill] sm:$0xff]  ;;  %v4995_v38 = vld [vmem:[#allocation7_spill] sm:$0xff]  ;;  %v5007_v47 = vld [vmem:[#allocation25_spill] sm:$0xff] }
0x1328   :  { %v410_v37 = vadd.f32 %v405_v9, %v167_v14  ;;  %v460_v22 = vadd.f32 %v455_v62, %v220_v57  ;;  %v483_v18 = vsel %vm454_vm9, %v3249_v13, %v4991_v53  ;;  %v509_v60 = vsel %vm454_vm9, %v4993_v63, %v4992_v21  ;;  %v5008_v58 = vld [vmem:[#allocation23_spill] sm:$0xff] }
0x1329   :  { %v461_v40 = vadd.f32 %v456_v10, %v221_v31  ;;  %v462_v12 = vadd.f32 %v3329_v19, %v222_v29  ;;  %v510_v17 = vsel %vm454_vm9, %v4992_v21, %v4994_v46  ;;  %v536_v14 = vsel %vm454_vm9, %v4996_v56, %v4995_v38  ;;  %v5009_v10 = vld [vmem:[#allocation24_spill] sm:$0xff] }
0x132a   :  { %v487_v57 = vadd.f32 %v482_v11, %v247_v30  ;;  %v489_v28 = vadd.f32 %v4991_v53, %v249_v49  ;;  %v537_v13 = vsel %vm454_vm9, %v4995_v38, %v4997_v16  ;;  %v563_v15 = vsel %vm454_vm9, %v4999_v25, %v4998_v41  ;;  %v5001_v30 = vld [vmem:[#allocation9_spill] sm:$0xff]  ;;  %v5002_v49 = vld [vmem:[#allocation19_spill] sm:$0xff]  ;;  %v5011_v11 = vld [vmem:[#allocation34_spill] sm:$0xff] }
0x132b   :  { %v488_v19 = vadd.f32 %v483_v18, %v248_v24  ;;  %v514_v42 = vadd.f32 %v509_v60, %v274_v36  ;;  %v516_v29 = vadd.f32 %v4994_v46, %v276_v6  ;;  %v564_v43 = vsel %vm454_vm9, %v4998_v41, %v5000_v0  ;;  %v5004_v36 = vld [vmem:[#allocation10_spill] sm:$0xff]  ;;  %v5005_v6 = vld [vmem:[#allocation21_spill] sm:$0xff]  ;;  %v5012_v60 = vld [vmem:[#allocation35_spill] sm:$0xff] }
0x132c   :  { %v515_v31 = vadd.f32 %v510_v17, %v275_v44  ;;  %v541_v45 = vadd.f32 %v536_v14, %v301_v39  ;;  %v543_v7 = vadd.f32 %v4997_v16, %v303_v32  ;;  %v590_v2 = vsel %vm454_vm9, %v5002_v49, %v5001_v30  ;;  %v5006_v39 = vld [vmem:[#allocation22_spill] sm:$0xff]  ;;  %v5013_v38 = vld [vmem:[#allocation27_spill] sm:$0xff]  ;;  %v5014_v56 = vld [vmem:[#allocation36_spill] sm:$0xff] }
0x132d   :  { %v542_v33 = vadd.f32 %v537_v13, %v302_v51  ;;  %v568_v4 = vadd.f32 %v563_v15, %v328_v61  ;;  %v591_v24 = vsel %vm454_vm9, %v5001_v30, %v5003_v5  ;;  %v617_v48 = vsel %vm454_vm9, %v5005_v6, %v5004_v36  ;;  %v5015_v41 = vld [vmem:[#allocation37_spill] sm:$0xff] }
0x132e   :  { %v569_v34 = vadd.f32 %v564_v43, %v329_v1  ;;  %v570_v44 = vadd.f32 %v5000_v0, %v330_v8  ;;  %v618_v32 = vsel %vm454_vm9, %v5004_v36, %v5006_v39  ;;  %v644_v51 = vsel %vm454_vm9, %v5008_v58, %v5007_v47  ;;  %v5010_v1 = vld [vmem:[#allocation26_spill] sm:$0xff]  ;;  %v5019_v43 = vld [vmem:[#allocation29_spill] sm:$0xff] }
0x132f   :  { %v595_v9 = vadd.f32 %v590_v2, %v355_v20  ;;  %v597_v62 = vadd.f32 %v5003_v5, %v357_v3  ;;  %v645_v35 = vsel %vm454_vm9, %v5007_v47, %v5009_v10  ;;  %v693_v8 = vsel %vm187_vm0, %v5011_v11, %v5010_v1  ;;  %v5021_v5 = vld [vmem:[#allocation41_spill] sm:$0xff]  ;;  %v5023_v36 = vld [vmem:[#allocation42_spill] sm:$0xff] }
0x1330   :  { %v596_v18 = vadd.f32 %v591_v24, %v356_v52  ;;  %v622_v21 = vadd.f32 %v617_v48, %v382_v23  ;;  %v624_v63 = vadd.f32 %v5006_v39, %v384_v26  ;;  %v694_v20 = vsel %vm187_vm0, %v5010_v1, %v5012_v60  ;;  %v5016_v23 = vld [vmem:[#allocation28_spill] sm:$0xff]  ;;  %v5017_v26 = vld [vmem:[#allocation38_spill] sm:$0xff] }
0x1331   :  { %v623_v46 = vadd.f32 %v618_v32, %v383_v55  ;;  %v649_v3 = vadd.f32 %v644_v51, %v409_v50  ;;  %v651_v17 = vadd.f32 %v5009_v10, %v411_v54  ;;  %v720_v14 = vsel %vm187_vm0, %v5014_v56, %v5013_v38  ;;  %v5018_v54 = vld [vmem:[#allocation39_spill] sm:$0xff]  ;;  %v5026_v10 = vld [vmem:[#allocation44_spill] sm:$0xff] }
0x1332   :  { %v650_v16 = vadd.f32 %v645_v35, %v410_v37  ;;  %v698_v13 = vadd.f32 %v693_v8, %v460_v22  ;;  %v721_v52 = vsel %vm187_vm0, %v5013_v38, %v5015_v41  ;;  %v747_v25 = vsel %vm187_vm0, %v5017_v26, %v5016_v23  ;;  %v5020_v37 = vld [vmem:[#allocation40_spill] sm:$0xff]  ;;  %v5024_v32 = vld [vmem:[#allocation43_spill] sm:$0xff] }
0x1333   :  { %v699_v55 = vadd.f32 %v694_v20, %v461_v40  ;;  %v700_v50 = vadd.f32 %v5012_v60, %v462_v12  ;;  %v748_v0 = vsel %vm187_vm0, %v5016_v23, %v5018_v54  ;;  %v774_v22 = vsel %vm187_vm0, %v5020_v37, %v5019_v43  ;;  %v5022_v40 = vld [vmem:[#allocation30_spill] sm:$0xff]  ;;  %v5025_v51 = vld [vmem:[#allocation31_spill] sm:$0xff]  ;;  %v5033_v23 = vld [vmem:[#allocation49_spill] sm:$0xff] }
0x1334   :  { %v725_v49 = vadd.f32 %v720_v14, %v487_v57  ;;  %v727_v2 = vadd.f32 %v5015_v41, %v489_v28  ;;  %v775_v24 = vsel %vm187_vm0, %v5019_v43, %v5021_v5  ;;  %v801_v12 = vsel %vm187_vm0, %v5023_v36, %v5022_v40  ;;  %v5029_v60 = vld [vmem:[#allocation46_spill] sm:$0xff]  ;;  %v5030_v38 = vld [vmem:[#allocation47_spill] sm:$0xff]  ;;  %v5031_v14 = vld [vmem:[#allocation33_spill] sm:$0xff] }
0x1335   :  { %v726_v6 = vadd.f32 %v721_v52, %v488_v19  ;;  %v752_v48 = vadd.f32 %v747_v25, %v514_v42  ;;  %v754_v39 = vadd.f32 %v5018_v54, %v516_v29  ;;  %v802_v47 = vsel %vm187_vm0, %v5022_v40, %v5024_v32  ;;  %v5027_v19 = vld [vmem:[#allocation45_spill] sm:$0xff]  ;;  %v5028_v29 = vld [vmem:[#allocation32_spill] sm:$0xff]  ;;  %v5034_v25 = vld [vmem:[#allocation51_spill] sm:$0xff] }
0x1336   :  { %v4135_v61 = vpop.permute.xlu1 %1585  ;;  %v753_v58 = vadd.f32 %v748_v0, %v515_v31  ;;  %v779_v57 = vadd.f32 %v774_v22, %v541_v45  ;;  %v781_v28 = vadd.f32 %v5021_v5, %v543_v7  ;;  %v828_v35 = vsel %vm187_vm0, %v5026_v10, %v5025_v51  ;;  %v5035_v54 = vld [vmem:[#allocation50_spill] sm:$0xff]  ;;  %v5036_v37 = vld [vmem:[#allocation53_spill] sm:$0xff]  ;;  %v5037_v22 = vld [vmem:[#allocation52_spill] sm:$0xff] }
0x1337   :  { %v4144_v53 = vpop.permute.xlu0 %1587  ;;  %v780_v11 = vadd.f32 %v775_v24, %v542_v33  ;;  %v806_v8 = vadd.f32 %v801_v12, %v568_v4  ;;  %v829_v42 = vsel %vm187_vm0, %v5025_v51, %v5027_v19  ;;  %v855_v20 = vsel %vm187_vm0, %v5029_v60, %v5028_v29  ;;  %v5032_v33 = vld [vmem:[#allocation48_spill] sm:$0xff]  ;;  %v5038_v36 = vld [vmem:[#allocation55_spill] sm:$0xff]  ;;  %v5039_v12 = vld [vmem:[#allocation54_spill] sm:$0xff] }
0x1338   :  { %v807_v45 = vadd.f32 %v802_v47, %v569_v34  ;;  %v808_v7 = vadd.f32 %v5024_v32, %v570_v44  ;;  %v856_v56 = vsel %vm187_vm0, %v5028_v29, %v5030_v38  ;;  %v882_v4 = vsel %vm187_vm0, %v5032_v33, %v5031_v14  ;;  %v5047_v33 = vld [vmem:[#allocation62_spill] sm:$0xff] }
0x1339   :  { %v833_v41 = vadd.f32 %v828_v35, %v595_v9  ;;  %v835_v52 = vadd.f32 %v5027_v19, %v597_v62  ;;  %v883_v26 = vsel %vm187_vm0, %v5031_v14, %v5033_v23  ;;  %v905_v34 = vsel %vm61_vm8, %v5035_v54, %v5034_v25  ;;  %v5041_v19 = vld [vmem:[#allocation56_spill] sm:$0xff]  ;;  %v5046_v14 = vld [vmem:[#allocation63_spill] sm:$0xff] }
0x133a   :  { %v4160_v15 = vpop.permute.xlu1 %1589  ;;  %v834_v44 = vadd.f32 %v829_v42, %v596_v18  ;;  %v860_v0 = vadd.f32 %v855_v20, %v622_v21  ;;  %v862_v43 = vadd.f32 %v5030_v38, %v624_v63  ;;  %v927_v5 = vsel %vm61_vm8, %v5037_v22, %v5036_v37  ;;  %v5043_v20 = vld [vmem:[#allocation58_spill] sm:$0xff] }
0x133b   :  { %v4169_v30 = vpop.permute.xlu0 %1613  ;;  %v861_v9 = vadd.f32 %v856_v56, %v623_v46  ;;  %v887_v62 = vadd.f32 %v882_v4, %v649_v3  ;;  %v889_v40 = vadd.f32 %v5033_v23, %v651_v17  ;;  %v949_v32 = vsel %vm61_vm8, %v5039_v12, %v5038_v36  ;;  %v5040_v3 = vld [vmem:[#allocation57_spill] sm:$0xff] }
0x133c   :  { %v888_v18 = vadd.f32 %v883_v26, %v650_v16  ;;  %v911_v21 = vadd.f32 %v5034_v25, %v700_v50  ;;  %v909_v63 = vadd.f32 %v5035_v54, %v698_v13  ;;  %v910_v51 = vadd.f32 %v905_v34, %v699_v55  ;;  %v5042_v16 = vld [vmem:[#allocation59_spill] sm:$0xff]  ;;  %v5048_v26 = vld [vmem:[#allocation64_spill] sm:$0xff]  ;;  %v5049_v25 = vld [vmem:[#allocation65_spill] sm:$0xff] }
0x133d   :  { %v933_v10 = vadd.f32 %v5036_v37, %v727_v2  ;;  %v931_v35 = vadd.f32 %v5037_v22, %v725_v49  ;;  %v932_v46 = vadd.f32 %v927_v5, %v726_v6  ;;  %v971_v17 = vsel %vm61_vm8, %v5041_v19, %v5040_v3  ;;  %v5044_v2 = vld [vmem:[#allocation61_spill] sm:$0xff]  ;;  %v5045_v6 = vld [vmem:[#allocation60_spill] sm:$0xff]  ;;  %v5050_v37 = vld [vmem:[#allocation66_spill] sm:$0xff] }
0x133e   :  { %v4186_v1 = vpop.permute.xlu1 %1615  ;;  %v955_v42 = vadd.f32 %v5038_v36, %v754_v39  ;;  %v953_v29 = vadd.f32 %v5039_v12, %v752_v48  ;;  %v954_v60 = vadd.f32 %v949_v32, %v753_v58  ;;  %v993_v50 = vsel %vm61_vm8, %v5043_v20, %v5042_v16  ;;  %v5052_v22 = vld [vmem:[#allocation74_spill] sm:$0xff]  ;;  %v5053_v12 = vld [vmem:[#allocation67_spill] sm:$0xff] }
0x133f   :  { %v4194_v31 = vpop.permute.xlu0 %1617  ;;  %v977_v55 = vadd.f32 %v5040_v3, %v781_v28  ;;  %v975_v49 = vadd.f32 %v5041_v19, %v779_v57  ;;  %v1015_v38 = vsel %vm61_vm8, %v5045_v6, %v5044_v2  ;;  %v976_v39 = vadd.f32 %v971_v17, %v780_v11  ;;  %v5054_v32 = vld [vmem:[#allocation75_spill] sm:$0xff]  ;;  %v5055_v17 = vld [vmem:[#allocation76_spill] sm:$0xff] }
0x1340   :  { %v999_v48 = vadd.f32 %v5042_v16, %v808_v7  ;;  %v997_v58 = vadd.f32 %v5043_v20, %v806_v8  ;;  %v1037_v4 = vsel %vm61_vm8, %v5047_v33, %v5046_v14  ;;  %v998_v23 = vadd.f32 %v993_v50, %v807_v45  ;;  %v5051_v7 = vld [vmem:[#allocation73_spill] sm:$0xff]  ;;  %v5056_v20 = vld [vmem:[#allocation68_spill] sm:$0xff] }
0x1341   :  { %v1021_v28 = vadd.f32 %v5044_v2, %v835_v52  ;;  %v1019_v57 = vadd.f32 %v5045_v6, %v833_v41  ;;  %v1059_v54 = vsel %vm61_vm8, %v5049_v25, %v5048_v26  ;;  %v1020_v34 = vadd.f32 %v1015_v38, %v834_v44  ;;  %v5057_v50 = vld [vmem:[#allocation77_spill] sm:$0xff]  ;;  %v5058_v6 = vld [vmem:[#allocation78_spill] sm:$0xff] }
0x1342   :  { %v4214_v24 = vpop.permute.xlu1 %1640  ;;  %v1043_v11 = vadd.f32 %v5046_v14, %v862_v43  ;;  %v1112_v8 = vsel %vm1111_vm10, %v5051_v7, %v5050_v37  ;;  %v1113_v5 = vsel %vm1111_vm10, %v5050_v37, %v5052_v22  ;;  %v1041_v52 = vadd.f32 %v5047_v33, %v860_v0  ;;  %v5060_v33 = vld [vmem:[#allocation79_spill] sm:$0xff]  ;;  %v5062_v37 = vld [vmem:[#allocation70_spill] sm:$0xff] }
0x1343   :  { %v4220_v47 = vpop.permute.xlu0 %1642  ;;  %v1042_v41 = vadd.f32 %v1037_v4, %v861_v9  ;;  %v1065_v36 = vadd.f32 %v5048_v26, %v889_v40  ;;  %v1139_v44 = vsel %vm1111_vm10, %v5054_v32, %v5053_v12  ;;  %v1063_v3 = vadd.f32 %v5049_v25, %v887_v62  ;;  %v5061_v26 = vld [vmem:[#allocation80_spill] sm:$0xff] }
0x1344   :  { %v1064_v19 = vadd.f32 %v1059_v54, %v888_v18  ;;  %v1140_v16 = vsel %vm1111_vm10, %v5053_v12, %v5055_v17  ;;  %v1166_v0 = vsel %vm1111_vm10, %v5057_v50, %v5056_v20  ;;  %v1117_v9 = vadd.f32 %v5051_v7, %v909_v63  ;;  %v5059_v18 = vld [vmem:[#allocation69_spill] sm:$0xff] }
0x1345   :  { %v1118_v40 = vadd.f32 %v1112_v8, %v910_v51  ;;  %v1119_v2 = vadd.f32 %v1113_v5, %v911_v21  ;;  %v1167_v38 = vsel %vm1111_vm10, %v5056_v20, %v5058_v6  ;;  %v1144_v14 = vadd.f32 %v5054_v32, %v931_v35  ;;  %v5063_v7 = vld [vmem:[#allocation81_spill] sm:$0xff]  ;;  %v5064_v5 = vld [vmem:[#allocation82_spill] sm:$0xff]  ;;  %v5065_v32 = vld [vmem:[#allocation71_spill] sm:$0xff] }
0x1346   :  { %v4234_v13 = vpop.permute.xlu1 %1644  ;;  %v1145_v62 = vadd.f32 %v1139_v44, %v932_v46  ;;  %v1193_v4 = vsel %vm1111_vm10, %v5060_v33, %v5059_v18  ;;  %v1194_v25 = vsel %vm1111_vm10, %v5059_v18, %v5061_v26  ;;  %v1146_v63 = vadd.f32 %v1140_v16, %v933_v10  ;;  %v5066_v44 = vld [vmem:[#allocation83_spill] sm:$0xff]  ;;  %v5067_v16 = vld [vmem:[#allocation84_spill] sm:$0xff]  ;;  %v5070_v6 = vld [vmem:[#allocation86_spill] sm:$0xff] }
0x1347   :  { %v4241_v56 = vpop.permute.xlu0 %1667  ;;  %v1171_v21 = vadd.f32 %v5057_v50, %v953_v29  ;;  %v1172_v51 = vadd.f32 %v1166_v0, %v954_v60  ;;  %v1220_v8 = vsel %vm1111_vm10, %v5063_v7, %v5062_v37  ;;  %v1173_v46 = vadd.f32 %v1167_v38, %v955_v42  ;;  %v5068_v42 = vld [vmem:[#allocation72_spill] sm:$0xff]  ;;  %v5069_v0 = vld [vmem:[#allocation85_spill] sm:$0xff] }
0x1348   :  { %v1198_v22 = vadd.f32 %v5060_v33, %v975_v49  ;;  %v1221_v12 = vsel %vm1111_vm10, %v5062_v37, %v5064_v5  ;;  %v1247_v10 = vsel %vm1111_vm10, %v5066_v44, %v5065_v32  ;;  %v1199_v17 = vadd.f32 %v1193_v4, %v976_v39  ;;  %v5071_v18 = vld [vmem:[#allocation89_spill] sm:$0xff]  ;;  %v5072_v33 = vld [vmem:[#allocation87_spill] sm:$0xff]  ;;  %v5073_v26 = vld [vmem:[#allocation88_spill] sm:$0xff] }
0x1349   :  { %v1200_v29 = vadd.f32 %v1194_v25, %v977_v55  ;;  %v1225_v60 = vadd.f32 %v5063_v7, %v997_v58  ;;  %v1248_v20 = vsel %vm1111_vm10, %v5065_v32, %v5067_v16  ;;  %v1226_v50 = vadd.f32 %v1220_v8, %v998_v23  ;;  %v5075_v5 = vld [vmem:[#allocation90_spill] sm:$0xff]  ;;  %v5076_v32 = vld [vmem:[#allocation95_spill] sm:$0xff] }
0x134a   :  { %v4260_v45 = vpop.permute.xlu1 %1669  ;;  %v1274_v49 = vsel %vm1111_vm10, %v5069_v0, %v5068_v42  ;;  %v1275_v38 = vsel %vm1111_vm10, %v5068_v42, %v5070_v6  ;;  %v1301_v39 = vsel %vm1111_vm10, %v5072_v33, %v5071_v18  ;;  %v1227_v58 = vadd.f32 %v1221_v12, %v999_v48  ;;  %v5077_v42 = vld [vmem:[#allocation96_spill] sm:$0xff]  ;;  %v5080_v6 = vld [vmem:[#allocation98_spill] sm:$0xff] }
0x134b   :  { %v4267_v43 = vpop.permute.xlu0 %1671  ;;  %v1252_v4 = vadd.f32 %v5066_v44, %v1019_v57  ;;  %v1253_v23 = vadd.f32 %v1247_v10, %v1020_v34  ;;  %v1302_v25 = vsel %vm1111_vm10, %v5071_v18, %v5073_v26  ;;  %v1254_v7 = vadd.f32 %v1248_v20, %v1021_v28  ;;  %v5078_v10 = vld [vmem:[#allocation91_spill] sm:$0xff]  ;;  %v5079_v20 = vld [vmem:[#allocation97_spill] sm:$0xff] }
0x134c   :  { %v1279_v8 = vadd.f32 %v5069_v0, %v1041_v52  ;;  %v1352_v16 = vsel %vm1351_vm5, %v5076_v32, %v5075_v5  ;;  %v1353_v48 = vsel %vm1351_vm5, %v5075_v5, %v5077_v42  ;;  %v1280_v57 = vadd.f32 %v1274_v49, %v1042_v41  ;;  %v5084_v49 = vld [vmem:[#allocation100_spill] sm:$0xff] }
0x134d   :  { %v1281_v34 = vadd.f32 %v1275_v38, %v1043_v11  ;;  %v1306_v12 = vadd.f32 %v5072_v33, %v1063_v3  ;;  %v1307_v44 = vadd.f32 %v1301_v39, %v1064_v19  ;;  %v1308_v28 = vadd.f32 %v1302_v25, %v1065_v36  ;;  %v5082_v3 = vld [vmem:[#allocation92_spill] sm:$0xff]  ;;  %v5083_v19 = vld [vmem:[#allocation99_spill] sm:$0xff]  ;;  %v5086_v39 = vld [vmem:[#allocation93_spill] sm:$0xff] }
0x134e   :  { %v4287_v54 = vpop.permute.xlu1 %1694  ;;  %v1357_v52 = vadd.f32 %v5076_v32, %v1117_v9  ;;  %v1379_v0 = vsel %vm1351_vm5, %v5079_v20, %v5078_v10  ;;  %v1380_v18 = vsel %vm1351_vm5, %v5078_v10, %v5080_v6  ;;  %v1358_v11 = vadd.f32 %v1352_v16, %v1118_v40  ;;  %v5087_v25 = vld [vmem:[#allocation101_spill] sm:$0xff]  ;;  %v5088_v40 = vld [vmem:[#allocation102_spill] sm:$0xff]  ;;  %v5090_v16 = vld [vmem:[#allocation103_spill] sm:$0xff] }
0x134f   :  { %v4293_v35 = vpop.permute.xlu0 %1696  ;;  %v1359_v41 = vadd.f32 %v1353_v48, %v1119_v2  ;;  %v1406_v36 = vsel %vm1351_vm5, %v5083_v19, %v5082_v3  ;;  %v1407_v9 = vsel %vm1351_vm5, %v5082_v3, %v5084_v49  ;;  %v1384_v33 = vadd.f32 %v5079_v20, %v1144_v14  ;;  %v5089_v32 = vld [vmem:[#allocation94_spill] sm:$0xff]  ;;  %v5091_v3 = vld [vmem:[#allocation104_spill] sm:$0xff] }
0x1350   :  { %v1433_v5 = vsel %vm1351_vm5, %v5087_v25, %v5086_v39  ;;  %v1434_v2 = vsel %vm1351_vm5, %v5086_v39, %v5088_v40  ;;  %v1460_v42 = vsel %vm1351_vm5, %v5090_v16, %v5089_v32  ;;  %v1385_v48 = vadd.f32 %v1379_v0, %v1145_v62  ;;  %v5093_v39 = vld [vmem:[#allocation105_spill] sm:$0xff] }
0x1351   :  { %v1386_v10 = vadd.f32 %v1380_v18, %v1146_v63  ;;  %v1411_v6 = vadd.f32 %v5083_v19, %v1171_v21  ;;  %v1461_v14 = vsel %vm1351_vm5, %v5089_v32, %v5091_v3  ;;  %v1412_v20 = vadd.f32 %v1406_v36, %v1172_v51  ;;  %v5095_v19 = vld [vmem:[#allocation107_spill] sm:$0xff] }
0x1352   :  { %v4315_v55 = vpop.permute.xlu1 %1698  ;;  %v1413_v49 = vadd.f32 %v1407_v9, %v1173_v46  ;;  %v1439_v62 = vadd.f32 %v1433_v5, %v1199_v17  ;;  %v1440_v63 = vadd.f32 %v1434_v2, %v1200_v29  ;;  %v1465_v21 = vadd.f32 %v5090_v16, %v1225_v60  ;;  %v5096_v9 = vld [vmem:[#allocation109_spill] sm:$0xff]  ;;  %v5097_v17 = vld [vmem:[#allocation110_spill] sm:$0xff]  ;;  %v5098_v5 = vld [vmem:[#allocation111_spill] sm:$0xff] }
0x1353   :  { %v4323_v37 = vpop.permute.xlu0 %1721  ;;  %v1466_v0 = vadd.f32 %v1460_v42, %v1226_v50  ;;  %v1467_v46 = vadd.f32 %v1461_v14, %v1227_v58  ;;  %v1520_v29 = vadd.f32 %v5097_v17, %v1280_v57  ;;  %v1521_v2 = vadd.f32 %v5098_v5, %v1281_v34  ;;  %v5099_v16 = vld [vmem:[#allocation113_spill] sm:$0xff] }
0x1354   :  { %5074 = vst [vmem:[#allocation11_spill] sm:$0xff] %v4323_v37  ;;  %v5092_v37 = vld [vmem:[#allocation108_spill] sm:$0xff]  ;;  %v4391_v50 = vstv %s4317_s15  ;;  %v4394_v58 = vstv %s4325_s16  ;;  %v4397_v32 = vstv %s4334_s17  ;;  %v4409_v57 = vstv %s4358_s19 }
0x1355   :  { %v1488_v40 = vsel %vm1351_vm5, %v5093_v39, %v5092_v37  ;;  %v1493_v37 = vadd.f32 %v5095_v19, %v1253_v23  ;;  %v1546_v34 = vadd.f32 %v4004_v59, %v1306_v12  ;;  %v1547_v42 = vadd.f32 %v5099_v16, %v1307_v44 }
0x1356   :  { %v4346_v26 = vpop.permute.xlu1 %1723  ;;  %v1494_v36 = vadd.f32 %v1488_v40, %v1254_v7  ;;  %v4403_v7 = vstv %s4337_s18  ;;  %v1593_v3 = vsel %vm1591_vm11, %v4144_v53, %v4160_v15  ;;  %v4417_v14 = vstv %s4370_s20 }
0x1357   :  { %5081 = vst [vmem:[#allocation12_spill] sm:$0xff] %v4346_v26  ;;  %v4356_v38 = vpop.permute.xlu0 %1725  ;;  %v1548_v39 = vadd.f32 %v4036_v27, %v1308_v28  ;;  %v1619_v40 = vsel %vm1591_vm11, %v4169_v30, %v4186_v1  ;;  %v1646_v59 = vsel %vm1591_vm11, %v4214_v24, %v4220_v47  ;;  %v1597_v12 = vadd.f32 %v4135_v61, %v1357_v52 }
0x1358   :  { %5085 = vst [vmem:[#allocation6_spill] sm:$0xff] %v4356_v38  ;;  %v1438_v38 = vadd.f32 %v5087_v25, %v1198_v22  ;;  %v5094_v22 = vld [vmem:[#allocation106_spill] sm:$0xff]  ;;  %v1519_v25 = vadd.f32 %v5096_v9, %v1279_v8  ;;  %v4406_v8 = vstv %s4348_s27  ;;  %v4434_v15 = vstv %s4382_s21 }
0x1359   :  { %v1492_v18 = vadd.f32 %v5094_v22, %v1252_v4  ;;  %v1592_v4 = vsel %vm1591_vm11, %v4135_v61, %v4144_v53  ;;  %v1620_v22 = vsel %vm1591_vm11, %v4186_v1, %v4194_v31  ;;  %v1647_v53 = vsel %vm1591_vm11, %v4220_v47, %v4234_v13 }
0x135a   :  { %v4380_v26 = vpop.permute.xlu1 %1748  ;;  %v1598_v44 = vadd.f32 %v1592_v4, %v1358_v11  ;;  %v1599_v28 = vadd.f32 %v1593_v3, %v1359_v41  ;;  %v1624_v19 = vadd.f32 %v4169_v30, %v1384_v33  ;;  %v1673_v1 = vsel %vm1591_vm11, %v4241_v56, %v4260_v45 }
0x135b   :  { %v1751_v51 = vpop.permute.xlu0 %1750  ;;  %v1674_v31 = vsel %vm1591_vm11, %v4260_v45, %v4267_v43  ;;  %v1625_v52 = vadd.f32 %v1619_v40, %v1385_v48  ;;  %v4443_v11 = vadd.f32 %v1620_v22, %v1386_v10  ;;  %v4446_v47 = vadd.f32 %v4214_v24, %v1411_v6  ;;  %v5101_v10 = vld [vmem:[#allocation11_spill] sm:$0xff] }
0x135c   :  { %v4448_v13 = vadd.f32 %v1646_v59, %v1412_v20  ;;  %v4450_v41 = vadd.f32 %v1647_v53, %v1413_v49  ;;  %v4453_v30 = vadd.f32 %v4241_v56, %v1438_v38  ;;  %v1700_v33 = vsel %vm1591_vm11, %v4287_v54, %v4293_v35 }
0x135d   :  { %v1701_v45 = vsel %vm1591_vm11, %v4293_v35, %v4315_v55  ;;  %v4461_v43 = vadd.f32 %v1673_v1, %v1439_v62  ;;  %v4463_v48 = vadd.f32 %v1674_v31, %v1440_v63  ;;  %v4472_v49 = vadd.f32 %v4287_v54, %v1465_v21 }
0x135e   :  { %v1753_v60 = vpop.permute.xlu1 %1752  ;;  %v5100_v24 = vld [vmem:[#allocation12_spill] sm:$0xff]  ;;  %v1754_v9 = vsel %vm1591_vm11, %v4380_v26, %v1751_v51  ;;  %v4477_v63 = vadd.f32 %v1700_v33, %v1466_v0  ;;  %v4479_v17 = vadd.f32 %v1701_v45, %v1467_v46  ;;  %v4482_v5 = vadd.f32 %v5101_v10, %v1492_v18 }
0x135f   :  { %v1776_v23 = vpop.permute.xlu0 %1775  ;;  %v1727_v6 = vsel %vm1591_vm11, %v5101_v10, %v5100_v24  ;;  %v5102_v20 = vld [vmem:[#allocation6_spill] sm:$0xff]  ;;  %v1755_v35 = vsel %vm1591_vm11, %v1751_v51, %v1753_v60  ;;  %v4490_v40 = vadd.f32 %v4380_v26, %v1519_v25  ;;  %v4492_v51 = vadd.f32 %v1754_v9, %v1520_v29 }
0x1360   :  { %v1728_v56 = vsel %vm1591_vm11, %v5100_v24, %v5102_v20  ;;  %v4485_v16 = vadd.f32 %v1727_v6, %v1493_v37  ;;  %v4494_v0 = vadd.f32 %v1755_v35, %v1521_v2 }
0x1361   :  { %v4487_v54 = vadd.f32 %v1728_v56, %v1494_v36  ;;  %v4498_v36 = vadd.f32 %v1776_v23, %v1546_v34 }
0x1362   :  { %v1778_v27 = vpop.permute.xlu1 %1777 }
0x1363   :  { %v1780_v61 = vpop.permute.xlu0 %1779  ;;  %v1781_v46 = vsel %vm1591_vm11, %v1776_v23, %v1778_v27 }
0x1364   :  { %v1782_v18 = vsel %vm1591_vm11, %v1778_v27, %v1780_v61  ;;  %v4501_v31 = vadd.f32 %v1781_v46, %v1547_v42 }
0x1365   :  { %v4503_v33 = vadd.f32 %v1782_v18, %v1548_v39 }
0x1366   :  { %v1826_v38 = vpop.permute.xlu1 %1825 }
0x1367   :  { %v1837_v55 = vadd.f32 %v1826_v38, %v1597_v12  ;;  %v1828_v62 = vpop.permute.xlu0 %1827 }
0x1368   :  { %v1832_v4 = vsel %vm1831_vm12, %v1826_v38, %v1828_v62 }
0x1369   :  { %v2032_v21 = vrot.slane %v1837_v55, 1  ;;  %v1838_v3 = vadd.f32 %v1832_v4, %v1598_v44  ;;  %v2041_v59 = vrot.slane %v1837_v55, 2  ;;  %v2050_v53 = vrot.slane %v1837_v55, 3 }
0x136a   :  { %v1830_v60 = vpop.permute.xlu1 %1829 }
0x136b   :  { %v2038_v22 = vadd.f32 %v2032_v21, %v1837_v55  ;;  %v2033_v37 = vrot.slane %v1838_v3, 1  ;;  %v1854_v12 = vpop.permute.xlu0 %1853  ;;  %v1833_v44 = vsel %vm1831_vm12, %v1828_v62, %v1830_v60  ;;  %v2042_v1 = vrot.slane %v1838_v3, 2 }
0x136c   :  { %v1864_v26 = vadd.f32 %v1854_v12, %v1624_v19  ;;  %v1839_v2 = vadd.f32 %v1833_v44, %v1599_v28  ;;  %v2051_v45 = vrot.slane %v1838_v3, 3 }
0x136d   :  { %v2047_v25 = vadd.f32 %v2041_v59, %v2038_v22  ;;  %v2039_v29 = vadd.f32 %v2033_v37, %v1838_v3 }
0x136e   :  { %v2135_v27 = vrot.slane %v1864_v26, 1  ;;  %v1856_v61 = vpop.permute.xlu1 %1855  ;;  %v2034_v6 = vrot.slane %v1839_v2, 1  ;;  %v2144_v23 = vrot.slane %v1864_v26, 2  ;;  %v2153_v56 = vrot.slane %v1864_v26, 3 }
0x136f   :  { %v2056_v24 = vadd.f32 %v2050_v53, %v2047_v25  ;;  %v2048_v10 = vadd.f32 %v2042_v1, %v2039_v29  ;;  %v1858_v34 = vpop.permute.xlu0 %1857  ;;  %v1859_v19 = vsel %vm1831_vm12, %v1854_v12, %v1856_v61  ;;  %v2043_v42 = vrot.slane %v1839_v2, 2 }
0x1370   :  { %v2141_v20 = vadd.f32 %v2135_v27, %v1864_v26  ;;  %v1860_v38 = vsel %vm1831_vm12, %v1856_v61, %v1858_v34  ;;  %v2040_v28 = vadd.f32 %v2034_v6, %v1839_v2  ;;  %v1865_v35 = vadd.f32 %v1859_v19, %v1625_v52 }
0x1371   :  { %v2057_v9 = vadd.f32 %v2051_v45, %v2048_v10  ;;  %v4508_v39 = vadd.f32 %v4391_v50, %v2056_v24  ;;  %v2052_v55 = vrot.slane %v1839_v2, 3  ;;  %v1866_v4 = vadd.f32 %v1860_v38, %v4443_v11 }
0x1372   :  { %v2150_v62 = vadd.f32 %v2144_v23, %v2141_v20  ;;  %v1881_v21 = vpop.permute.xlu1 %1880  ;;  %v2049_v46 = vadd.f32 %v2043_v42, %v2040_v28  ;;  %v2136_v60 = vrot.slane %v1865_v35, 1  ;;  %v2145_v18 = vrot.slane %v1865_v35, 2 }
0x1373   :  { %v4512_v3 = vadd.f32 %v4391_v50, %v2057_v9  ;;  %v1883_v22 = vpop.permute.xlu0 %1882  ;;  %v2154_v37 = vrot.slane %v1865_v35, 3  ;;  %v2137_v12 = vrot.slane %v1866_v4, 1  ;;  %v2146_v53 = vrot.slane %v1866_v4, 2 }
0x1374   :  { %v2159_v59 = vadd.f32 %v2153_v56, %v2150_v62  ;;  %v2058_v52 = vadd.f32 %v2052_v55, %v2049_v46  ;;  %v2142_v44 = vadd.f32 %v2136_v60, %v1865_v35  ;;  %v2155_v26 = vrot.slane %v1866_v4, 3 }
0x1375   :  { %v1891_v25 = vadd.f32 %v1881_v21, %v4446_v47  ;;  %v2143_v11 = vadd.f32 %v2137_v12, %v1866_v4  ;;  %v1886_v1 = vsel %vm1831_vm12, %v1881_v21, %v1883_v22  ;;  %v2066_v45 = vcombine.low %v4508_v39, %v4512_v3 }
0x1376   :  { %v4516_v29 = vadd.f32 %v4394_v58, %v2159_v59  ;;  %v1885_v2 = vpop.permute.xlu1 %1884  ;;  %v2151_v27 = vadd.f32 %v2145_v18, %v2142_v44  ;;  %v1892_v34 = vadd.f32 %v1886_v1, %v4448_v13  ;;  %v4526_v9 = vadd.f32 %v4391_v50, %v2058_v52 }
0x1377   :  { %v2235_v61 = vrot.slane %v1891_v25, 1  ;;  %v2244_v24 = vrot.slane %v1891_v25, 2  ;;  %v2253_v10 = vrot.slane %v1891_v25, 3  ;;  %v1908_v6 = vpop.permute.xlu0 %1907  ;;  %v2152_v23 = vadd.f32 %v2146_v53, %v2143_v11 }
0x1378   :  { %v1887_v47 = vsel %vm1831_vm12, %v1883_v22, %v1885_v2  ;;  %v1918_v20 = vadd.f32 %v1908_v6, %v4453_v30  ;;  %v2160_v56 = vadd.f32 %v2154_v37, %v2151_v27  ;;  %v2236_v42 = vrot.slane %v1892_v34, 1 }
0x1379   :  { %v2241_v19 = vadd.f32 %v2235_v61, %v1891_v25  ;;  %v1893_v38 = vadd.f32 %v1887_v47, %v4450_v41  ;;  %v4528_v28 = vadd.f32 %v2155_v26, %v2152_v23  ;;  %v2245_v35 = vrot.slane %v1892_v34, 2 }
0x137a   :  { %v2254_v55 = vrot.slane %v1892_v34, 3  ;;  %v1910_v62 = vpop.permute.xlu1 %1909  ;;  %v4531_v4 = vadd.f32 %v4394_v58, %v2160_v56  ;;  %v2242_v60 = vadd.f32 %v2236_v42, %v1892_v34  ;;  %v2335_v22 = vrot.slane %v1918_v20, 1 }
0x137b   :  { %v2250_v13 = vadd.f32 %v2244_v24, %v2241_v19  ;;  %v2237_v21 = vrot.slane %v1893_v38, 1  ;;  %v2246_v46 = vrot.slane %v1893_v38, 2  ;;  %v1912_v30 = vpop.permute.xlu0 %1911  ;;  %v2255_v18 = vrot.slane %v1893_v38, 3 }
0x137c   :  { %v2344_v41 = vrot.slane %v1918_v20, 2  ;;  %v2353_v37 = vrot.slane %v1918_v20, 3  ;;  %v1913_v12 = vsel %vm1831_vm12, %v1908_v6, %v1910_v62  ;;  %v2251_v53 = vadd.f32 %v2245_v35, %v2242_v60 }
0x137d   :  { %v2259_v59 = vadd.f32 %v2253_v10, %v2250_v13  ;;  %v2243_v50 = vadd.f32 %v2237_v21, %v1893_v38  ;;  %v2341_v52 = vadd.f32 %v2335_v22, %v1918_v20  ;;  %v1919_v44 = vadd.f32 %v1913_v12, %v4461_v43 }
0x137e   :  { %v1914_v26 = vsel %vm1831_vm12, %v1910_v62, %v1912_v30  ;;  %v1935_v25 = vpop.permute.xlu1 %1934  ;;  %v2260_v61 = vadd.f32 %v2254_v55, %v2251_v53  ;;  %v2101_v53 = vcombine.high %v4526_v9, %v4526_v9 }
0x137f   :  { %v4537_v11 = vadd.f32 %v4397_v32, %v2259_v59  ;;  %v2252_v1 = vadd.f32 %v2246_v46, %v2243_v50  ;;  %v1920_v2 = vadd.f32 %v1914_v26, %v4463_v48  ;;  %v1945_v27 = vadd.f32 %v1935_v25, %v4472_v49  ;;  %v1937_v6 = vpop.permute.xlu0 %1936  ;;  %v5103_v46 = vld [vmem:[#allocation112_spill] sm:$0xff] }
0x1380   :  { %v2350_v24 = vadd.f32 %v2344_v41, %v2341_v52  ;;  %v2336_v10 = vrot.slane %v1919_v44, 1  ;;  %v2345_v23 = vrot.slane %v1919_v44, 2  ;;  %v2354_v47 = vrot.slane %v1919_v44, 3 }
0x1381   :  { %v4541_v34 = vadd.f32 %v2255_v18, %v2252_v1  ;;  %v2337_v43 = vrot.slane %v1920_v2, 1  ;;  %v2346_v20 = vrot.slane %v1920_v2, 2  ;;  %v4544_v56 = vadd.f32 %v4397_v32, %v2260_v61 }
0x1382   :  { %v2359_v19 = vadd.f32 %v2353_v37, %v2350_v24  ;;  %v2342_v38 = vadd.f32 %v2336_v10, %v1919_v44  ;;  %v2355_v42 = vrot.slane %v1920_v2, 3  ;;  %v2435_v48 = vrot.slane %v1945_v27, 1  ;;  %v1939_v55 = vpop.permute.xlu1 %1938 }
0x1383   :  { %v2343_v35 = vadd.f32 %v2337_v43, %v1920_v2  ;;  %v2444_v62 = vrot.slane %v1945_v27, 2  ;;  %v2453_v49 = vrot.slane %v1945_v27, 3  ;;  %v2073_v30 = vrot.slane %v2066_v45, %v5103_v46  ;;  %v1962_v52 = vpop.permute.xlu0 %1961 }
0x1384   :  { %v4547_v13 = vadd.f32 %v4403_v7, %v2359_v19  ;;  %v2351_v21 = vadd.f32 %v2345_v23, %v2342_v38  ;;  %v2080_v60 = vrot.slane %v4526_v9, %v5103_v46  ;;  %v2441_v22 = vadd.f32 %v2435_v48, %v1945_v27 }
0x1385   :  { %v2352_v18 = vadd.f32 %v2346_v20, %v2343_v35  ;;  %v1940_v41 = vsel %vm1831_vm12, %v1935_v25, %v1937_v6  ;;  %v2100_v59 = vcombine.high %v4508_v39, %v4512_v3  ;;  %v1941_v1 = vsel %vm1831_vm12, %v1937_v6, %v1939_v55 }
0x1386   :  { %v2360_v50 = vadd.f32 %v2354_v47, %v2351_v21  ;;  %v2081_v37 = vcombine.low %v2073_v30, %v2080_v60  ;;  %v1946_v12 = vadd.f32 %v1940_v41, %v4477_v63  ;;  %v2450_v45 = vadd.f32 %v2444_v62, %v2441_v22  ;;  %v1964_v24 = vpop.permute.xlu1 %1963 }
0x1387   :  { %v4558_v44 = vadd.f32 %v2355_v42, %v2352_v18  ;;  %v2108_v26 = vrot.slane %v2100_v59, %v5103_v46  ;;  %v2115_v61 = vrot.slane %v2101_v53, %v5103_v46  ;;  %v1947_v9 = vadd.f32 %v1941_v1, %v4479_v17  ;;  %v1966_v62 = vpop.permute.xlu0 %1965 }
0x1388   :  { %v4563_v25 = vadd.f32 %v4403_v7, %v2360_v50  ;;  %v2088_v39 = vrot.slane %v2081_v37, %v5103_v46  ;;  %v2436_v3 = vrot.slane %v1946_v12, 1  ;;  %v2445_v2 = vrot.slane %v1946_v12, 2 }
0x1389   :  { %v2459_v27 = vadd.f32 %v2453_v49, %v2450_v45  ;;  %v2454_v63 = vrot.slane %v1946_v12, 3  ;;  %v1972_v23 = vadd.f32 %v1962_v52, %v4482_v5  ;;  %v2165_v6 = vadd.f32 %v4394_v58, %v4528_v28 }
0x138a   :  { %2089 = vrot.lane.b32.xlu1 %v2088_v39, %s2990_s10  ;;  %v2442_v10 = vadd.f32 %v2436_v3, %v1946_v12  ;;  %v2169_v47 = vcombine.low %v4516_v29, %v4531_v4  ;;  %v2116_v20 = vcombine.low %v2108_v26, %v2115_v61  ;;  %v2437_v19 = vrot.slane %v1947_v9, 1  ;;  %v1989_v50 = vpop.permute.xlu1 %1988 }
0x138b   :  { %v4575_v43 = vadd.f32 %v4406_v8, %v2459_v27  ;;  %v2446_v38 = vrot.slane %v1947_v9, 2  ;;  %v2455_v17 = vrot.slane %v1947_v9, 3  ;;  %v2535_v35 = vrot.slane %v1972_v23, 1 }
0x138c   :  { %v2451_v42 = vadd.f32 %v2445_v2, %v2442_v10  ;;  %v2544_v48 = vrot.slane %v1972_v23, 2  ;;  %v2123_v49 = vrot.slane %v2116_v20, %v5103_v46  ;;  %v2443_v5 = vadd.f32 %v2437_v19, %v1947_v9 }
0x138d   :  { %v2553_v55 = vrot.slane %v1972_v23, 3  ;;  %v2176_v58 = vrot.slane %v2169_v47, %v5103_v46  ;;  %v2541_v21 = vadd.f32 %v2535_v35, %v1972_v23  ;;  %v2183_v30 = vrot.slane %v2165_v6, %v5103_v46 }
0x138e   :  { %v2460_v28 = vadd.f32 %v2454_v63, %v2451_v42  ;;  %v2200_v60 = vcombine.high %v4516_v29, %v4531_v4  ;;  %2124 = vrot.lane.b32.xlu0 %v2123_v49, %s2990_s10  ;;  %v2452_v18 = vadd.f32 %v2446_v38, %v2443_v5  ;;  %v2201_v22 = vcombine.high %v2165_v6, %v2165_v6  ;;  %v1993_v42 = vpop.permute.xlu1 %1992 }
0x138f   :  { %v1967_v41 = vsel %vm1831_vm12, %v1962_v52, %v1964_v24  ;;  %v1968_v59 = vsel %vm1831_vm12, %v1964_v24, %v1966_v62  ;;  %v2550_v12 = vadd.f32 %v2544_v48, %v2541_v21  ;;  %v2184_v53 = vcombine.low %v2176_v58, %v2183_v30  ;;  %v1991_v24 = vpop.permute.xlu0 %1990 }
0x1390   :  { %v4586_v37 = vadd.f32 %v4406_v8, %v2460_v28  ;;  %v2208_v45 = vrot.slane %v2200_v60, %v5103_v46  ;;  %v4589_v26 = vadd.f32 %v2455_v17, %v2452_v18  ;;  %v2215_v29 = vrot.slane %v2201_v22, %v5103_v46 }
0x1391   :  { %v1973_v4 = vadd.f32 %v1967_v41, %v4485_v16  ;;  %v1974_v1 = vadd.f32 %v1968_v59, %v4487_v54  ;;  %v2559_v39 = vadd.f32 %v2553_v55, %v2550_v12  ;;  %v2191_v52 = vrot.slane %v2184_v53, %v5103_v46 }
0x1392   :  { %v1999_v3 = vadd.f32 %v1989_v50, %v4490_v40  ;;  %v2265_v2 = vadd.f32 %v4397_v32, %v4541_v34  ;;  %v2216_v27 = vcombine.low %v2208_v45, %v2215_v29  ;;  %v2269_v34 = vcombine.low %v4537_v11, %v4544_v56 }
0x1393   :  { %v2536_v63 = vrot.slane %v1973_v4, 1  ;;  %v2545_v61 = vrot.slane %v1973_v4, 2  ;;  %v2554_v9 = vrot.slane %v1973_v4, 3  ;;  %v4599_v10 = vadd.f32 %v4409_v57, %v2559_v39  ;;  %2192 = vrot.lane.b32.xlu1 %v2191_v52, %s2990_s10  ;;  %v2016_v18 = vpop.permute.xlu0 %2015 }
0x1394   :  { %v2537_v16 = vrot.slane %v1974_v1, 1  ;;  %v2546_v54 = vrot.slane %v1974_v1, 2  ;;  %v2555_v23 = vrot.slane %v1974_v1, 3  ;;  %v2223_v6 = vrot.slane %v2216_v27, %v5103_v46 }
0x1395   :  { %v2542_v47 = vadd.f32 %v2536_v63, %v1973_v4  ;;  %v2635_v40 = vrot.slane %v1999_v3, 1  ;;  %v2644_v20 = vrot.slane %v1999_v3, 2  ;;  %v2653_v32 = vrot.slane %v1999_v3, 3 }
0x1396   :  { %v2543_v19 = vadd.f32 %v2537_v16, %v1974_v1  ;;  %v2283_v38 = vrot.slane %v2265_v2, %v5103_v46  ;;  %2224 = vrot.lane.b32.xlu0 %v2223_v6, %s2990_s10  ;;  %v1994_v48 = vsel %vm1831_vm12, %v1989_v50, %v1991_v24  ;;  %v2300_v62 = vcombine.high %v4537_v11, %v4544_v56 }
0x1397   :  { %v2551_v17 = vadd.f32 %v2545_v61, %v2542_v47  ;;  %v2641_v35 = vadd.f32 %v2635_v40, %v1999_v3  ;;  %v2276_v5 = vrot.slane %v2269_v34, %v5103_v46  ;;  %v2000_v55 = vadd.f32 %v1994_v48, %v4492_v51 }
0x1398   :  { %v2552_v49 = vadd.f32 %v2546_v54, %v2543_v19  ;;  %v2301_v58 = vcombine.high %v2265_v2, %v2265_v2  ;;  %v2308_v30 = vrot.slane %v2300_v62, %v5103_v46  ;;  %v1995_v60 = vsel %vm1831_vm12, %v1991_v24, %v1993_v42 }
0x1399   :  { %v2560_v28 = vadd.f32 %v2554_v9, %v2551_v17  ;;  %v2650_v21 = vadd.f32 %v2644_v20, %v2641_v35  ;;  %v2284_v41 = vcombine.low %v2276_v5, %v2283_v38  ;;  %v2636_v59 = vrot.slane %v2000_v55, 1  ;;  %v2018_v9 = vpop.permute.xlu1 %2017 }
0x139a   :  { %v4614_v22 = vadd.f32 %v2555_v23, %v2552_v49  ;;  %v2645_v50 = vrot.slane %v2000_v55, 2  ;;  %v2654_v12 = vrot.slane %v2000_v55, 3  ;;  %v2315_v51 = vrot.slane %v2301_v58, %v5103_v46 }
0x139b   :  { %v4617_v11 = vadd.f32 %v4409_v57, %v2560_v28  ;;  %v2659_v56 = vadd.f32 %v2653_v32, %v2650_v21  ;;  %v2291_v53 = vrot.slane %v2284_v41, %v5103_v46  ;;  %v2642_v45 = vadd.f32 %v2636_v59, %v2000_v55 }
0x139c   :  { %v2001_v29 = vadd.f32 %v1995_v60, %v4494_v0  ;;  %v2026_v4 = vadd.f32 %v2016_v18, %v4498_v36  ;;  %v2316_v39 = vcombine.low %v2308_v30, %v2315_v51  ;;  %v2365_v52 = vadd.f32 %v4403_v7, %v4558_v44  ;;  %v2020_v44 = vpop.permute.xlu0 %2019 }
0x139d   :  { %v4624_v1 = vadd.f32 %v4417_v14, %v2659_v56  ;;  %v2369_v3 = vcombine.low %v4547_v13, %v4563_v25  ;;  %2292 = vrot.lane.b32.xlu1 %v2291_v53, %s2990_s10  ;;  %v2651_v2 = vadd.f32 %v2645_v50, %v2642_v45  ;;  %v2400_v40 = vcombine.high %v4547_v13, %v4563_v25 }
0x139e   :  { %v2637_v27 = vrot.slane %v2001_v29, 1  ;;  %v2646_v63 = vrot.slane %v2001_v29, 2  ;;  %v2655_v61 = vrot.slane %v2001_v29, 3  ;;  %v2323_v0 = vrot.slane %v2316_v39, %v5103_v46 }
0x139f   :  { %v2735_v36 = vrot.slane %v2026_v4, 1  ;;  %v2744_v24 = vrot.slane %v2026_v4, 2  ;;  %v2753_v16 = vrot.slane %v2026_v4, 3  ;;  %v2660_v54 = vadd.f32 %v2654_v12, %v2651_v2 }
0x13a0   :  { %v2643_v23 = vadd.f32 %v2637_v27, %v2001_v29  ;;  %v2376_v6 = vrot.slane %v2369_v3, %v5103_v46  ;;  %v2383_v7 = vrot.slane %v2365_v52, %v5103_v46  ;;  %2324 = vrot.lane.b32.xlu0 %v2323_v0, %s2990_s10  ;;  %v2401_v20 = vcombine.high %v2365_v52, %v2365_v52 }
0x13a1   :  { %v2741_v47 = vadd.f32 %v2735_v36, %v2026_v4  ;;  %v2021_v19 = vsel %vm1831_vm12, %v2016_v18, %v2018_v9  ;;  %v2664_v32 = vadd.f32 %v4417_v14, %v2660_v54  ;;  %v2408_v35 = vrot.slane %v2400_v40, %v5103_v46 }
0x13a2   :  { %v2652_v34 = vadd.f32 %v2646_v63, %v2643_v23  ;;  %v2384_v38 = vcombine.low %v2376_v6, %v2383_v7  ;;  %v2027_v42 = vadd.f32 %v2021_v19, %v4501_v31  ;;  %v2415_v48 = vrot.slane %v2401_v20, %v5103_v46 }
0x13a3   :  { %v2750_v17 = vadd.f32 %v2744_v24, %v2741_v47  ;;  %v2022_v62 = vsel %vm1831_vm12, %v2018_v9, %v2020_v44  ;;  %v2465_v30 = vadd.f32 %v4406_v8, %v4589_v26  ;;  %v2469_v60 = vcombine.low %v4575_v43, %v4586_v37 }
0x13a4   :  { %v2661_v49 = vadd.f32 %v2655_v61, %v2652_v34  ;;  %v2391_v5 = vrot.slane %v2384_v38, %v5103_v46  ;;  %v2736_v13 = vrot.slane %v2027_v42, 1  ;;  %v2745_v25 = vrot.slane %v2027_v42, 2 }
0x13a5   :  { %v2759_v55 = vadd.f32 %v2753_v16, %v2750_v17  ;;  %v2416_v58 = vcombine.low %v2408_v35, %v2415_v48  ;;  %v2754_v28 = vrot.slane %v2027_v42, 3  ;;  %v2028_v21 = vadd.f32 %v2022_v62, %v4503_v33 }
0x13a6   :  { %2392 = vrot.lane.b32.xlu1 %v2391_v5, %s2990_s10  ;;  %v2742_v31 = vadd.f32 %v2736_v13, %v2027_v42  ;;  %v2500_v18 = vcombine.high %v4575_v43, %v4586_v37  ;;  %v2476_v51 = vrot.slane %v2469_v60, %v5103_v46  ;;  %v2483_v53 = vrot.slane %v2465_v30, %v5103_v46 }
0x13a7   :  { %v2763_v41 = vadd.f32 %v4434_v15, %v2759_v55  ;;  %v2423_v59 = vrot.slane %v2416_v58, %v5103_v46  ;;  %v2737_v50 = vrot.slane %v2028_v21, 1  ;;  %v2746_v56 = vrot.slane %v2028_v21, 2 }
0x13a8   :  { %v2751_v12 = vadd.f32 %v2745_v25, %v2742_v31  ;;  %v2755_v33 = vrot.slane %v2028_v21, 3  ;;  %v2501_v26 = vcombine.high %v2465_v30, %v2465_v30  ;;  %v2508_v45 = vrot.slane %v2500_v18, %v5103_v46 }
0x13a9   :  { %2424 = vrot.lane.b32.xlu0 %v2423_v59, %s2990_s10  ;;  %v2743_v8 = vadd.f32 %v2737_v50, %v2028_v21  ;;  %v2565_v43 = vadd.f32 %v4409_v57, %v4614_v22  ;;  %v2484_v29 = vcombine.low %v2476_v51, %v2483_v53  ;;  %v2569_v4 = vcombine.low %v4599_v10, %v4617_v11 }
0x13aa   :  { %v2760_v37 = vadd.f32 %v2754_v28, %v2751_v12  ;;  %v2600_v39 = vcombine.high %v4599_v10, %v4617_v11  ;;  %v2515_v3 = vrot.slane %v2501_v26, %v5103_v46  ;;  %v2665_v10 = vadd.f32 %v4417_v14, %v2661_v49 }
0x13ab   :  { %v2752_v52 = vadd.f32 %v2746_v56, %v2743_v8  ;;  %v2583_v2 = vrot.slane %v2565_v43, %v5103_v46  ;;  %v2601_v27 = vcombine.high %v2565_v43, %v2565_v43  ;;  %v2491_v61 = vrot.slane %v2484_v29, %v5103_v46 }
0x13ac   :  { %v2764_v63 = vadd.f32 %v4434_v15, %v2760_v37  ;;  %v2576_v57 = vrot.slane %v2569_v4, %v5103_v46  ;;  %v2608_v22 = vrot.slane %v2600_v39, %v5103_v46  ;;  %v2516_v0 = vcombine.low %v2508_v45, %v2515_v3 }
0x13ad   :  { %v2761_v9 = vadd.f32 %v2755_v33, %v2752_v52  ;;  %v2615_v36 = vrot.slane %v2601_v27, %v5103_v46  ;;  %2492 = vrot.lane.b32.xlu1 %v2491_v61, %s2990_s10  ;;  %v2669_v24 = vcombine.low %v4624_v1, %v2664_v32  ;;  %v2700_v16 = vcombine.high %v4624_v1, %v2664_v32 }
0x13ae   :  { %v2584_v11 = vcombine.low %v2576_v57, %v2583_v2  ;;  %v2769_v54 = vcombine.low %v2763_v41, %v2764_v63  ;;  %v2523_v23 = vrot.slane %v2516_v0, %v5103_v46  ;;  %v2683_v7 = vrot.slane %v2665_v10, %v5103_v46 }
0x13af   :  { %v2616_v6 = vcombine.low %v2608_v22, %v2615_v36  ;;  %v2701_v44 = vcombine.high %v2665_v10, %v2665_v10  ;;  %v2676_v40 = vrot.slane %v2669_v24, %v5103_v46  ;;  %v2708_v14 = vrot.slane %v2700_v16, %v5103_v46 }
0x13b0   :  { %v2591_v47 = vrot.slane %v2584_v11, %v5103_v46  ;;  %v2765_v20 = vadd.f32 %v4434_v15, %v2761_v9  ;;  %2524 = vrot.lane.b32.xlu0 %v2523_v23, %s2990_s10  ;;  %v2776_v32 = vrot.slane %v2769_v54, %v5103_v46  ;;  %v2800_v34 = vcombine.high %v2763_v41, %v2764_v63 }
0x13b1   :  { %v2623_v19 = vrot.slane %v2616_v6, %v5103_v46  ;;  %v2715_v1 = vrot.slane %v2701_v44, %v5103_v46  ;;  %v2684_v38 = vcombine.low %v2676_v40, %v2683_v7  ;;  %v5104_v28 = vlaneseq }
0x13b2   :  { %2592 = vrot.lane.b32.xlu1 %v2591_v47, %s2990_s10  ;;  %v2783_v42 = vrot.slane %v2765_v20, %v5103_v46  ;;  %v2801_v17 = vcombine.high %v2765_v20, %v2765_v20  ;;  %v2808_v48 = vrot.slane %v2800_v34, %v5103_v46 }
0x13b3   :  { %v2716_v35 = vcombine.low %v2708_v14, %v2715_v1  ;;  %v2691_v15 = vrot.slane %v2684_v38, %v5103_v46  ;;  %vm4699_vm13 = vcmp.lt.s32.totalorder %v5104_v28, 256 }
0x13b4   :  { %v2784_v62 = vcombine.low %v2776_v32, %v2783_v42  ;;  %v2815_v49 = vrot.slane %v2801_v17, %v5103_v46  ;;  %2624 = vrot.lane.b32.xlu0 %v2623_v19, %s2990_s10 }
0x13b5   :  { %v2723_v5 = vrot.slane %v2716_v35, %v5103_v46 }
0x13b6   :  { %2692 = vrot.lane.b32.xlu1 %v2691_v15, %s2990_s10  ;;  %v2791_v13 = vrot.slane %v2784_v62, %v5103_v46  ;;  %v2816_v25 = vcombine.low %v2808_v48, %v2815_v49 }
0x13b8   :  { %v2823_v55 = vrot.slane %v2816_v25, %v5103_v46  ;;  %2724 = vrot.lane.b32.xlu0 %v2723_v5, %s2990_s10 }
0x13ba   :  { %2792 = vrot.lane.b32.xlu1 %v2791_v13, %s2990_s10 }
0x13bc   :  { %2824 = vrot.lane.b32.xlu0 %v2823_v55, %s2990_s10 }
0x13fc   :  { %v2090_v58 = vpop.permute.xlu1 %2089 }
0x13fd   :  { %v2091_v31 = vrot.slane %v2090_v58, 1 }
0x13ff   :  { %v2092_v30 = vsel %vm1804_vm7, %v2090_v58, %v2091_v31 }
0x1400   :  { %2098 = vst.msk [vmem:[%s4803_s4] ss:$8 sm:$0x3] %vm4699_vm13, %v2092_v30  ;;  %v2125_v46 = vpop.permute.xlu0 %2124 }
0x1401   :  { %v2126_v60 = vrot.slane %v2125_v46, 1 }
0x1403   :  { %v2127_v18 = vsel %vm1804_vm7, %v2125_v46, %v2126_v60 }
0x1404   :  { %2929 = vst.msk [vmem:[%s4803_s4 + $0x10] ss:$8 sm:$0x3] %vm4699_vm13, %v2127_v18 }
0x1405   :  { %v2193_v41 = vpop.permute.xlu1 %2192 }
0x1406   :  { %v2194_v59 = vrot.slane %v2193_v41, 1 }
0x1408   :  { %v2195_v50 = vsel %vm1804_vm7, %v2193_v41, %v2194_v59  ;;  %v2225_v56 = vpop.permute.xlu0 %2224 }
0x1409   :  { %2930 = vst.msk [vmem:[%s4803_s4 + $0x1] ss:$8 sm:$0x3] %vm4699_vm13, %v2195_v50  ;;  %v2226_v12 = vrot.slane %v2225_v56, 1 }
0x140b   :  { %v2227_v33 = vsel %vm1804_vm7, %v2225_v56, %v2226_v12 }
0x140c   :  { %2931 = vst.msk [vmem:[%s4803_s4 + $0x11] ss:$8 sm:$0x3] %vm4699_vm13, %v2227_v33 }
0x140f   :  { %v2293_v51 = vpop.permute.xlu1 %2292 }
0x1410   :  { %v2294_v53 = vrot.slane %v2293_v51, 1 }
0x1412   :  { %v2295_v8 = vsel %vm1804_vm7, %v2293_v51, %v2294_v53  ;;  %v2325_v26 = vpop.permute.xlu0 %2324 }
0x1413   :  { %2932 = vst.msk [vmem:[%s4803_s4 + $0x2] ss:$8 sm:$0x3] %vm4699_vm13, %v2295_v8  ;;  %v2326_v45 = vrot.slane %v2325_v26, 1 }
0x1415   :  { %v2327_v43 = vsel %vm1804_vm7, %v2325_v26, %v2326_v45 }
0x1416   :  { %2933 = vst.msk [vmem:[%s4803_s4 + $0x12] ss:$8 sm:$0x3] %vm4699_vm13, %v2327_v43 }
0x1418   :  { %v2393_v37 = vpop.permute.xlu1 %2392 }
0x1419   :  { %v2394_v29 = vrot.slane %v2393_v37, 1 }
0x141b   :  { %v2395_v4 = vsel %vm1804_vm7, %v2393_v37, %v2394_v29  ;;  %v2425_v39 = vpop.permute.xlu0 %2424 }
0x141c   :  { %2934 = vst.msk [vmem:[%s4803_s4 + $0x3] ss:$8 sm:$0x3] %vm4699_vm13, %v2395_v4  ;;  %v2426_v52 = vrot.slane %v2425_v39, 1 }
0x141e   :  { %v2427_v3 = vsel %vm1804_vm7, %v2425_v39, %v2426_v52 }
0x141f   :  { %2935 = vst.msk [vmem:[%s4803_s4 + $0x13] ss:$8 sm:$0x3] %vm4699_vm13, %v2427_v3  ;;  %v2493_v2 = vpop.permute.xlu1 %2492 }
0x1420   :  { %v2494_v27 = vrot.slane %v2493_v2, 1 }
0x1422   :  { %v2495_v63 = vsel %vm1804_vm7, %v2493_v2, %v2494_v27  ;;  %v2525_v61 = vpop.permute.xlu0 %2524 }
0x1423   :  { %2936 = vst.msk [vmem:[%s4803_s4 + $0x4] ss:$8 sm:$0x3] %vm4699_vm13, %v2495_v63  ;;  %v2526_v57 = vrot.slane %v2525_v61, 1 }
0x1424   :  { %v2593_v22 = vpop.permute.xlu1 %2592 }
0x1425   :  { %v2594_v9 = vrot.slane %v2593_v22, 1  ;;  %v2527_v0 = vsel %vm1804_vm7, %v2525_v61, %v2526_v57 }
0x1426   :  { %2937 = vst.msk [vmem:[%s4803_s4 + $0x14] ss:$8 sm:$0x3] %vm4699_vm13, %v2527_v0  ;;  %v2625_v10 = vpop.permute.xlu0 %2624 }
0x1427   :  { %v2595_v36 = vsel %vm1804_vm7, %v2593_v22, %v2594_v9  ;;  %v2626_v11 = vrot.slane %v2625_v10, 1 }
0x1428   :  { %2938 = vst.msk [vmem:[%s4803_s4 + $0x5] ss:$8 sm:$0x3] %vm4699_vm13, %v2595_v36  ;;  %v2693_v24 = vpop.permute.xlu1 %2692 }
0x1429   :  { %v2694_v16 = vrot.slane %v2693_v24, 1  ;;  %v2627_v54 = vsel %vm1804_vm7, %v2625_v10, %v2626_v11 }
0x142a   :  { %2939 = vst.msk [vmem:[%s4803_s4 + $0x15] ss:$8 sm:$0x3] %vm4699_vm13, %v2627_v54  ;;  %v2725_v6 = vpop.permute.xlu0 %2724 }
0x142b   :  { %v2695_v23 = vsel %vm1804_vm7, %v2693_v24, %v2694_v16  ;;  %v2726_v7 = vrot.slane %v2725_v6, 1 }
0x142c   :  { %2940 = vst.msk [vmem:[%s4803_s4 + $0x6] ss:$8 sm:$0x3] %vm4699_vm13, %v2695_v23  ;;  %v2793_v44 = vpop.permute.xlu1 %2792 }
0x142d   :  { %v2794_v47 = vrot.slane %v2793_v44, 1  ;;  %v2727_v40 = vsel %vm1804_vm7, %v2725_v6, %v2726_v7 }
0x142e   :  { %2941 = vst.msk [vmem:[%s4803_s4 + $0x16] ss:$8 sm:$0x3] %vm4699_vm13, %v2727_v40  ;;  %v2825_v20 = vpop.permute.xlu0 %2824 }
0x142f   :  { %v2795_v14 = vsel %vm1804_vm7, %v2793_v44, %v2794_v47  ;;  %v2826_v19 = vrot.slane %v2825_v20, 1 }
0x1430   :  { %2942 = vst.msk [vmem:[%s4803_s4 + $0x7] ss:$8 sm:$0x3] %vm4699_vm13, %v2795_v14 }
0x1431   :  { %v2827_v1 = vsel %vm1804_vm7, %v2825_v20, %v2826_v19 }
0x1432   :  { %2943 = vst.msk [vmem:[%s4803_s4 + $0x17] ss:$8 sm:$0x3] %vm4699_vm13, %v2827_v1 }
0x1433   :  { %2836 = vsyncpa [#allocation4], 1 }

</bundles_post_ra>
